<compile_context>
chip_gen: v7x
topology: tpu7x:2x2x1
jax: 0.10.0
libtpu: 0.0.40
codegen_flags: <defaults>
</compile_context>

<pallas_src>
import functools

import jax
import jax.numpy as jnp
from jax.experimental import pallas as pl
from jax.experimental.pallas import tpu as pltpu

EPS = 1e-8       # _norm_no_nan eps
LN_EPS = 1e-5    # torch.nn.LayerNorm default eps

# per-GVP activation flags: (apply relu to scalar, apply sigmoid before the wsv gate)
_MSG_ACTS = ((True, True), (True, True), (False, False))
_FF_ACTS = ((True, True), (False, False))


def _dot(a, b):
    return jnp.dot(a, b, preferred_element_type=jnp.float32)


# --------------------- in-kernel GVP building blocks (x/y/z layout) ----------

def _gvp_tail(s_pre, vhx, vhy, vhz, ws_vn, b, wv, wsv, bsv, relu_s, sigmoid_gate_in):
    """Shared GVP tail: vector norm, scalar linear, wv, vector gating, activations."""
    vn = jnp.sqrt(jnp.maximum(vhx * vhx + vhy * vhy + vhz * vhz, EPS))     # (B, h)
    s = s_pre + _dot(vn, ws_vn) + b                                        # (B, so)
    ox, oy, oz = _dot(vhx, wv), _dot(vhy, wv), _dot(vhz, wv)               # (B, vo)
    gate_in = jax.nn.sigmoid(s) if sigmoid_gate_in else s
    gate = jax.nn.sigmoid(_dot(gate_in, wsv) + bsv)                        # (B, vo)
    ox, oy, oz = ox * gate, oy * gate, oz * gate
    if relu_s:
        s = jnp.maximum(s, 0.0)
    return s, ox, oy, oz


def _gvp(s, vx, vy, vz, wh, ws_s, ws_vn, b, wv, wsv, bsv, relu_s, sigmoid_gate_in):
    vhx, vhy, vhz = _dot(vx, wh), _dot(vy, wh), _dot(vz, wh)
    return _gvp_tail(_dot(s, ws_s), vhx, vhy, vhz, ws_vn, b, wv, wsv, bsv,
                     relu_s, sigmoid_gate_in)


def _ln_tuple(s, vx, vy, vz, g, b):
    """LayerNorm on scalar channels + vector-channel RMS normalization."""
    mu = jnp.mean(s, axis=-1, keepdims=True)
    var = jnp.mean((s - mu) * (s - mu), axis=-1, keepdims=True)
    s = (s - mu) * jax.lax.rsqrt(var + LN_EPS) * g + b
    vn2 = jnp.maximum(vx * vx + vy * vy + vz * vz, EPS)        # per-channel |v|^2
    inv = jax.lax.rsqrt(jnp.mean(vn2, axis=-1, keepdims=True))
    return s, vx * inv, vy * inv, vz * inv


def _store_slab(out_ref, ns, nv, s, vx, vy, vz):
    """Write [s | vx | vy | vz] into a single lane-contiguous output slab."""
    out_ref[:, :ns] = s
    out_ref[:, ns:ns + nv] = vx
    out_ref[:, ns + nv:ns + 2 * nv] = vy
    out_ref[:, ns + 2 * nv:] = vz


# ----------------------------------- kernels ---------------------------------

def _message_kernel(ns, nv, *refs):
    """Fused 3-GVP message function over a tile of (edge, conformer) rows."""
    (sj_ref, vjx_ref, vjy_ref, vjz_ref,
     se_ref, vex_ref, vey_ref, vez_ref,
     si_ref, vix_ref, viy_ref, viz_ref) = refs[:12]
    w = [r[...] for r in refs[12:-1]]          # resident weights
    out_ref = refs[-1]

    sj, se, si = sj_ref[...], se_ref[...], si_ref[...]
    vjx, vjy, vjz = vjx_ref[...], vjy_ref[...], vjz_ref[...]
    vex, vey, vez = vex_ref[...], vey_ref[...], vez_ref[...]
    vix, viy, viz = vix_ref[...], viy_ref[...], viz_ref[...]

    # GVP #1 -- wh / ws pre-split along the [j | edge | i] concat boundaries,
    # so no in-kernel concatenation is needed.
    (wh_j, wh_e, wh_i, ws_sj, ws_se, ws_si, ws_vn1, b1, wv1, wsv1, bsv1) = w[:11]
    vhx = _dot(vjx, wh_j) + _dot(vex, wh_e) + _dot(vix, wh_i)
    vhy = _dot(vjy, wh_j) + _dot(vey, wh_e) + _dot(viy, wh_i)
    vhz = _dot(vjz, wh_j) + _dot(vez, wh_e) + _dot(viz, wh_i)
    s_pre = _dot(sj, ws_sj) + _dot(se, ws_se) + _dot(si, ws_si)
    s, vx, vy, vz = _gvp_tail(s_pre, vhx, vhy, vhz, ws_vn1, b1, wv1, wsv1, bsv1,
                              *_MSG_ACTS[0])

    # GVP #2, #3
    s, vx, vy, vz = _gvp(s, vx, vy, vz, *w[11:18], *_MSG_ACTS[1])
    s, vx, vy, vz = _gvp(s, vx, vy, vz, *w[18:25], *_MSG_ACTS[2])

    _store_slab(out_ref, ns, nv, s, vx, vy, vz)


def _node_kernel(ns, nv, *refs):
    """Residual + LayerNorm + 2-GVP feed-forward + residual + LayerNorm.
    dh arrives as an un-normalized edge sum slab; 1/deg scaling is fused here."""
    (xs_ref, xvx_ref, xvy_ref, xvz_ref, dh_ref, inv_ref) = refs[:6]
    w = [r[...] for r in refs[6:-1]]
    out_ref = refs[-1]

    ln0_g, ln0_b = w[0], w[1]
    ff1 = w[2:9]
    ff2 = w[9:16]
    ln1_g, ln1_b = w[16], w[17]

    dh = dh_ref[...]
    inv = inv_ref[...]                              # (tile, 1) = 1/deg (mean aggr)

    # x + dropout(mean(dh)) with eval-mode dropout == identity
    s0 = xs_ref[...] + dh[:, :ns] * inv
    v0x = xvx_ref[...] + dh[:, ns:ns + nv] * inv
    v0y = xvy_ref[...] + dh[:, ns + nv:ns + 2 * nv] * inv
    v0z = xvz_ref[...] + dh[:, ns + 2 * nv:] * inv
    s1, v1x, v1y, v1z = _ln_tuple(s0, v0x, v0y, v0z, ln0_g, ln0_b)

    fs, fvx, fvy, fvz = _gvp(s1, v1x, v1y, v1z, *ff1, *_FF_ACTS[0])
    fs, fvx, fvy, fvz = _gvp(fs, fvx, fvy, fvz, *ff2, *_FF_ACTS[1])

    s2, v2x, v2y, v2z = _ln_tuple(s1 + fs, v1x + fvx, v1y + fvy, v1z + fvz,
                                  ln1_g, ln1_b)
    _store_slab(out_ref, ns, nv, s2, v2x, v2y, v2z)


# ------------------------------ pallas_call wrapper ---------------------------

def _round_up(x, m):
    return ((x + m - 1) // m) * m


def _cdiv(a, b):
    return -(-a // b)


def _pad_rows(a, rows_padded):
    pad = rows_padded - a.shape[0]
    return a if pad == 0 else jnp.pad(a, ((0, pad), (0, 0)))


def _rowwise_pallas_call(kernel, data, weights, out_width, *, max_tile=1024):
    """Run `kernel` over row tiles of the 2-D `data` arrays; `weights` stay
    resident (full block, constant index_map). Returns the un-padded single
    output slab of shape (rows, out_width)."""
    rows = data[0].shape[0]
    # Balanced row tiles: multiple of 8 (dense sublanes), capped at `max_tile`
    # rows, sized so padding never exceeds ~8 rows per tile. Per-tile footprint
    # is far below the 16/32 MiB scoped-VMEM defaults of v5e/v6e/v7x.
    n_tiles = _cdiv(rows, max_tile)
    tile = _round_up(_cdiv(rows, n_tiles), 8)
    rows_padded = _round_up(rows, tile)

    data = [_pad_rows(a.astype(jnp.float32), rows_padded) for a in data]
    weights = [w.astype(jnp.float32) for w in weights]

    in_specs = ([pl.BlockSpec((tile, a.shape[1]), lambda i: (i, 0)) for a in data]
                + [pl.BlockSpec(w.shape, lambda i: (0, 0)) for w in weights])

    out = pl.pallas_call(
        kernel,
        grid=(rows_padded // tile,),
        in_specs=in_specs,
        out_specs=pl.BlockSpec((tile, out_width), lambda i: (i, 0)),
        out_shape=jax.ShapeDtypeStruct((rows_padded, out_width), jnp.float32),
        compiler_params=pltpu.CompilerParams(
            dimension_semantics=("parallel",),   # lets v7x shard rows over both TCs
            vmem_limit_bytes=32 * 1024 * 1024,
        ),
    )(*data, *weights)
    return out[:rows]


def _split_slab(o, ns, nv):
    return (o[:, :ns], o[:, ns:ns + nv],
            o[:, ns + nv:ns + 2 * nv], o[:, ns + 2 * nv:])


# ------------------------------ parameters ------------------------------------

def _init_gvp(key, si, vi, so, vo):
    h = max(vi, vo)
    k = jax.random.split(key, 7)
    sc = 0.1
    return {
        "wh":    sc * jax.random.normal(k[0], (vi, h), jnp.float32),
        "ws_s":  sc * jax.random.normal(k[1], (si, so), jnp.float32),
        "ws_vn": sc * jax.random.normal(k[2], (h, so), jnp.float32),
        "b":     sc * jax.random.normal(k[3], (1, so), jnp.float32),
        "wv":    sc * jax.random.normal(k[4], (h, vo), jnp.float32),
        "wsv":   sc * jax.random.normal(k[5], (so, vo), jnp.float32),
        "bsv":   sc * jax.random.normal(k[6], (1, vo), jnp.float32),
    }


def init_layer_params(key, ns, nv, se, ve):
    k = jax.random.split(key, 9)
    s_in, v_in = 2 * ns + se, 2 * nv + ve
    return {
        "msg": [_init_gvp(k[0], s_in, v_in, ns, nv),
                _init_gvp(k[1], ns, nv, ns, nv),
                _init_gvp(k[2], ns, nv, ns, nv)],
        "ff":  [_init_gvp(k[3], ns, nv, 4 * ns, 2 * nv),
                _init_gvp(k[4], 4 * ns, 2 * nv, ns, nv)],
        "ln0_g": 1.0 + 0.1 * jax.random.normal(k[5], (1, ns), jnp.float32),
        "ln0_b": 0.1 * jax.random.normal(k[6], (1, ns), jnp.float32),
        "ln1_g": 1.0 + 0.1 * jax.random.normal(k[7], (1, ns), jnp.float32),
        "ln1_b": 0.1 * jax.random.normal(k[8], (1, ns), jnp.float32),
    }


def _gvp_wlist(g):
    return [g["wh"], g["ws_s"], g["ws_vn"], g["b"], g["wv"], g["wsv"], g["bsv"]]


def _message_weights(params, ns, nv, se, ve):
    g1, g2, g3 = params["msg"]
    wh, ws_s = g1["wh"], g1["ws_s"]
    # split the first GVP's wh / ws along the [j | edge | i] concat boundaries
    out = [wh[:nv], wh[nv:nv + ve], wh[nv + ve:],
           ws_s[:ns], ws_s[ns:ns + se], ws_s[ns + se:],
           g1["ws_vn"], g1["b"], g1["wv"], g1["wsv"], g1["bsv"]]
    return out + _gvp_wlist(g2) + _gvp_wlist(g3)


def _node_weights(params):
    return ([params["ln0_g"], params["ln0_b"]]
            + _gvp_wlist(params["ff"][0]) + _gvp_wlist(params["ff"][1])
            + [params["ln1_g"], params["ln1_b"]])


# ------------------------------ layer forward ---------------------------------

def multi_gvp_conv_layer_forward(params, x_s, x_v, edge_index, e_s, e_v):
    """MultiGVPConvLayer forward (eval mode).
    x_s: (N, n_conf, ns), x_v: (N, n_conf, nv, 3), edge_index: (2, E) int32
    e_s: (E, n_conf, se), e_v: (E, n_conf, ve, 3)
    Returns (out_s (N, n_conf, ns), out_v (N, n_conf, nv, 3))."""
    n_nodes, n_conf, ns = x_s.shape
    nv = x_v.shape[2]
    se = e_s.shape[-1]
    ve = e_v.shape[-2]
    n_edges = edge_index.shape[1]
    src, dst = edge_index[0], edge_index[1]
    out_width = ns + 3 * nv

    def comps(v):   # (..., c, 3) -> three (..., c) planes
        return v[..., 0], v[..., 1], v[..., 2]

    xvx, xvy, xvz = comps(x_v)
    evx, evy, evz = comps(e_v)

    def edge_rows(a):   # (E, n_conf, f) -> (E*n_conf, f)
        return a.reshape(n_edges * n_conf, a.shape[-1])

    # TODO(synk): the per-edge gather and the scatter-sum aggregation stay in
    # XLA; fusing them into the message kernel would need scalar-prefetched
    # edge_index with manual DMA gather/scatter.
    msg_in = [edge_rows(x_s[src]), edge_rows(xvx[src]), edge_rows(xvy[src]), edge_rows(xvz[src]),
              edge_rows(e_s),      edge_rows(evx),      edge_rows(evy),      edge_rows(evz),
              edge_rows(x_s[dst]), edge_rows(xvx[dst]), edge_rows(xvy[dst]), edge_rows(xvz[dst])]

    msg_out = _rowwise_pallas_call(
        functools.partial(_message_kernel, ns, nv),
        msg_in, _message_weights(params, ns, nv, se, ve), out_width)

    # aggr='mean' over incoming edges: one segment_sum over the whole message
    # slab; the 1/deg scaling is fused into the node kernel.
    deg = jax.ops.segment_sum(jnp.ones((n_edges,), jnp.float32), dst,
                              num_segments=n_nodes)
    inv_deg = 1.0 / jnp.maximum(deg, 1.0)
    inv_rows = jnp.broadcast_to(inv_deg[:, None], (n_nodes, n_conf)).reshape(
        n_nodes * n_conf, 1)

    dh = jax.ops.segment_sum(msg_out.reshape(n_edges, n_conf, out_width), dst,
                             num_segments=n_nodes)
    dh_rows = dh.reshape(n_nodes * n_conf, out_width)

    def node_rows(a):   # (N, n_conf, f) -> (N*n_conf, f)
        return a.reshape(n_nodes * n_conf, a.shape[-1])

    node_in = [node_rows(x_s), node_rows(xvx), node_rows(xvy), node_rows(xvz),
               dh_rows, inv_rows]

    node_out = _rowwise_pallas_call(
        functools.partial(_node_kernel, ns, nv),
        node_in, _node_weights(params), out_width)

    out_s, out_vx, out_vy, out_vz = _split_slab(node_out, ns, nv)
    out_s = out_s.reshape(n_nodes, n_conf, ns)
    out_v = jnp.stack([out_vx, out_vy, out_vz], axis=-1).reshape(n_nodes, n_conf, nv, 3)
    return out_s, out_v


# ------------------------------ pure-JAX reference ----------------------------

def _gvp_ref(s, v, p, relu_s, sigmoid_gate_in):
    vt = jnp.swapaxes(v, -1, -2)                       # (..., 3, vi)
    vh = vt @ p["wh"]                                  # (..., 3, h)
    vn = jnp.sqrt(jnp.maximum(jnp.sum(vh * vh, axis=-2), EPS))
    s_lin = s @ p["ws_s"] + vn @ p["ws_vn"] + p["b"]
    v_out = jnp.swapaxes(vh @ p["wv"], -1, -2)         # (..., vo, 3)
    gate_in = jax.nn.sigmoid(s_lin) if sigmoid_gate_in else s_lin
    gate = jax.nn.sigmoid(gate_in @ p["wsv"] + p["bsv"])
    v_out = v_out * gate[..., None]
    s_out = jax.nn.relu(s_lin) if relu_s else s_lin
    return s_out, v_out


def _ln_ref(s, v, g, b):
    mu = jnp.mean(s, -1, keepdims=True)
    var = jnp.mean((s - mu) ** 2, -1, keepdims=True)
    s = (s - mu) / jnp.sqrt(var + LN_EPS) * g + b
    vn = jnp.maximum(jnp.sum(v * v, -1, keepdims=True), EPS)
    vn = jnp.sqrt(jnp.mean(vn, -2, keepdims=True))
    return s, v / vn


def multi_gvp_conv_layer_reference(params, x_s, x_v, edge_index, e_s, e_v):
    n_nodes = x_s.shape[0]
    n_edges = edge_index.shape[1]
    src, dst = edge_index[0], edge_index[1]
    m_s = jnp.concatenate([x_s[src], e_s, x_s[dst]], axis=-1)
    m_v = jnp.concatenate([x_v[src], e_v, x_v[dst]], axis=-2)
    for p, (relu_s, sig) in zip(params["msg"], _MSG_ACTS):
        m_s, m_v = _gvp_ref(m_s, m_v, p, relu_s, sig)
    deg = jax.ops.segment_sum(jnp.ones((n_edges,), jnp.float32), dst,
                              num_segments=n_nodes)
    inv_deg = 1.0 / jnp.maximum(deg, 1.0)
    dh_s = jax.ops.segment_sum(m_s, dst, num_segments=n_nodes) * inv_deg[:, None, None]
    dh_v = jax.ops.segment_sum(m_v, dst, num_segments=n_nodes) * inv_deg[:, None, None, None]
    s1, v1 = _ln_ref(x_s + dh_s, x_v + dh_v, params["ln0_g"], params["ln0_b"])
    fs, fv = s1, v1
    for p, (relu_s, sig) in zip(params["ff"], _FF_ACTS):
        fs, fv = _gvp_ref(fs, fv, p, relu_s, sig)
    return _ln_ref(s1 + fs, v1 + fv, params["ln1_g"], params["ln1_b"])


# ----------------------------------- demo -------------------------------------

if __name__ == "__main__":
    NS, NV = 8, 4          # node dims (n_scalar, n_vector)
    SE, VE = 6, 2          # edge dims
    N_CONF = 3
    N_NODES = 12

    key = jax.random.PRNGKey(0)
    k_params, k_s, k_v, k_es, k_ev = jax.random.split(key, 5)

    # bidirectional ring graph: E = 2 * N_NODES edges
    idx = jnp.arange(N_NODES, dtype=jnp.int32)
    src = jnp.concatenate([idx, (idx + 1) % N_NODES])
    dst = jnp.concatenate([(idx + 1) % N_NODES, idx])
    edge_index = jnp.stack([src, dst])                  # (2, 24)
    n_edges = int(edge_index.shape[1])

    x_s = jax.random.normal(k_s, (N_NODES, N_CONF, NS), jnp.float32)
    x_v = jax.random.normal(k_v, (N_NODES, N_CONF, NV, 3), jnp.float32)
    e_s = jax.random.normal(k_es, (n_edges, N_CONF, SE), jnp.float32)
    e_v = jax.random.normal(k_ev, (n_edges, N_CONF, VE, 3), jnp.float32)

    params = init_layer_params(k_params, NS, NV, SE, VE)

    out_s, out_v = multi_gvp_conv_layer_forward(params, x_s, x_v, edge_index, e_s, e_v)
    jax.block_until_ready((out_s, out_v))

    ref_s, ref_v = multi_gvp_conv_layer_reference(params, x_s, x_v, edge_index, e_s, e_v)

    assert out_s.shape == (N_NODES, N_CONF, NS)
    assert out_v.shape == (N_NODES, N_CONF, NV, 3)
    assert jnp.allclose(out_s, ref_s, atol=1e-3, rtol=1e-3), \
        float(jnp.max(jnp.abs(out_s - ref_s)))
    assert jnp.allclose(out_v, ref_v, atol=1e-3, rtol=1e-3), \
        float(jnp.max(jnp.abs(out_v - ref_v)))

    print("KERNEL_OK")
</pallas_src>

<mosaic_0001>
module attributes {stable_mosaic.version = 11 : i64} {
  func.func @_message_kernel(%arg0: i32, %arg1: memref<72x8xf32, #tpu.memory_space<vmem>>, %arg2: memref<72x4xf32, #tpu.memory_space<vmem>>, %arg3: memref<72x4xf32, #tpu.memory_space<vmem>>, %arg4: memref<72x4xf32, #tpu.memory_space<vmem>>, %arg5: memref<72x6xf32, #tpu.memory_space<vmem>>, %arg6: memref<72x2xf32, #tpu.memory_space<vmem>>, %arg7: memref<72x2xf32, #tpu.memory_space<vmem>>, %arg8: memref<72x2xf32, #tpu.memory_space<vmem>>, %arg9: memref<72x8xf32, #tpu.memory_space<vmem>>, %arg10: memref<72x4xf32, #tpu.memory_space<vmem>>, %arg11: memref<72x4xf32, #tpu.memory_space<vmem>>, %arg12: memref<72x4xf32, #tpu.memory_space<vmem>>, %arg13: memref<4x10xf32, #tpu.memory_space<vmem>>, %arg14: memref<2x10xf32, #tpu.memory_space<vmem>>, %arg15: memref<4x10xf32, #tpu.memory_space<vmem>>, %arg16: memref<8x8xf32, #tpu.memory_space<vmem>>, %arg17: memref<6x8xf32, #tpu.memory_space<vmem>>, %arg18: memref<8x8xf32, #tpu.memory_space<vmem>>, %arg19: memref<10x8xf32, #tpu.memory_space<vmem>>, %arg20: memref<1x8xf32, #tpu.memory_space<vmem>>, %arg21: memref<10x4xf32, #tpu.memory_space<vmem>>, %arg22: memref<8x4xf32, #tpu.memory_space<vmem>>, %arg23: memref<1x4xf32, #tpu.memory_space<vmem>>, %arg24: memref<4x4xf32, #tpu.memory_space<vmem>>, %arg25: memref<8x8xf32, #tpu.memory_space<vmem>>, %arg26: memref<4x8xf32, #tpu.memory_space<vmem>>, %arg27: memref<1x8xf32, #tpu.memory_space<vmem>>, %arg28: memref<4x4xf32, #tpu.memory_space<vmem>>, %arg29: memref<8x4xf32, #tpu.memory_space<vmem>>, %arg30: memref<1x4xf32, #tpu.memory_space<vmem>>, %arg31: memref<4x4xf32, #tpu.memory_space<vmem>>, %arg32: memref<8x8xf32, #tpu.memory_space<vmem>>, %arg33: memref<4x8xf32, #tpu.memory_space<vmem>>, %arg34: memref<1x8xf32, #tpu.memory_space<vmem>>, %arg35: memref<4x4xf32, #tpu.memory_space<vmem>>, %arg36: memref<8x4xf32, #tpu.memory_space<vmem>>, %arg37: memref<1x4xf32, #tpu.memory_space<vmem>>, %arg38: memref<72x20xf32, #tpu.memory_space<vmem>>) attributes {dimension_semantics = [#tpu.dimension_semantics<parallel>], iteration_bounds = array<i64: 1>, scalar_prefetch = 0 : i64, scratch_operands = 0 : i64, tpu.core_type = #tpu.core_type<tc>, window_params = [{transform_indices = @transform_0, window_bounds = array<i64: 72, 8>}, {transform_indices = @transform_1, window_bounds = array<i64: 72, 4>}, {transform_indices = @transform_2, window_bounds = array<i64: 72, 4>}, {transform_indices = @transform_3, window_bounds = array<i64: 72, 4>}, {transform_indices = @transform_4, window_bounds = array<i64: 72, 6>}, {transform_indices = @transform_5, window_bounds = array<i64: 72, 2>}, {transform_indices = @transform_6, window_bounds = array<i64: 72, 2>}, {transform_indices = @transform_7, window_bounds = array<i64: 72, 2>}, {transform_indices = @transform_8, window_bounds = array<i64: 72, 8>}, {transform_indices = @transform_9, window_bounds = array<i64: 72, 4>}, {transform_indices = @transform_10, window_bounds = array<i64: 72, 4>}, {transform_indices = @transform_11, window_bounds = array<i64: 72, 4>}, {pipeline_mode = #tpu.pipeline_mode<synchronous>, transform_indices = @transform_12, window_bounds = array<i64: 4, 10>}, {pipeline_mode = #tpu.pipeline_mode<synchronous>, transform_indices = @transform_13, window_bounds = array<i64: 2, 10>}, {pipeline_mode = #tpu.pipeline_mode<synchronous>, transform_indices = @transform_14, window_bounds = array<i64: 4, 10>}, {pipeline_mode = #tpu.pipeline_mode<synchronous>, transform_indices = @transform_15, window_bounds = array<i64: 8, 8>}, {pipeline_mode = #tpu.pipeline_mode<synchronous>, transform_indices = @transform_16, window_bounds = array<i64: 6, 8>}, {pipeline_mode = #tpu.pipeline_mode<synchronous>, transform_indices = @transform_17, window_bounds = array<i64: 8, 8>}, {pipeline_mode = #tpu.pipeline_mode<synchronous>, transform_indices = @transform_18, window_bounds = array<i64: 10, 8>}, {pipeline_mode = #tpu.pipeline_mode<synchronous>, transform_indices = @transform_19, window_bounds = array<i64: 1, 8>}, {pipeline_mode = #tpu.pipeline_mode<synchronous>, transform_indices = @transform_20, window_bounds = array<i64: 10, 4>}, {pipeline_mode = #tpu.pipeline_mode<synchronous>, transform_indices = @transform_21, window_bounds = array<i64: 8, 4>}, {pipeline_mode = #tpu.pipeline_mode<synchronous>, transform_indices = @transform_22, window_bounds = array<i64: 1, 4>}, {pipeline_mode = #tpu.pipeline_mode<synchronous>, transform_indices = @transform_23, window_bounds = array<i64: 4, 4>}, {pipeline_mode = #tpu.pipeline_mode<synchronous>, transform_indices = @transform_24, window_bounds = array<i64: 8, 8>}, {pipeline_mode = #tpu.pipeline_mode<synchronous>, transform_indices = @transform_25, window_bounds = array<i64: 4, 8>}, {pipeline_mode = #tpu.pipeline_mode<synchronous>, transform_indices = @transform_26, window_bounds = array<i64: 1, 8>}, {pipeline_mode = #tpu.pipeline_mode<synchronous>, transform_indices = @transform_27, window_bounds = array<i64: 4, 4>}, {pipeline_mode = #tpu.pipeline_mode<synchronous>, transform_indices = @transform_28, window_bounds = array<i64: 8, 4>}, {pipeline_mode = #tpu.pipeline_mode<synchronous>, transform_indices = @transform_29, window_bounds = array<i64: 1, 4>}, {pipeline_mode = #tpu.pipeline_mode<synchronous>, transform_indices = @transform_30, window_bounds = array<i64: 4, 4>}, {pipeline_mode = #tpu.pipeline_mode<synchronous>, transform_indices = @transform_31, window_bounds = array<i64: 8, 8>}, {pipeline_mode = #tpu.pipeline_mode<synchronous>, transform_indices = @transform_32, window_bounds = array<i64: 4, 8>}, {pipeline_mode = #tpu.pipeline_mode<synchronous>, transform_indices = @transform_33, window_bounds = array<i64: 1, 8>}, {pipeline_mode = #tpu.pipeline_mode<synchronous>, transform_indices = @transform_34, window_bounds = array<i64: 4, 4>}, {pipeline_mode = #tpu.pipeline_mode<synchronous>, transform_indices = @transform_35, window_bounds = array<i64: 8, 4>}, {pipeline_mode = #tpu.pipeline_mode<synchronous>, transform_indices = @transform_36, window_bounds = array<i64: 1, 4>}, {transform_indices = @transform_37, window_bounds = array<i64: 72, 20>}]} {
    %c0 = arith.constant 0 : index
    %c0_0 = arith.constant 0 : index
    %0 = vector.load %arg13[%c0, %c0_0] : memref<4x10xf32, #tpu.memory_space<vmem>>, vector<4x10xf32>
    %c0_1 = arith.constant 0 : index
    %c0_2 = arith.constant 0 : index
    %1 = vector.load %arg14[%c0_1, %c0_2] : memref<2x10xf32, #tpu.memory_space<vmem>>, vector<2x10xf32>
    %c0_3 = arith.constant 0 : index
    %c0_4 = arith.constant 0 : index
    %2 = vector.load %arg15[%c0_3, %c0_4] : memref<4x10xf32, #tpu.memory_space<vmem>>, vector<4x10xf32>
    %c0_5 = arith.constant 0 : index
    %c0_6 = arith.constant 0 : index
    %3 = vector.load %arg16[%c0_5, %c0_6] : memref<8x8xf32, #tpu.memory_space<vmem>>, vector<8x8xf32>
    %c0_7 = arith.constant 0 : index
    %c0_8 = arith.constant 0 : index
    %4 = vector.load %arg17[%c0_7, %c0_8] : memref<6x8xf32, #tpu.memory_space<vmem>>, vector<6x8xf32>
    %c0_9 = arith.constant 0 : index
    %c0_10 = arith.constant 0 : index
    %5 = vector.load %arg18[%c0_9, %c0_10] : memref<8x8xf32, #tpu.memory_space<vmem>>, vector<8x8xf32>
    %c0_11 = arith.constant 0 : index
    %c0_12 = arith.constant 0 : index
    %6 = vector.load %arg19[%c0_11, %c0_12] : memref<10x8xf32, #tpu.memory_space<vmem>>, vector<10x8xf32>
    %c0_13 = arith.constant 0 : index
    %c0_14 = arith.constant 0 : index
    %7 = vector.load %arg20[%c0_13, %c0_14] : memref<1x8xf32, #tpu.memory_space<vmem>>, vector<1x8xf32>
    %c0_15 = arith.constant 0 : index
    %c0_16 = arith.constant 0 : index
    %8 = vector.load %arg21[%c0_15, %c0_16] : memref<10x4xf32, #tpu.memory_space<vmem>>, vector<10x4xf32>
    %c0_17 = arith.constant 0 : index
    %c0_18 = arith.constant 0 : index
    %9 = vector.load %arg22[%c0_17, %c0_18] : memref<8x4xf32, #tpu.memory_space<vmem>>, vector<8x4xf32>
    %c0_19 = arith.constant 0 : index
    %c0_20 = arith.constant 0 : index
    %10 = vector.load %arg23[%c0_19, %c0_20] : memref<1x4xf32, #tpu.memory_space<vmem>>, vector<1x4xf32>
    %c0_21 = arith.constant 0 : index
    %c0_22 = arith.constant 0 : index
    %11 = vector.load %arg24[%c0_21, %c0_22] : memref<4x4xf32, #tpu.memory_space<vmem>>, vector<4x4xf32>
    %c0_23 = arith.constant 0 : index
    %c0_24 = arith.constant 0 : index
    %12 = vector.load %arg25[%c0_23, %c0_24] : memref<8x8xf32, #tpu.memory_space<vmem>>, vector<8x8xf32>
    %c0_25 = arith.constant 0 : index
    %c0_26 = arith.constant 0 : index
    %13 = vector.load %arg26[%c0_25, %c0_26] : memref<4x8xf32, #tpu.memory_space<vmem>>, vector<4x8xf32>
    %c0_27 = arith.constant 0 : index
    %c0_28 = arith.constant 0 : index
    %14 = vector.load %arg27[%c0_27, %c0_28] : memref<1x8xf32, #tpu.memory_space<vmem>>, vector<1x8xf32>
    %c0_29 = arith.constant 0 : index
    %c0_30 = arith.constant 0 : index
    %15 = vector.load %arg28[%c0_29, %c0_30] : memref<4x4xf32, #tpu.memory_space<vmem>>, vector<4x4xf32>
    %c0_31 = arith.constant 0 : index
    %c0_32 = arith.constant 0 : index
    %16 = vector.load %arg29[%c0_31, %c0_32] : memref<8x4xf32, #tpu.memory_space<vmem>>, vector<8x4xf32>
    %c0_33 = arith.constant 0 : index
    %c0_34 = arith.constant 0 : index
    %17 = vector.load %arg30[%c0_33, %c0_34] : memref<1x4xf32, #tpu.memory_space<vmem>>, vector<1x4xf32>
    %c0_35 = arith.constant 0 : index
    %c0_36 = arith.constant 0 : index
    %18 = vector.load %arg31[%c0_35, %c0_36] : memref<4x4xf32, #tpu.memory_space<vmem>>, vector<4x4xf32>
    %c0_37 = arith.constant 0 : index
    %c0_38 = arith.constant 0 : index
    %19 = vector.load %arg32[%c0_37, %c0_38] : memref<8x8xf32, #tpu.memory_space<vmem>>, vector<8x8xf32>
    %c0_39 = arith.constant 0 : index
    %c0_40 = arith.constant 0 : index
    %20 = vector.load %arg33[%c0_39, %c0_40] : memref<4x8xf32, #tpu.memory_space<vmem>>, vector<4x8xf32>
    %c0_41 = arith.constant 0 : index
    %c0_42 = arith.constant 0 : index
    %21 = vector.load %arg34[%c0_41, %c0_42] : memref<1x8xf32, #tpu.memory_space<vmem>>, vector<1x8xf32>
    %c0_43 = arith.constant 0 : index
    %c0_44 = arith.constant 0 : index
    %22 = vector.load %arg35[%c0_43, %c0_44] : memref<4x4xf32, #tpu.memory_space<vmem>>, vector<4x4xf32>
    %c0_45 = arith.constant 0 : index
    %c0_46 = arith.constant 0 : index
    %23 = vector.load %arg36[%c0_45, %c0_46] : memref<8x4xf32, #tpu.memory_space<vmem>>, vector<8x4xf32>
    %c0_47 = arith.constant 0 : index
    %c0_48 = arith.constant 0 : index
    %24 = vector.load %arg37[%c0_47, %c0_48] : memref<1x4xf32, #tpu.memory_space<vmem>>, vector<1x4xf32>
    %c0_49 = arith.constant 0 : index
    %c0_50 = arith.constant 0 : index
    %25 = vector.load %arg1[%c0_49, %c0_50] : memref<72x8xf32, #tpu.memory_space<vmem>>, vector<72x8xf32>
    %c0_51 = arith.constant 0 : index
    %c0_52 = arith.constant 0 : index
    %26 = vector.load %arg5[%c0_51, %c0_52] : memref<72x6xf32, #tpu.memory_space<vmem>>, vector<72x6xf32>
    %c0_53 = arith.constant 0 : index
    %c0_54 = arith.constant 0 : index
    %27 = vector.load %arg9[%c0_53, %c0_54] : memref<72x8xf32, #tpu.memory_space<vmem>>, vector<72x8xf32>
    %c0_55 = arith.constant 0 : index
    %c0_56 = arith.constant 0 : index
    %28 = vector.load %arg2[%c0_55, %c0_56] : memref<72x4xf32, #tpu.memory_space<vmem>>, vector<72x4xf32>
    %c0_57 = arith.constant 0 : index
    %c0_58 = arith.constant 0 : index
    %29 = vector.load %arg3[%c0_57, %c0_58] : memref<72x4xf32, #tpu.memory_space<vmem>>, vector<72x4xf32>
    %c0_59 = arith.constant 0 : index
    %c0_60 = arith.constant 0 : index
    %30 = vector.load %arg4[%c0_59, %c0_60] : memref<72x4xf32, #tpu.memory_space<vmem>>, vector<72x4xf32>
    %c0_61 = arith.constant 0 : index
    %c0_62 = arith.constant 0 : index
    %31 = vector.load %arg6[%c0_61, %c0_62] : memref<72x2xf32, #tpu.memory_space<vmem>>, vector<72x2xf32>
    %c0_63 = arith.constant 0 : index
    %c0_64 = arith.constant 0 : index
    %32 = vector.load %arg7[%c0_63, %c0_64] : memref<72x2xf32, #tpu.memory_space<vmem>>, vector<72x2xf32>
    %c0_65 = arith.constant 0 : index
    %c0_66 = arith.constant 0 : index
    %33 = vector.load %arg8[%c0_65, %c0_66] : memref<72x2xf32, #tpu.memory_space<vmem>>, vector<72x2xf32>
    %c0_67 = arith.constant 0 : index
    %c0_68 = arith.constant 0 : index
    %34 = vector.load %arg10[%c0_67, %c0_68] : memref<72x4xf32, #tpu.memory_space<vmem>>, vector<72x4xf32>
    %c0_69 = arith.constant 0 : index
    %c0_70 = arith.constant 0 : index
    %35 = vector.load %arg11[%c0_69, %c0_70] : memref<72x4xf32, #tpu.memory_space<vmem>>, vector<72x4xf32>
    %c0_71 = arith.constant 0 : index
    %c0_72 = arith.constant 0 : index
    %36 = vector.load %arg12[%c0_71, %c0_72] : memref<72x4xf32, #tpu.memory_space<vmem>>, vector<72x4xf32>
    %cst = arith.constant dense<0.000000e+00> : vector<72x10xf32>
    %37 = tpu.matmul %28, %0, %cst {dimension_numbers = #tpu.dot_dimension_numbers<[1], [0], [0], [1], [0, 0, 1, 1], [], []>} : vector<72x4xf32>, vector<4x10xf32>, vector<72x10xf32> -> vector<72x10xf32>
    %cst_73 = arith.constant dense<0.000000e+00> : vector<72x10xf32>
    %38 = tpu.matmul %31, %1, %cst_73 {dimension_numbers = #tpu.dot_dimension_numbers<[1], [0], [0], [1], [0, 0, 1, 1], [], []>} : vector<72x2xf32>, vector<2x10xf32>, vector<72x10xf32> -> vector<72x10xf32>
    %39 = arith.addf %37, %38 : vector<72x10xf32>
    %cst_74 = arith.constant dense<0.000000e+00> : vector<72x10xf32>
    %40 = tpu.matmul %34, %2, %cst_74 {dimension_numbers = #tpu.dot_dimension_numbers<[1], [0], [0], [1], [0, 0, 1, 1], [], []>} : vector<72x4xf32>, vector<4x10xf32>, vector<72x10xf32> -> vector<72x10xf32>
    %41 = arith.addf %39, %40 : vector<72x10xf32>
    %cst_75 = arith.constant dense<0.000000e+00> : vector<72x10xf32>
    %42 = tpu.matmul %29, %0, %cst_75 {dimension_numbers = #tpu.dot_dimension_numbers<[1], [0], [0], [1], [0, 0, 1, 1], [], []>} : vector<72x4xf32>, vector<4x10xf32>, vector<72x10xf32> -> vector<72x10xf32>
    %cst_76 = arith.constant dense<0.000000e+00> : vector<72x10xf32>
    %43 = tpu.matmul %32, %1, %cst_76 {dimension_numbers = #tpu.dot_dimension_numbers<[1], [0], [0], [1], [0, 0, 1, 1], [], []>} : vector<72x2xf32>, vector<2x10xf32>, vector<72x10xf32> -> vector<72x10xf32>
    %44 = arith.addf %42, %43 : vector<72x10xf32>
    %cst_77 = arith.constant dense<0.000000e+00> : vector<72x10xf32>
    %45 = tpu.matmul %35, %2, %cst_77 {dimension_numbers = #tpu.dot_dimension_numbers<[1], [0], [0], [1], [0, 0, 1, 1], [], []>} : vector<72x4xf32>, vector<4x10xf32>, vector<72x10xf32> -> vector<72x10xf32>
    %46 = arith.addf %44, %45 : vector<72x10xf32>
    %cst_78 = arith.constant dense<0.000000e+00> : vector<72x10xf32>
    %47 = tpu.matmul %30, %0, %cst_78 {dimension_numbers = #tpu.dot_dimension_numbers<[1], [0], [0], [1], [0, 0, 1, 1], [], []>} : vector<72x4xf32>, vector<4x10xf32>, vector<72x10xf32> -> vector<72x10xf32>
    %cst_79 = arith.constant dense<0.000000e+00> : vector<72x10xf32>
    %48 = tpu.matmul %33, %1, %cst_79 {dimension_numbers = #tpu.dot_dimension_numbers<[1], [0], [0], [1], [0, 0, 1, 1], [], []>} : vector<72x2xf32>, vector<2x10xf32>, vector<72x10xf32> -> vector<72x10xf32>
    %49 = arith.addf %47, %48 : vector<72x10xf32>
    %cst_80 = arith.constant dense<0.000000e+00> : vector<72x10xf32>
    %50 = tpu.matmul %36, %2, %cst_80 {dimension_numbers = #tpu.dot_dimension_numbers<[1], [0], [0], [1], [0, 0, 1, 1], [], []>} : vector<72x4xf32>, vector<4x10xf32>, vector<72x10xf32> -> vector<72x10xf32>
    %51 = arith.addf %49, %50 : vector<72x10xf32>
    %cst_81 = arith.constant dense<0.000000e+00> : vector<72x8xf32>
    %52 = tpu.matmul %25, %3, %cst_81 {dimension_numbers = #tpu.dot_dimension_numbers<[1], [0], [0], [1], [0, 0, 1, 1], [], []>} : vector<72x8xf32>, vector<8x8xf32>, vector<72x8xf32> -> vector<72x8xf32>
    %cst_82 = arith.constant dense<0.000000e+00> : vector<72x8xf32>
    %53 = tpu.matmul %26, %4, %cst_82 {dimension_numbers = #tpu.dot_dimension_numbers<[1], [0], [0], [1], [0, 0, 1, 1], [], []>} : vector<72x6xf32>, vector<6x8xf32>, vector<72x8xf32> -> vector<72x8xf32>
    %54 = arith.addf %52, %53 : vector<72x8xf32>
    %cst_83 = arith.constant dense<0.000000e+00> : vector<72x8xf32>
    %55 = tpu.matmul %27, %5, %cst_83 {dimension_numbers = #tpu.dot_dimension_numbers<[1], [0], [0], [1], [0, 0, 1, 1], [], []>} : vector<72x8xf32>, vector<8x8xf32>, vector<72x8xf32> -> vector<72x8xf32>
    %56 = arith.addf %54, %55 : vector<72x8xf32>
    %57 = arith.mulf %41, %41 : vector<72x10xf32>
    %58 = arith.mulf %46, %46 : vector<72x10xf32>
    %59 = arith.addf %57, %58 : vector<72x10xf32>
    %60 = arith.mulf %51, %51 : vector<72x10xf32>
    %61 = arith.addf %59, %60 : vector<72x10xf32>
    %cst_84 = arith.constant 9.99999993E-9 : f32
    %62 = vector.broadcast %cst_84 : f32 to vector<72x10xf32>
    %63 = arith.maximumf %61, %62 : vector<72x10xf32>
    %64 = math.sqrt %63 : vector<72x10xf32>
    %cst_85 = arith.constant dense<0.000000e+00> : vector<72x8xf32>
    %65 = tpu.matmul %64, %6, %cst_85 {dimension_numbers = #tpu.dot_dimension_numbers<[1], [0], [0], [1], [0, 0, 1, 1], [], []>} : vector<72x10xf32>, vector<10x8xf32>, vector<72x8xf32> -> vector<72x8xf32>
    %66 = arith.addf %56, %65 : vector<72x8xf32>
    %67 = vector.broadcast %7 : vector<1x8xf32> to vector<72x8xf32>
    %68 = arith.addf %66, %67 : vector<72x8xf32>
    %cst_86 = arith.constant dense<0.000000e+00> : vector<72x4xf32>
    %69 = tpu.matmul %41, %8, %cst_86 {dimension_numbers = #tpu.dot_dimension_numbers<[1], [0], [0], [1], [0, 0, 1, 1], [], []>} : vector<72x10xf32>, vector<10x4xf32>, vector<72x4xf32> -> vector<72x4xf32>
    %cst_87 = arith.constant dense<0.000000e+00> : vector<72x4xf32>
    %70 = tpu.matmul %46, %8, %cst_87 {dimension_numbers = #tpu.dot_dimension_numbers<[1], [0], [0], [1], [0, 0, 1, 1], [], []>} : vector<72x10xf32>, vector<10x4xf32>, vector<72x4xf32> -> vector<72x4xf32>
    %cst_88 = arith.constant dense<0.000000e+00> : vector<72x4xf32>
    %71 = tpu.matmul %51, %8, %cst_88 {dimension_numbers = #tpu.dot_dimension_numbers<[1], [0], [0], [1], [0, 0, 1, 1], [], []>} : vector<72x10xf32>, vector<10x4xf32>, vector<72x4xf32> -> vector<72x4xf32>
    %72 = arith.negf %68 : vector<72x8xf32>
    %73 = math.exp %72 : vector<72x8xf32>
    %cst_89 = arith.constant 1.000000e+00 : f32
    %74 = vector.broadcast %cst_89 : f32 to vector<72x8xf32>
    %75 = arith.addf %74, %73 : vector<72x8xf32>
    %76 = arith.divf %74, %75 : vector<72x8xf32>
    %cst_90 = arith.constant dense<0.000000e+00> : vector<72x4xf32>
    %77 = tpu.matmul %76, %9, %cst_90 {dimension_numbers = #tpu.dot_dimension_numbers<[1], [0], [0], [1], [0, 0, 1, 1], [], []>} : vector<72x8xf32>, vector<8x4xf32>, vector<72x4xf32> -> vector<72x4xf32>
    %78 = vector.broadcast %10 : vector<1x4xf32> to vector<72x4xf32>
    %79 = arith.addf %77, %78 : vector<72x4xf32>
    %80 = arith.negf %79 : vector<72x4xf32>
    %81 = math.exp %80 : vector<72x4xf32>
    %cst_91 = arith.constant 1.000000e+00 : f32
    %82 = vector.broadcast %cst_91 : f32 to vector<72x4xf32>
    %83 = arith.addf %82, %81 : vector<72x4xf32>
    %84 = arith.divf %82, %83 : vector<72x4xf32>
    %85 = arith.mulf %69, %84 : vector<72x4xf32>
    %86 = arith.mulf %70, %84 : vector<72x4xf32>
    %87 = arith.mulf %71, %84 : vector<72x4xf32>
    %cst_92 = arith.constant 0.000000e+00 : f32
    %88 = vector.broadcast %cst_92 : f32 to vector<72x8xf32>
    %89 = arith.maximumf %68, %88 : vector<72x8xf32>
    %cst_93 = arith.constant dense<0.000000e+00> : vector<72x4xf32>
    %90 = tpu.matmul %85, %11, %cst_93 {dimension_numbers = #tpu.dot_dimension_numbers<[1], [0], [0], [1], [0, 0, 1, 1], [], []>} : vector<72x4xf32>, vector<4x4xf32>, vector<72x4xf32> -> vector<72x4xf32>
    %cst_94 = arith.constant dense<0.000000e+00> : vector<72x4xf32>
    %91 = tpu.matmul %86, %11, %cst_94 {dimension_numbers = #tpu.dot_dimension_numbers<[1], [0], [0], [1], [0, 0, 1, 1], [], []>} : vector<72x4xf32>, vector<4x4xf32>, vector<72x4xf32> -> vector<72x4xf32>
    %cst_95 = arith.constant dense<0.000000e+00> : vector<72x4xf32>
    %92 = tpu.matmul %87, %11, %cst_95 {dimension_numbers = #tpu.dot_dimension_numbers<[1], [0], [0], [1], [0, 0, 1, 1], [], []>} : vector<72x4xf32>, vector<4x4xf32>, vector<72x4xf32> -> vector<72x4xf32>
    %cst_96 = arith.constant dense<0.000000e+00> : vector<72x8xf32>
    %93 = tpu.matmul %89, %12, %cst_96 {dimension_numbers = #tpu.dot_dimension_numbers<[1], [0], [0], [1], [0, 0, 1, 1], [], []>} : vector<72x8xf32>, vector<8x8xf32>, vector<72x8xf32> -> vector<72x8xf32>
    %94 = arith.mulf %90, %90 : vector<72x4xf32>
    %95 = arith.mulf %91, %91 : vector<72x4xf32>
    %96 = arith.addf %94, %95 : vector<72x4xf32>
    %97 = arith.mulf %92, %92 : vector<72x4xf32>
    %98 = arith.addf %96, %97 : vector<72x4xf32>
    %cst_97 = arith.constant 9.99999993E-9 : f32
    %99 = vector.broadcast %cst_97 : f32 to vector<72x4xf32>
    %100 = arith.maximumf %98, %99 : vector<72x4xf32>
    %101 = math.sqrt %100 : vector<72x4xf32>
    %cst_98 = arith.constant dense<0.000000e+00> : vector<72x8xf32>
    %102 = tpu.matmul %101, %13, %cst_98 {dimension_numbers = #tpu.dot_dimension_numbers<[1], [0], [0], [1], [0, 0, 1, 1], [], []>} : vector<72x4xf32>, vector<4x8xf32>, vector<72x8xf32> -> vector<72x8xf32>
    %103 = arith.addf %93, %102 : vector<72x8xf32>
    %104 = vector.broadcast %14 : vector<1x8xf32> to vector<72x8xf32>
    %105 = arith.addf %103, %104 : vector<72x8xf32>
    %cst_99 = arith.constant dense<0.000000e+00> : vector<72x4xf32>
    %106 = tpu.matmul %90, %15, %cst_99 {dimension_numbers = #tpu.dot_dimension_numbers<[1], [0], [0], [1], [0, 0, 1, 1], [], []>} : vector<72x4xf32>, vector<4x4xf32>, vector<72x4xf32> -> vector<72x4xf32>
    %cst_100 = arith.constant dense<0.000000e+00> : vector<72x4xf32>
    %107 = tpu.matmul %91, %15, %cst_100 {dimension_numbers = #tpu.dot_dimension_numbers<[1], [0], [0], [1], [0, 0, 1, 1], [], []>} : vector<72x4xf32>, vector<4x4xf32>, vector<72x4xf32> -> vector<72x4xf32>
    %cst_101 = arith.constant dense<0.000000e+00> : vector<72x4xf32>
    %108 = tpu.matmul %92, %15, %cst_101 {dimension_numbers = #tpu.dot_dimension_numbers<[1], [0], [0], [1], [0, 0, 1, 1], [], []>} : vector<72x4xf32>, vector<4x4xf32>, vector<72x4xf32> -> vector<72x4xf32>
    %109 = arith.negf %105 : vector<72x8xf32>
    %110 = math.exp %109 : vector<72x8xf32>
    %cst_102 = arith.constant 1.000000e+00 : f32
    %111 = vector.broadcast %cst_102 : f32 to vector<72x8xf32>
    %112 = arith.addf %111, %110 : vector<72x8xf32>
    %113 = arith.divf %111, %112 : vector<72x8xf32>
    %cst_103 = arith.constant dense<0.000000e+00> : vector<72x4xf32>
    %114 = tpu.matmul %113, %16, %cst_103 {dimension_numbers = #tpu.dot_dimension_numbers<[1], [0], [0], [1], [0, 0, 1, 1], [], []>} : vector<72x8xf32>, vector<8x4xf32>, vector<72x4xf32> -> vector<72x4xf32>
    %115 = vector.broadcast %17 : vector<1x4xf32> to vector<72x4xf32>
    %116 = arith.addf %114, %115 : vector<72x4xf32>
    %117 = arith.negf %116 : vector<72x4xf32>
    %118 = math.exp %117 : vector<72x4xf32>
    %cst_104 = arith.constant 1.000000e+00 : f32
    %119 = vector.broadcast %cst_104 : f32 to vector<72x4xf32>
    %120 = arith.addf %119, %118 : vector<72x4xf32>
    %121 = arith.divf %119, %120 : vector<72x4xf32>
    %122 = arith.mulf %106, %121 : vector<72x4xf32>
    %123 = arith.mulf %107, %121 : vector<72x4xf32>
    %124 = arith.mulf %108, %121 : vector<72x4xf32>
    %cst_105 = arith.constant 0.000000e+00 : f32
    %125 = vector.broadcast %cst_105 : f32 to vector<72x8xf32>
    %126 = arith.maximumf %105, %125 : vector<72x8xf32>
    %cst_106 = arith.constant dense<0.000000e+00> : vector<72x4xf32>
    %127 = tpu.matmul %122, %18, %cst_106 {dimension_numbers = #tpu.dot_dimension_numbers<[1], [0], [0], [1], [0, 0, 1, 1], [], []>} : vector<72x4xf32>, vector<4x4xf32>, vector<72x4xf32> -> vector<72x4xf32>
    %cst_107 = arith.constant dense<0.000000e+00> : vector<72x4xf32>
    %128 = tpu.matmul %123, %18, %cst_107 {dimension_numbers = #tpu.dot_dimension_numbers<[1], [0], [0], [1], [0, 0, 1, 1], [], []>} : vector<72x4xf32>, vector<4x4xf32>, vector<72x4xf32> -> vector<72x4xf32>
    %cst_108 = arith.constant dense<0.000000e+00> : vector<72x4xf32>
    %129 = tpu.matmul %124, %18, %cst_108 {dimension_numbers = #tpu.dot_dimension_numbers<[1], [0], [0], [1], [0, 0, 1, 1], [], []>} : vector<72x4xf32>, vector<4x4xf32>, vector<72x4xf32> -> vector<72x4xf32>
    %cst_109 = arith.constant dense<0.000000e+00> : vector<72x8xf32>
    %130 = tpu.matmul %126, %19, %cst_109 {dimension_numbers = #tpu.dot_dimension_numbers<[1], [0], [0], [1], [0, 0, 1, 1], [], []>} : vector<72x8xf32>, vector<8x8xf32>, vector<72x8xf32> -> vector<72x8xf32>
    %131 = arith.mulf %127, %127 : vector<72x4xf32>
    %132 = arith.mulf %128, %128 : vector<72x4xf32>
    %133 = arith.addf %131, %132 : vector<72x4xf32>
    %134 = arith.mulf %129, %129 : vector<72x4xf32>
    %135 = arith.addf %133, %134 : vector<72x4xf32>
    %cst_110 = arith.constant 9.99999993E-9 : f32
    %136 = vector.broadcast %cst_110 : f32 to vector<72x4xf32>
    %137 = arith.maximumf %135, %136 : vector<72x4xf32>
    %138 = math.sqrt %137 : vector<72x4xf32>
    %cst_111 = arith.constant dense<0.000000e+00> : vector<72x8xf32>
    %139 = tpu.matmul %138, %20, %cst_111 {dimension_numbers = #tpu.dot_dimension_numbers<[1], [0], [0], [1], [0, 0, 1, 1], [], []>} : vector<72x4xf32>, vector<4x8xf32>, vector<72x8xf32> -> vector<72x8xf32>
    %140 = arith.addf %130, %139 : vector<72x8xf32>
    %141 = vector.broadcast %21 : vector<1x8xf32> to vector<72x8xf32>
    %142 = arith.addf %140, %141 : vector<72x8xf32>
    %cst_112 = arith.constant dense<0.000000e+00> : vector<72x4xf32>
    %143 = tpu.matmul %127, %22, %cst_112 {dimension_numbers = #tpu.dot_dimension_numbers<[1], [0], [0], [1], [0, 0, 1, 1], [], []>} : vector<72x4xf32>, vector<4x4xf32>, vector<72x4xf32> -> vector<72x4xf32>
    %cst_113 = arith.constant dense<0.000000e+00> : vector<72x4xf32>
    %144 = tpu.matmul %128, %22, %cst_113 {dimension_numbers = #tpu.dot_dimension_numbers<[1], [0], [0], [1], [0, 0, 1, 1], [], []>} : vector<72x4xf32>, vector<4x4xf32>, vector<72x4xf32> -> vector<72x4xf32>
    %cst_114 = arith.constant dense<0.000000e+00> : vector<72x4xf32>
    %145 = tpu.matmul %129, %22, %cst_114 {dimension_numbers = #tpu.dot_dimension_numbers<[1], [0], [0], [1], [0, 0, 1, 1], [], []>} : vector<72x4xf32>, vector<4x4xf32>, vector<72x4xf32> -> vector<72x4xf32>
    %cst_115 = arith.constant dense<0.000000e+00> : vector<72x4xf32>
    %146 = tpu.matmul %142, %23, %cst_115 {dimension_numbers = #tpu.dot_dimension_numbers<[1], [0], [0], [1], [0, 0, 1, 1], [], []>} : vector<72x8xf32>, vector<8x4xf32>, vector<72x4xf32> -> vector<72x4xf32>
    %147 = vector.broadcast %24 : vector<1x4xf32> to vector<72x4xf32>
    %148 = arith.addf %146, %147 : vector<72x4xf32>
    %149 = arith.negf %148 : vector<72x4xf32>
    %150 = math.exp %149 : vector<72x4xf32>
    %cst_116 = arith.constant 1.000000e+00 : f32
    %151 = vector.broadcast %cst_116 : f32 to vector<72x4xf32>
    %152 = arith.addf %151, %150 : vector<72x4xf32>
    %153 = arith.divf %151, %152 : vector<72x4xf32>
    %154 = arith.mulf %143, %153 : vector<72x4xf32>
    %155 = arith.mulf %144, %153 : vector<72x4xf32>
    %156 = arith.mulf %145, %153 : vector<72x4xf32>
    %c0_117 = arith.constant 0 : index
    %c0_118 = arith.constant 0 : index
    %157 = vector.load %arg38[%c0_117, %c0_118] : memref<72x20xf32, #tpu.memory_space<vmem>>, vector<72x8xf32>
    tpu.vector_store %arg38[%c0_117, %c0_118], %142 {strides = array<i32>} : memref<72x20xf32, #tpu.memory_space<vmem>>, vector<72x8xf32>,
    %c0_119 = arith.constant 0 : index
    %c8 = arith.constant 8 : index
    %158 = vector.load %arg38[%c0_119, %c8] : memref<72x20xf32, #tpu.memory_space<vmem>>, vector<72x4xf32>
    tpu.vector_store %arg38[%c0_119, %c8], %154 {strides = array<i32>} : memref<72x20xf32, #tpu.memory_space<vmem>>, vector<72x4xf32>,
    %c0_120 = arith.constant 0 : index
    %c12 = arith.constant 12 : index
    %159 = vector.load %arg38[%c0_120, %c12] : memref<72x20xf32, #tpu.memory_space<vmem>>, vector<72x4xf32>
    tpu.vector_store %arg38[%c0_120, %c12], %155 {strides = array<i32>} : memref<72x20xf32, #tpu.memory_space<vmem>>, vector<72x4xf32>,
    %c0_121 = arith.constant 0 : index
    %c16 = arith.constant 16 : index
    %160 = vector.load %arg38[%c0_121, %c16] : memref<72x20xf32, #tpu.memory_space<vmem>>, vector<72x4xf32>
    tpu.vector_store %arg38[%c0_121, %c16], %156 {strides = array<i32>} : memref<72x20xf32, #tpu.memory_space<vmem>>, vector<72x4xf32>,
    return
  }
  func.func @transform_0(%arg0: i32) -> (i32, i32) {
    %c0_i32 = arith.constant 0 : i32
    %c0_i32_0 = arith.constant 0 : i32
    return %arg0, %c0_i32 : i32, i32
  }
  func.func @transform_1(%arg0: i32) -> (i32, i32) {
    %c0_i32 = arith.constant 0 : i32
    %c0_i32_0 = arith.constant 0 : i32
    return %arg0, %c0_i32 : i32, i32
  }
  func.func @transform_2(%arg0: i32) -> (i32, i32) {
    %c0_i32 = arith.constant 0 : i32
    %c0_i32_0 = arith.constant 0 : i32
    return %arg0, %c0_i32 : i32, i32
  }
  func.func @transform_3(%arg0: i32) -> (i32, i32) {
    %c0_i32 = arith.constant 0 : i32
    %c0_i32_0 = arith.constant 0 : i32
    return %arg0, %c0_i32 : i32, i32
  }
  func.func @transform_4(%arg0: i32) -> (i32, i32) {
    %c0_i32 = arith.constant 0 : i32
    %c0_i32_0 = arith.constant 0 : i32
    return %arg0, %c0_i32 : i32, i32
  }
  func.func @transform_5(%arg0: i32) -> (i32, i32) {
    %c0_i32 = arith.constant 0 : i32
    %c0_i32_0 = arith.constant 0 : i32
    return %arg0, %c0_i32 : i32, i32
  }
  func.func @transform_6(%arg0: i32) -> (i32, i32) {
    %c0_i32 = arith.constant 0 : i32
    %c0_i32_0 = arith.constant 0 : i32
    return %arg0, %c0_i32 : i32, i32
  }
  func.func @transform_7(%arg0: i32) -> (i32, i32) {
    %c0_i32 = arith.constant 0 : i32
    %c0_i32_0 = arith.constant 0 : i32
    return %arg0, %c0_i32 : i32, i32
  }
  func.func @transform_8(%arg0: i32) -> (i32, i32) {
    %c0_i32 = arith.constant 0 : i32
    %c0_i32_0 = arith.constant 0 : i32
    return %arg0, %c0_i32 : i32, i32
  }
  func.func @transform_9(%arg0: i32) -> (i32, i32) {
    %c0_i32 = arith.constant 0 : i32
    %c0_i32_0 = arith.constant 0 : i32
    return %arg0, %c0_i32 : i32, i32
  }
  func.func @transform_10(%arg0: i32) -> (i32, i32) {
    %c0_i32 = arith.constant 0 : i32
    %c0_i32_0 = arith.constant 0 : i32
    return %arg0, %c0_i32 : i32, i32
  }
  func.func @transform_11(%arg0: i32) -> (i32, i32) {
    %c0_i32 = arith.constant 0 : i32
    %c0_i32_0 = arith.constant 0 : i32
    return %arg0, %c0_i32 : i32, i32
  }
  func.func @transform_12(%arg0: i32) -> (i32, i32) {
    %c0_i32 = arith.constant 0 : i32
    %c0_i32_0 = arith.constant 0 : i32
    %c0_i32_1 = arith.constant 0 : i32
    return %c0_i32, %c0_i32_0 : i32, i32
  }
  func.func @transform_13(%arg0: i32) -> (i32, i32) {
    %c0_i32 = arith.constant 0 : i32
    %c0_i32_0 = arith.constant 0 : i32
    %c0_i32_1 = arith.constant 0 : i32
    return %c0_i32, %c0_i32_0 : i32, i32
  }
  func.func @transform_14(%arg0: i32) -> (i32, i32) {
    %c0_i32 = arith.constant 0 : i32
    %c0_i32_0 = arith.constant 0 : i32
    %c0_i32_1 = arith.constant 0 : i32
    return %c0_i32, %c0_i32_0 : i32, i32
  }
  func.func @transform_15(%arg0: i32) -> (i32, i32) {
    %c0_i32 = arith.constant 0 : i32
    %c0_i32_0 = arith.constant 0 : i32
    %c0_i32_1 = arith.constant 0 : i32
    return %c0_i32, %c0_i32_0 : i32, i32
  }
  func.func @transform_16(%arg0: i32) -> (i32, i32) {
    %c0_i32 = arith.constant 0 : i32
    %c0_i32_0 = arith.constant 0 : i32
    %c0_i32_1 = arith.constant 0 : i32
    return %c0_i32, %c0_i32_0 : i32, i32
  }
  func.func @transform_17(%arg0: i32) -> (i32, i32) {
    %c0_i32 = arith.constant 0 : i32
    %c0_i32_0 = arith.constant 0 : i32
    %c0_i32_1 = arith.constant 0 : i32
    return %c0_i32, %c0_i32_0 : i32, i32
  }
  func.func @transform_18(%arg0: i32) -> (i32, i32) {
    %c0_i32 = arith.constant 0 : i32
    %c0_i32_0 = arith.constant 0 : i32
    %c0_i32_1 = arith.constant 0 : i32
    return %c0_i32, %c0_i32_0 : i32, i32
  }
  func.func @transform_19(%arg0: i32) -> (i32, i32) {
    %c0_i32 = arith.constant 0 : i32
    %c0_i32_0 = arith.constant 0 : i32
    %c0_i32_1 = arith.constant 0 : i32
    return %c0_i32, %c0_i32_0 : i32, i32
  }
  func.func @transform_20(%arg0: i32) -> (i32, i32) {
    %c0_i32 = arith.constant 0 : i32
    %c0_i32_0 = arith.constant 0 : i32
    %c0_i32_1 = arith.constant 0 : i32
    return %c0_i32, %c0_i32_0 : i32, i32
  }
  func.func @transform_21(%arg0: i32) -> (i32, i32) {
    %c0_i32 = arith.constant 0 : i32
    %c0_i32_0 = arith.constant 0 : i32
    %c0_i32_1 = arith.constant 0 : i32
    return %c0_i32, %c0_i32_0 : i32, i32
  }
  func.func @transform_22(%arg0: i32) -> (i32, i32) {
    %c0_i32 = arith.constant 0 : i32
    %c0_i32_0 = arith.constant 0 : i32
    %c0_i32_1 = arith.constant 0 : i32
    return %c0_i32, %c0_i32_0 : i32, i32
  }
  func.func @transform_23(%arg0: i32) -> (i32, i32) {
    %c0_i32 = arith.constant 0 : i32
    %c0_i32_0 = arith.constant 0 : i32
    %c0_i32_1 = arith.constant 0 : i32
    return %c0_i32, %c0_i32_0 : i32, i32
  }
  func.func @transform_24(%arg0: i32) -> (i32, i32) {
    %c0_i32 = arith.constant 0 : i32
    %c0_i32_0 = arith.constant 0 : i32
    %c0_i32_1 = arith.constant 0 : i32
    return %c0_i32, %c0_i32_0 : i32, i32
  }
  func.func @transform_25(%arg0: i32) -> (i32, i32) {
    %c0_i32 = arith.constant 0 : i32
    %c0_i32_0 = arith.constant 0 : i32
    %c0_i32_1 = arith.constant 0 : i32
    return %c0_i32, %c0_i32_0 : i32, i32
  }
  func.func @transform_26(%arg0: i32) -> (i32, i32) {
    %c0_i32 = arith.constant 0 : i32
    %c0_i32_0 = arith.constant 0 : i32
    %c0_i32_1 = arith.constant 0 : i32
    return %c0_i32, %c0_i32_0 : i32, i32
  }
  func.func @transform_27(%arg0: i32) -> (i32, i32) {
    %c0_i32 = arith.constant 0 : i32
    %c0_i32_0 = arith.constant 0 : i32
    %c0_i32_1 = arith.constant 0 : i32
    return %c0_i32, %c0_i32_0 : i32, i32
  }
  func.func @transform_28(%arg0: i32) -> (i32, i32) {
    %c0_i32 = arith.constant 0 : i32
    %c0_i32_0 = arith.constant 0 : i32
    %c0_i32_1 = arith.constant 0 : i32
    return %c0_i32, %c0_i32_0 : i32, i32
  }
  func.func @transform_29(%arg0: i32) -> (i32, i32) {
    %c0_i32 = arith.constant 0 : i32
    %c0_i32_0 = arith.constant 0 : i32
    %c0_i32_1 = arith.constant 0 : i32
    return %c0_i32, %c0_i32_0 : i32, i32
  }
  func.func @transform_30(%arg0: i32) -> (i32, i32) {
    %c0_i32 = arith.constant 0 : i32
    %c0_i32_0 = arith.constant 0 : i32
    %c0_i32_1 = arith.constant 0 : i32
    return %c0_i32, %c0_i32_0 : i32, i32
  }
  func.func @transform_31(%arg0: i32) -> (i32, i32) {
    %c0_i32 = arith.constant 0 : i32
    %c0_i32_0 = arith.constant 0 : i32
    %c0_i32_1 = arith.constant 0 : i32
    return %c0_i32, %c0_i32_0 : i32, i32
  }
  func.func @transform_32(%arg0: i32) -> (i32, i32) {
    %c0_i32 = arith.constant 0 : i32
    %c0_i32_0 = arith.constant 0 : i32
    %c0_i32_1 = arith.constant 0 : i32
    return %c0_i32, %c0_i32_0 : i32, i32
  }
  func.func @transform_33(%arg0: i32) -> (i32, i32) {
    %c0_i32 = arith.constant 0 : i32
    %c0_i32_0 = arith.constant 0 : i32
    %c0_i32_1 = arith.constant 0 : i32
    return %c0_i32, %c0_i32_0 : i32, i32
  }
  func.func @transform_34(%arg0: i32) -> (i32, i32) {
    %c0_i32 = arith.constant 0 : i32
    %c0_i32_0 = arith.constant 0 : i32
    %c0_i32_1 = arith.constant 0 : i32
    return %c0_i32, %c0_i32_0 : i32, i32
  }
  func.func @transform_35(%arg0: i32) -> (i32, i32) {
    %c0_i32 = arith.constant 0 : i32
    %c0_i32_0 = arith.constant 0 : i32
    %c0_i32_1 = arith.constant 0 : i32
    return %c0_i32, %c0_i32_0 : i32, i32
  }
  func.func @transform_36(%arg0: i32) -> (i32, i32) {
    %c0_i32 = arith.constant 0 : i32
    %c0_i32_0 = arith.constant 0 : i32
    %c0_i32_1 = arith.constant 0 : i32
    return %c0_i32, %c0_i32_0 : i32, i32
  }
  func.func @transform_37(%arg0: i32) -> (i32, i32) {
    %c0_i32 = arith.constant 0 : i32
    %c0_i32_0 = arith.constant 0 : i32
    return %arg0, %c0_i32 : i32, i32
  }
}

</mosaic_0001>

<bundles_post_ra>
// kernel: tpu_custom_call.1
= control target key start
LH: loop header
LB: loop body
LE: loop exit
PB: predicated region body
PF: predicated region fallthrough
CT: control target
= control target key end

     0   :  { %v8312_v0 = vmov 0.0   ;;  %s8313_s3 = smov 13   ;;  %s8314_s7 = smov 5   ;;  %vm8315_vm0 = vmmov 0   ;;  %vm317_vm1 = vcmask 1041408   ;;  %vm289_vm2 = vcmask 15360   ;;  %s10664_s0 = inlined_call_operand.smem [shape: u32[38], index: -1, kind: input, shape index: {}] }
   0x1   :  { %6892 = vmatprep.subr.mxu0 %v8312_v0  ;;  %7931 = vmatprep.subr.mxu1 %v8312_v0  ;;  %s6119_s6 = sld [smem:[%s10664_s0 + %s8313_s3]]   ;;  %s8316_s11 = smov 12   ;;  %vm459_vm3 = vcmask 1043456   ;;  %vm431_vm4 = vcmask 31744   ;;  %vm1590_vm5 = vcmask 1045504   ;;  %vm1562_vm6 = vcmask 48128  }
   0x2   :  { %s8366_s10 = sld [smem:[%s10664_s0 + %s8314_s7]]   ;;  %6894 = vmatprep.mubr.msk.f32.mxu0 %vm8315_vm0, %v8312_v0  ;;  %6909 = vmatprep.mubr.msk.f32.mxu1 %vm8315_vm0, %v8312_v0  ;;  %s8317_s15 = smov 6   ;;  %vm1704_vm7 = vcmask 64512   ;;  %vm8333_vm8 = vmmov 1   ;;  %vm2105_vm10 = vcmask 80896  }
   0x3   :  { %s6118_s14 = sld [smem:[%s10664_s0 + %s8316_s11]]   ;;  %s8318_s19 = smov 1   ;;  %vm8884_vm9 = vmpackc.low %vm317_vm1, %vm8333_vm8 }
   0x4   :  { %s8410_s18 = sld [smem:[%s10664_s0 + %s8317_s15]]   ;;  %s8319_s23 = smov 14  }
   0x5   :  { %s8426_s22 = sld [smem:[%s10664_s0 + %s8318_s19]]   ;;  %s8320_s27 = smov 2  }
   0x6   :  { %s6120_s26 = sld [smem:[%s10664_s0 + %s8319_s23]]   ;;  %s8321_s1 = smov 9  }
   0x7   :  { %v8376_v1 = vld [vmem:[%s6119_s6] sm:$0x3]  ;;  %s8506_s30 = sld [smem:[%s10664_s0 + %s8320_s27]]   ;;  %s8322_s5 = smov 10  }
   0x8   :  { %v235_v2 = vld [vmem:[%s8366_s10] sm:$0xff]  ;;  %v240_v3 = vld [vmem:[%s8366_s10 + $0x28] sm:$0xff]  ;;  %6893 = vmatpush3.msk.msra.mxu0 %vm317_vm1, %v8376_v1  ;;  %7932 = vmatpush3.msk.msra.mxu1 %vm317_vm1, %v8376_v1  ;;  %v241_v6 = vld [vmem:[%s8366_s10 + $0x30] sm:$0xff]  ;;  %s8519_s4 = sld [smem:[%s10664_s0 + %s8321_s1]]   ;;  %s8323_s9 = smov 16  }
   0x9   :  { %6895 = vmatmul.mubr.msk.f32.vlgmr.msra.gmra.mrb[0].mxu0 %vm289_vm2, %v235_v2  ;;  %6910 = vmatmul.mubr.msk.f32.vlgmr.msra.gmra.mrb[0].mxu1 %vm289_vm2, %v240_v3  ;;  %v8386_v4 = vld [vmem:[%s6118_s14] sm:$0xf]  ;;  %v236_v5 = vld [vmem:[%s8366_s10 + $0x8] sm:$0xff]  ;;  %v237_v7 = vld [vmem:[%s8366_s10 + $0x10] sm:$0xff]  ;;  %s8594_s8 = sld [smem:[%s10664_s0 + %s8322_s5]]   ;;  %s8324_s14 = smov 7  }
   0xa   :  { %6921 = vmatprep.subr.mxu0 %v8312_v0  ;;  %6897 = vmatprep.mubr.msk.f32.mxu0 %vm8315_vm0, %v8312_v0  ;;  %v242_v8 = vld [vmem:[%s8366_s10 + $0x38] sm:$0xff]  ;;  %v243_v10 = vld [vmem:[%s8366_s10 + $0x40] sm:$0xff]  ;;  %v245_v14 = vld [vmem:[%s8410_s18 + $0x8] sm:$0xff]  ;;  %s6122_s13 = sld [smem:[%s10664_s0 + %s8323_s9]]   ;;  %s8329_s3 = smov 17  }
   0xb   :  { %6922 = vmatpush3.msk.msra.mxu0 %vm459_vm3, %v8386_v4  ;;  %6912 = vmatprep.mubr.msk.f32.mxu1 %vm8315_vm0, %v8312_v0  ;;  %v238_v9 = vld [vmem:[%s8366_s10 + $0x18] sm:$0xff]  ;;  %v239_v11 = vld [vmem:[%s8366_s10 + $0x20] sm:$0xff]  ;;  %v209_v16 = vld [vmem:[%s8426_s22 + $0x8] sm:$0xff]  ;;  %s8611_s17 = sld [smem:[%s10664_s0 + %s8324_s14]]   ;;  %s8330_s7 = smov 11  }
   0xc   :  { %6979 = vmatprep.subr.mxu1 %v8312_v0  ;;  %6950 = vmatprep.subr.mxu0 %v8312_v0  ;;  %v244_v12 = vld [vmem:[%s8410_s18] sm:$0xff]  ;;  %v246_v17 = vld [vmem:[%s8410_s18 + $0x10] sm:$0xff]  ;;  %v247_v19 = vld [vmem:[%s8410_s18 + $0x18] sm:$0xff]  ;;  %s8773_s2 = sld [smem:[%s10664_s0]]   ;;  %s8346_s14 = smov 31  }
   0xd   :  { %6898 = vmatmul.mubr.msk.f32.gmra.mrb[2].mxu0 %vm289_vm2, %v236_v5  ;;  %6913 = vmatmul.mubr.msk.f32.gmra.mrb[2].mxu1 %vm289_vm2, %v241_v6  ;;  %v208_v13 = vld [vmem:[%s8426_s22] sm:$0xff]  ;;  %v210_v18 = vld [vmem:[%s8426_s22 + $0x10] sm:$0xff]  ;;  %v211_v20 = vld [vmem:[%s8426_s22 + $0x18] sm:$0xff]  ;;  %s6123_s6 = sld [smem:[%s10664_s0 + %s8329_s3]]   ;;  %s8337_s3 = smov 19  }
   0xe   :  { %6900 = vmatprep.mubr.msk.f32.mxu0 %vm8315_vm0, %v8312_v0  ;;  %6915 = vmatprep.mubr.msk.f32.mxu1 %vm8315_vm0, %v8312_v0  ;;  %v8447_v15 = vld [vmem:[%s6120_s26] sm:$0xf]  ;;  %v249_v23 = vld [vmem:[%s8410_s18 + $0x28] sm:$0xff]  ;;  %v250_v25 = vld [vmem:[%s8410_s18 + $0x30] sm:$0xff]  ;;  %s8327_s26 = smov 3   ;;  %s8786_s12 = sld [smem:[%s10664_s0 + %s8330_s7]]  }
   0xf   :  { %6980 = vmatpush3.msk.msra.mxu1 %vm317_vm1, %v8376_v1  ;;  %v248_v21 = vld [vmem:[%s8410_s18 + $0x20] sm:$0xff]  ;;  %v213_v24 = vld [vmem:[%s8426_s22 + $0x28] sm:$0xff]  ;;  %v214_v26 = vld [vmem:[%s8426_s22 + $0x30] sm:$0xff]  ;;  %s8700_s29 = sld [smem:[%s10664_s0 + %s8327_s26]]   ;;  %s8338_s7 = smov 22  }
  0x10   :  { %7008 = vmatprep.subr.mxu1 %v8312_v0  ;;  %v212_v22 = vld [vmem:[%s8426_s22 + $0x20] sm:$0xff]  ;;  %v251_v27 = vld [vmem:[%s8410_s18 + $0x38] sm:$0xff]  ;;  %v218_v33 = vld [vmem:[%s8506_s30 + $0x8] sm:$0xff]  ;;  %s8342_s26 = smov 28   ;;  %s8347_s19 = smov 34  }
  0x11   :  { %6901 = vmatmul.mubr.msk.f32.gmra.mrb[4].mxu0 %vm289_vm2, %v237_v7  ;;  %6916 = vmatmul.mubr.msk.f32.gmra.mrb[4].mxu1 %vm289_vm2, %v242_v8  ;;  %v215_v28 = vld [vmem:[%s8426_s22 + $0x38] sm:$0xff]  ;;  %v252_v29 = vld [vmem:[%s8410_s18 + $0x40] sm:$0xff]  ;;  %v263_v34 = vld [vmem:[%s8519_s4 + $0x8] sm:$0xff]  ;;  %s8325_s18 = smov 4   ;;  %s8348_s23 = smov 32  }
  0x12   :  { %6903 = vmatprep.mubr.msk.f32.mxu0 %vm8315_vm0, %v8312_v0  ;;  %6918 = vmatprep.mubr.msk.f32.mxu1 %vm8315_vm0, %v8312_v0  ;;  %v216_v30 = vld [vmem:[%s8426_s22 + $0x40] sm:$0xff]  ;;  %v219_v35 = vld [vmem:[%s8506_s30 + $0x10] sm:$0xff]  ;;  %v220_v37 = vld [vmem:[%s8506_s30 + $0x18] sm:$0xff]  ;;  %s8684_s21 = sld [smem:[%s10664_s0 + %s8325_s18]]   ;;  %s8326_s22 = smov 15  }
  0x13   :  { %v217_v31 = vld [vmem:[%s8506_s30] sm:$0xff]  ;;  %v264_v36 = vld [vmem:[%s8519_s4 + $0x10] sm:$0xff]  ;;  %v265_v38 = vld [vmem:[%s8519_s4 + $0x18] sm:$0xff]  ;;  %s6121_s25 = sld [smem:[%s10664_s0 + %s8326_s22]]   ;;  %s8340_s18 = smov 27  }
  0x14   :  { %v262_v32 = vld [vmem:[%s8519_s4] sm:$0xff]  ;;  %v222_v41 = vld [vmem:[%s8506_s30 + $0x28] sm:$0xff]  ;;  %v223_v43 = vld [vmem:[%s8506_s30 + $0x30] sm:$0xff]  ;;  %s8341_s22 = smov 25   ;;  %s8349_s27 = smov 35  }
  0x15   :  { %6904 = vmatmul.mubr.msk.f32.gmra.mrb[6].mxu0 %vm289_vm2, %v238_v9  ;;  %6919 = vmatmul.mubr.msk.f32.gmra.mrb[6].mxu1 %vm289_vm2, %v243_v10  ;;  %v221_v39 = vld [vmem:[%s8506_s30 + $0x20] sm:$0xff]  ;;  %v267_v42 = vld [vmem:[%s8519_s4 + $0x28] sm:$0xff]  ;;  %v268_v44 = vld [vmem:[%s8519_s4 + $0x30] sm:$0xff]  ;;  %s8350_s1 = smov 33   ;;  %s8351_s5 = smov 37  }
  0x16   :  { %6906 = vmatprep.mubr.msk.f32.mxu0 %vm8315_vm0, %v8312_v0  ;;  %6981 = vmatprep.mubr.msk.f32.mxu1 %vm8315_vm0, %v8312_v0  ;;  %v266_v40 = vld [vmem:[%s8519_s4 + $0x20] sm:$0xff]  ;;  %v224_v45 = vld [vmem:[%s8506_s30 + $0x38] sm:$0xff]  ;;  %v272_v51 = vld [vmem:[%s8594_s8 + $0x8] sm:$0xff]  ;;  %s8352_s10 = smov 36  }
  0x17   :  { %v269_v46 = vld [vmem:[%s8519_s4 + $0x38] sm:$0xff]  ;;  %v225_v47 = vld [vmem:[%s8506_s30 + $0x40] sm:$0xff]  ;;  %v273_v53 = vld [vmem:[%s8594_s8 + $0x10] sm:$0xff]  ;;  %s8343_s30 = smov 30  }
  0x18   :  { %v270_v48 = vld [vmem:[%s8519_s4 + $0x40] sm:$0xff]  ;;  %v254_v54 = vld [vmem:[%s8611_s17 + $0x8] sm:$0xff]  ;;  %v274_v55 = vld [vmem:[%s8594_s8 + $0x18] sm:$0xff]  ;;  %s8344_s4 = smov 26  }
  0x19   :  { %6907 = vmatmul.mubr.msk.f32.gmra.mrb[8].mxu0 %vm289_vm2, %v239_v11  ;;  %6982 = vmatmul.mubr.msk.f32.vlgmr.msra.gmra.mrb[8].mxu1 %vm289_vm2, %v244_v12  ;;  %v271_v49 = vld [vmem:[%s8594_s8] sm:$0xff]  ;;  %v255_v56 = vld [vmem:[%s8611_s17 + $0x10] sm:$0xff]  ;;  %v256_v58 = vld [vmem:[%s8611_s17 + $0x18] sm:$0xff]  ;;  %v8328_v11 = vmov 0.0|0.0  }
  0x1a   :  { %6923 = vmatprep.mubr.msk.f32.mxu0 %vm8315_vm0, %v8312_v0  ;;  %6984 = vmatprep.mubr.msk.f32.mxu1 %vm8315_vm0, %v8312_v0  ;;  %v158_v50 = vld [vmem:[%s6122_s13] sm:$0x3f]  ;;  %v276_v59 = vld [vmem:[%s8594_s8 + $0x28] sm:$0xff]  ;;  %v277_v61 = vld [vmem:[%s8594_s8 + $0x30] sm:$0xff]  ;;  %s8331_s13 = smov 20  }
  0x1b   :  { %7009 = vmatpush3.msk.msra.mxu1 %vm459_vm3, %v8386_v4  ;;  %v253_v52 = vld [vmem:[%s8611_s17] sm:$0xff]  ;;  %v258_v62 = vld [vmem:[%s8611_s17 + $0x28] sm:$0xff]  ;;  %v278_v63 = vld [vmem:[%s8594_s8 + $0x38] sm:$0xff]  ;;  %s6126_s16 = sld [smem:[%s10664_s0 + %s8331_s13]]   ;;  %s8339_s13 = smov 24  }
  0x1c   :  { %7037 = vmatprep.subr.mxu1 %v8312_v0  ;;  %v275_v57 = vld [vmem:[%s8594_s8 + $0x20] sm:$0xff]  ;;  %v260_v3 = vld [vmem:[%s8611_s17 + $0x38] sm:$0xff]  ;;  %v191_v8 = vld [vmem:[%s8684_s21 + $0x8] sm:$0xff] }
  0x1d   :  { %6924 = vmatmul.mubr.msk.f32.vlgmr.msra.gmra.mrb[0].mxu0 %vm431_vm4, %v208_v13  ;;  %6985 = vmatmul.mubr.msk.f32.gmra.mrb[10].mxu1 %vm289_vm2, %v245_v14  ;;  %v257_v60 = vld [vmem:[%s8611_s17 + $0x20] sm:$0xff]  ;;  %v227_v9 = vld [vmem:[%s8700_s29 + $0x8] sm:$0xff]  ;;  %v192_v10 = vld [vmem:[%s8684_s21 + $0x10] sm:$0xff] }
  0x1e   :  { %6951 = vmatpush3.msk.msra.mxu0 %vm459_vm3, %v8447_v15  ;;  %6926 = vmatprep.mubr.msk.f32.mxu0 %vm8315_vm0, %v8312_v0  ;;  %v279_v2 = vld [vmem:[%s8594_s8 + $0x40] sm:$0xff]  ;;  %v228_v12 = vld [vmem:[%s8700_s29 + $0x10] sm:$0xff]  ;;  %v193_v13 = vld [vmem:[%s8684_s21 + $0x18] sm:$0xff]  ;;  %s8345_s8 = smov 29  }
  0x1f   :  { %6987 = vmatprep.mubr.msk.f32.mxu1 %vm8315_vm0, %v8312_v0  ;;  %7066 = vmatprep.subr.mxu0 %v8312_v0  ;;  %v190_v5 = vld [vmem:[%s8684_s21] sm:$0xff]  ;;  %v229_v14 = vld [vmem:[%s8700_s29 + $0x18] sm:$0xff] }
  0x20   :  { %v157_v6 = vld [vmem:[%s6121_s25] sm:$0xff]  ;;  %s8335_s25 = smov 21  }
  0x21   :  { %6927 = vmatmul.mubr.msk.f32.gmra.mrb[2].mxu0 %vm431_vm4, %v209_v16  ;;  %6988 = vmatmul.mubr.msk.f32.gmra.mrb[12].mxu1 %vm289_vm2, %v246_v17  ;;  %v226_v7 = vld [vmem:[%s8700_s29] sm:$0xff]  ;;  %v195_v17 = vld [vmem:[%s8684_s21 + $0x28] sm:$0xff]  ;;  %s6127_s28 = sld [smem:[%s10664_s0 + %s8335_s25]]  }
  0x22   :  { %6929 = vmatprep.mubr.msk.f32.mxu0 %vm8315_vm0, %v8312_v0  ;;  %6990 = vmatprep.mubr.msk.f32.mxu1 %vm8315_vm0, %v8312_v0  ;;  %v230_v16 = vld [vmem:[%s8700_s29 + $0x20] sm:$0xff]  ;;  %s6131_s25 = sld [smem:[%s10664_s0 + %s8341_s22]]  }
  0x23   :  { %s6140_s22 = sld [smem:[%s10664_s0 + %s8347_s19]]  }
  0x25   :  { %6930 = vmatmul.mubr.msk.f32.gmra.mrb[4].mxu0 %vm431_vm4, %v210_v18  ;;  %6991 = vmatmul.mubr.msk.f32.gmra.mrb[14].mxu1 %vm289_vm2, %v247_v19  ;;  %v231_v18 = vld [vmem:[%s8700_s29 + $0x28] sm:$0xff]  ;;  %v196_v19 = vld [vmem:[%s8684_s21 + $0x30] sm:$0xff] }
  0x26   :  { %6932 = vmatprep.mubr.msk.f32.mxu0 %vm8315_vm0, %v8312_v0  ;;  %6993 = vmatprep.mubr.msk.f32.mxu1 %vm8315_vm0, %v8312_v0 }
  0x29   :  { %6933 = vmatmul.mubr.msk.f32.gmra.mrb[6].mxu0 %vm431_vm4, %v211_v20  ;;  %6994 = vmatmul.mubr.msk.f32.gmra.mrb[16].mxu1 %vm289_vm2, %v248_v21  ;;  %v232_v20 = vld [vmem:[%s8700_s29 + $0x30] sm:$0xff]  ;;  %v197_v21 = vld [vmem:[%s8684_s21 + $0x38] sm:$0xff] }
  0x2a   :  { %6935 = vmatprep.mubr.msk.f32.mxu0 %vm8315_vm0, %v8312_v0  ;;  %6996 = vmatprep.mubr.msk.f32.mxu1 %vm8315_vm0, %v8312_v0 }
  0x2d   :  { %6936 = vmatmul.mubr.msk.f32.gmra.mrb[8].mxu0 %vm431_vm4, %v212_v22  ;;  %6997 = vmatmul.mubr.msk.f32.gmra.mrb[18].mxu1 %vm289_vm2, %v249_v23  ;;  %v233_v22 = vld [vmem:[%s8700_s29 + $0x38] sm:$0xff]  ;;  %v198_v23 = vld [vmem:[%s8684_s21 + $0x40] sm:$0xff] }
  0x2e   :  { %6938 = vmatprep.mubr.msk.f32.mxu0 %vm8315_vm0, %v8312_v0  ;;  %6999 = vmatprep.mubr.msk.f32.mxu1 %vm8315_vm0, %v8312_v0 }
  0x31   :  { %6939 = vmatmul.mubr.msk.f32.gmra.mrb[10].mxu0 %vm431_vm4, %v213_v24  ;;  %7000 = vmatmul.mubr.msk.f32.gmra.mrb[20].mxu1 %vm289_vm2, %v250_v25  ;;  %v234_v24 = vld [vmem:[%s8700_s29 + $0x40] sm:$0xff]  ;;  %s8336_s29 = smov 23  }
  0x32   :  { %6941 = vmatprep.mubr.msk.f32.mxu0 %vm8315_vm0, %v8312_v0  ;;  %7002 = vmatprep.mubr.msk.f32.mxu1 %vm8315_vm0, %v8312_v0  ;;  %v181_v25 = vld [vmem:[%s8773_s2] sm:$0xff] }
  0x35   :  { %6942 = vmatmul.mubr.msk.f32.gmra.mrb[12].mxu0 %vm431_vm4, %v214_v26  ;;  %7003 = vmatmul.mubr.msk.f32.gmra.mrb[22].mxu1 %vm289_vm2, %v251_v27  ;;  %v159_v26 = vld [vmem:[%s6123_s6] sm:$0xff]  ;;  %s6125_s6 = sld [smem:[%s10664_s0 + %s8337_s3]]  }
  0x36   :  { %6944 = vmatprep.mubr.msk.f32.mxu0 %vm8315_vm0, %v8312_v0  ;;  %7005 = vmatprep.mubr.msk.f32.mxu1 %vm8315_vm0, %v8312_v0  ;;  %v280_v27 = vld [vmem:[%s8786_s12] sm:$0xff]  ;;  %s6136_s3 = sld [smem:[%s10664_s0 + %s8343_s30]]  }
  0x37   :  { %s6141_s30 = sld [smem:[%s10664_s0 + %s8349_s27]]  }
  0x39   :  { %6945 = vmatmul.mubr.msk.f32.gmra.mrb[14].mxu0 %vm431_vm4, %v215_v28  ;;  %7006 = vmatmul.mubr.msk.f32.gmra.mrb[24].mxu1 %vm289_vm2, %v252_v29  ;;  %v182_v28 = vld [vmem:[%s8773_s2 + $0x8] sm:$0xff] }
  0x3a   :  { %6947 = vmatprep.mubr.msk.f32.mxu0 %vm8315_vm0, %v8312_v0  ;;  %7010 = vmatprep.mubr.msk.f32.mxu1 %vm8315_vm0, %v8312_v0  ;;  %v281_v29 = vld [vmem:[%s8786_s12 + $0x8] sm:$0xff] }
  0x3d   :  { %6948 = vmatmul.mubr.msk.f32.gmra.mrb[16].mxu0 %vm431_vm4, %v216_v30  ;;  %7011 = vmatmul.mubr.msk.f32.vlgmr.msra.gmra.mrb[8].mxu1 %vm431_vm4, %v217_v31  ;;  %v183_v30 = vld [vmem:[%s8773_s2 + $0x10] sm:$0xff] }
  0x3e   :  { %6952 = vmatprep.mubr.msk.f32.mxu0 %vm8315_vm0, %v8312_v0  ;;  %7013 = vmatprep.mubr.msk.f32.mxu1 %vm8315_vm0, %v8312_v0  ;;  %v282_v31 = vld [vmem:[%s8786_s12 + $0x10] sm:$0xff] }
  0x3f   :  { %7038 = vmatpush3.msk.msra.mxu1 %vm459_vm3, %v8447_v15 }
  0x40   :  { %7153 = vmatprep.subr.mxu1 %v8312_v0 }
  0x41   :  { %6953 = vmatmul.mubr.msk.f32.vlgmr.msra.gmra.mrb[0].mxu0 %vm431_vm4, %v262_v32  ;;  %7014 = vmatmul.mubr.msk.f32.gmra.mrb[10].mxu1 %vm431_vm4, %v218_v33  ;;  %v184_v32 = vld [vmem:[%s8773_s2 + $0x18] sm:$0xff] }
  0x42   :  { %7067 = vmatpush3.msk.msra.mxu0 %vm317_vm1, %v8376_v1  ;;  %6955 = vmatprep.mubr.msk.f32.mxu0 %vm8315_vm0, %v8312_v0  ;;  %v259_v1 = vld [vmem:[%s8611_s17 + $0x30] sm:$0xff]  ;;  %v283_v33 = vld [vmem:[%s8786_s12 + $0x18] sm:$0xff] }
  0x43   :  { %7016 = vmatprep.mubr.msk.f32.mxu1 %vm8315_vm0, %v8312_v0  ;;  %7095 = vmatprep.subr.mxu0 %v8312_v0 }
  0x45   :  { %6956 = vmatmul.mubr.msk.f32.gmra.mrb[2].mxu0 %vm431_vm4, %v263_v34  ;;  %7017 = vmatmul.mubr.msk.f32.gmra.mrb[12].mxu1 %vm431_vm4, %v219_v35  ;;  %v185_v34 = vld [vmem:[%s8773_s2 + $0x20] sm:$0xff] }
  0x46   :  { %6958 = vmatprep.mubr.msk.f32.mxu0 %vm8315_vm0, %v8312_v0  ;;  %7019 = vmatprep.mubr.msk.f32.mxu1 %vm8315_vm0, %v8312_v0  ;;  %v284_v35 = vld [vmem:[%s8786_s12 + $0x20] sm:$0xff] }
  0x49   :  { %6959 = vmatmul.mubr.msk.f32.gmra.mrb[4].mxu0 %vm431_vm4, %v264_v36  ;;  %7020 = vmatmul.mubr.msk.f32.gmra.mrb[14].mxu1 %vm431_vm4, %v220_v37  ;;  %v186_v36 = vld [vmem:[%s8773_s2 + $0x28] sm:$0xff] }
  0x4a   :  { %6961 = vmatprep.mubr.msk.f32.mxu0 %vm8315_vm0, %v8312_v0  ;;  %7022 = vmatprep.mubr.msk.f32.mxu1 %vm8315_vm0, %v8312_v0  ;;  %v285_v37 = vld [vmem:[%s8786_s12 + $0x28] sm:$0xff] }
  0x4d   :  { %6962 = vmatmul.mubr.msk.f32.gmra.mrb[6].mxu0 %vm431_vm4, %v265_v38  ;;  %7023 = vmatmul.mubr.msk.f32.gmra.mrb[16].mxu1 %vm431_vm4, %v221_v39  ;;  %v187_v38 = vld [vmem:[%s8773_s2 + $0x30] sm:$0xff] }
  0x4e   :  { %6964 = vmatprep.mubr.msk.f32.mxu0 %vm8315_vm0, %v8312_v0  ;;  %7025 = vmatprep.mubr.msk.f32.mxu1 %vm8315_vm0, %v8312_v0  ;;  %v286_v39 = vld [vmem:[%s8786_s12 + $0x30] sm:$0xff] }
  0x51   :  { %6965 = vmatmul.mubr.msk.f32.gmra.mrb[8].mxu0 %vm431_vm4, %v266_v40  ;;  %7026 = vmatmul.mubr.msk.f32.gmra.mrb[18].mxu1 %vm431_vm4, %v222_v41  ;;  %v188_v40 = vld [vmem:[%s8773_s2 + $0x38] sm:$0xff] }
  0x52   :  { %6967 = vmatprep.mubr.msk.f32.mxu0 %vm8315_vm0, %v8312_v0  ;;  %7028 = vmatprep.mubr.msk.f32.mxu1 %vm8315_vm0, %v8312_v0  ;;  %v287_v41 = vld [vmem:[%s8786_s12 + $0x38] sm:$0xff] }
  0x55   :  { %6968 = vmatmul.mubr.msk.f32.gmra.mrb[10].mxu0 %vm431_vm4, %v267_v42  ;;  %7029 = vmatmul.mubr.msk.f32.gmra.mrb[20].mxu1 %vm431_vm4, %v223_v43  ;;  %v189_v42 = vld [vmem:[%s8773_s2 + $0x40] sm:$0xff]  ;;  %s6129_s2 = sld [smem:[%s10664_s0 + %s8336_s29]]  }
  0x56   :  { %6970 = vmatprep.mubr.msk.f32.mxu0 %vm8315_vm0, %v8312_v0  ;;  %7031 = vmatprep.mubr.msk.f32.mxu1 %vm8315_vm0, %v8312_v0  ;;  %v163_v43 = vld [vmem:[%s6126_s16] sm:$0xff]  ;;  %s6134_s29 = sld [smem:[%s10664_s0 + %s8342_s26]]  }
  0x57   :  { %s6138_s26 = sld [smem:[%s10664_s0 + %s8348_s23]]  }
  0x59   :  { %6971 = vmatmul.mubr.msk.f32.gmra.mrb[12].mxu0 %vm431_vm4, %v268_v44  ;;  %7032 = vmatmul.mubr.msk.f32.gmra.mrb[22].mxu1 %vm431_vm4, %v224_v45  ;;  %v164_v44 = vld [vmem:[%s6126_s16 + $0x8] sm:$0x3]  ;;  %v288_v45 = vld [vmem:[%s8786_s12 + $0x40] sm:$0xff]  ;;  %s6128_s12 = sld [smem:[%s10664_s0 + %s8338_s7]]  }
  0x5a   :  { %6973 = vmatprep.mubr.msk.f32.mxu0 %vm8315_vm0, %v8312_v0  ;;  %7034 = vmatprep.mubr.msk.f32.mxu1 %vm8315_vm0, %v8312_v0  ;;  %s6130_s16 = sld [smem:[%s10664_s0 + %s8339_s13]]  }
  0x5b   :  { %s6132_s7 = sld [smem:[%s10664_s0 + %s8344_s4]]  }
  0x5c   :  { %s6135_s13 = sld [smem:[%s10664_s0 + %s8345_s8]]  }
  0x5d   :  { %6974 = vmatmul.mubr.msk.f32.gmra.mrb[14].mxu0 %vm431_vm4, %v269_v46  ;;  %7035 = vmatmul.mubr.msk.f32.gmra.mrb[24].mxu1 %vm431_vm4, %v225_v47  ;;  %v8881_v47 = vpack.c.bf16 %v164_v44, %v163_v43  ;;  %s6139_s4 = sld [smem:[%s10664_s0 + %s8350_s1]]  }
  0x5e   :  { %6976 = vmatprep.mubr.msk.f32.mxu0 %vm8315_vm0, %v8312_v0  ;;  %7039 = vmatprep.mubr.msk.f32.mxu1 %vm8315_vm0, %v8312_v0  ;;  %s10452_s8 = sld [smem:[%s10664_s0 + %s8351_s5]]  }
  0x61   :  { %6977 = vmatmul.mubr.msk.f32.gmra.mrb[16].mxu0 %vm431_vm4, %v270_v48  ;;  %7040 = vmatmul.mubr.msk.f32.vlgmr.msra.gmra.mrb[8].mxu1 %vm431_vm4, %v271_v49 }
  0x62   :  { %7042 = vmatprep.mubr.msk.f32.mxu1 %vm8315_vm0, %v8312_v0  ;;  %7068 = vmatprep.mubr.msk.f32.mxu0 %vm8315_vm0, %v8312_v0 }
  0x63   :  { %7154 = vmatpush3.msk.msra.mxu1 %vm1590_vm5, %v158_v50 }
  0x64   :  { %7182 = vmatprep.subr.mxu1 %v8312_v0 }
  0x65   :  { %7043 = vmatmul.mubr.msk.f32.gmra.mrb[10].mxu1 %vm431_vm4, %v272_v51  ;;  %7069 = vmatmul.mubr.msk.f32.vlgmr.msra.gmra.mrb[18].mxu0 %vm289_vm2, %v253_v52 }
  0x66   :  { %7096 = vmatpush3.msk.msra.mxu0 %vm459_vm3, %v8386_v4  ;;  %7045 = vmatprep.mubr.msk.f32.mxu1 %vm8315_vm0, %v8312_v0  ;;  %v261_v4 = vld [vmem:[%s8611_s17 + $0x40] sm:$0xff]  ;;  %s8332_s17 = smov 8  }
  0x67   :  { %7071 = vmatprep.mubr.msk.f32.mxu0 %vm8315_vm0, %v8312_v0  ;;  %7124 = vmatprep.subr.mxu0 %v8312_v0  ;;  %s8863_s20 = sld [smem:[%s10664_s0 + %s8332_s17]]  }
  0x69   :  { %7046 = vmatmul.mubr.msk.f32.gmra.mrb[12].mxu1 %vm431_vm4, %v273_v53  ;;  %7072 = vmatmul.mubr.msk.f32.gmra.mrb[20].mxu0 %vm289_vm2, %v254_v54 }
  0x6a   :  { %7048 = vmatprep.mubr.msk.f32.mxu1 %vm8315_vm0, %v8312_v0  ;;  %7074 = vmatprep.mubr.msk.f32.mxu0 %vm8315_vm0, %v8312_v0 }
  0x6d   :  { %7049 = vmatmul.mubr.msk.f32.gmra.mrb[14].mxu1 %vm431_vm4, %v274_v55  ;;  %7075 = vmatmul.mubr.msk.f32.gmra.mrb[22].mxu0 %vm289_vm2, %v255_v56  ;;  %v199_v46 = vld [vmem:[%s8863_s20] sm:$0xff]  ;;  %v200_v49 = vld [vmem:[%s8863_s20 + $0x8] sm:$0xff]  ;;  %v201_v50 = vld [vmem:[%s8863_s20 + $0x10] sm:$0xff] }
  0x6e   :  { %7051 = vmatprep.mubr.msk.f32.mxu1 %vm8315_vm0, %v8312_v0  ;;  %7077 = vmatprep.mubr.msk.f32.mxu0 %vm8315_vm0, %v8312_v0  ;;  %v202_v51 = vld [vmem:[%s8863_s20 + $0x18] sm:$0xff]  ;;  %v203_v52 = vld [vmem:[%s8863_s20 + $0x20] sm:$0xff]  ;;  %v204_v55 = vld [vmem:[%s8863_s20 + $0x28] sm:$0xff] }
  0x71   :  { %7052 = vmatmul.mubr.msk.f32.gmra.mrb[16].mxu1 %vm431_vm4, %v275_v57  ;;  %7078 = vmatmul.mubr.msk.f32.gmra.mrb[24].mxu0 %vm289_vm2, %v256_v58 }
  0x72   :  { %7054 = vmatprep.mubr.msk.f32.mxu1 %vm8315_vm0, %v8312_v0  ;;  %7080 = vmatprep.mubr.msk.f32.mxu0 %vm8315_vm0, %v8312_v0 }
  0x75   :  { %7055 = vmatmul.mubr.msk.f32.gmra.mrb[18].mxu1 %vm431_vm4, %v276_v59  ;;  %7081 = vmatmul.mubr.msk.f32.gmra.mrb[26].mxu0 %vm289_vm2, %v257_v60 }
  0x76   :  { %7057 = vmatprep.mubr.msk.f32.mxu1 %vm8315_vm0, %v8312_v0  ;;  %7083 = vmatprep.mubr.msk.f32.mxu0 %vm8315_vm0, %v8312_v0 }
  0x79   :  { %7058 = vmatmul.mubr.msk.f32.gmra.mrb[20].mxu1 %vm431_vm4, %v277_v61  ;;  %7084 = vmatmul.mubr.msk.f32.gmra.mrb[28].mxu0 %vm289_vm2, %v258_v62  ;;  %v205_v61 = vld [vmem:[%s8863_s20 + $0x30] sm:$0xff] }
  0x7a   :  { %7060 = vmatprep.mubr.msk.f32.mxu1 %vm8315_vm0, %v8312_v0  ;;  %7086 = vmatprep.mubr.msk.f32.mxu0 %vm8315_vm0, %v8312_v0 }
  0x7d   :  { %7061 = vmatmul.mubr.msk.f32.gmra.mrb[22].mxu1 %vm431_vm4, %v278_v63  ;;  %7087 = vmatmul.mubr.msk.f32.gmra.mrb[30].mxu0 %vm289_vm2, %v259_v1  ;;  %v206_v1 = vld [vmem:[%s8863_s20 + $0x38] sm:$0xff] }
  0x7e   :  { %7063 = vmatprep.mubr.msk.f32.mxu1 %vm8315_vm0, %v8312_v0  ;;  %7089 = vmatprep.mubr.msk.f32.mxu0 %vm8315_vm0, %v8312_v0 }
  0x81   :  { %7064 = vmatmul.mubr.msk.f32.gmra.mrb[24].mxu1 %vm431_vm4, %v279_v2  ;;  %7090 = vmatmul.mubr.msk.f32.gmra.mrb[32].mxu0 %vm289_vm2, %v260_v3 }
  0x82   :  { %7092 = vmatprep.mubr.msk.f32.mxu0 %vm8315_vm0, %v8312_v0  ;;  %7155 = vmatprep.mubr.msk.f32.mxu1 %vm8315_vm0, %v8312_v0 }
  0x85   :  { %7093 = vmatmul.mubr.msk.f32.gmra.mrb[34].mxu0 %vm289_vm2, %v261_v4  ;;  %7156 = vmatmul.mubr.msk.f32.vlgmr.msra.gmra.mrb[26].mxu1 %vm1562_vm6, %v190_v5  ;;  %v207_v4 = vld [vmem:[%s8863_s20 + $0x40] sm:$0xff] }
  0x86   :  { %7097 = vmatprep.mubr.msk.f32.mxu0 %vm8315_vm0, %v8312_v0  ;;  %7158 = vmatprep.mubr.msk.f32.mxu1 %vm8315_vm0, %v8312_v0 }
  0x87   :  { %7183 = vmatpush3.msra.mxu1 %v157_v6 }
  0x88   :  { %7211 = vmatprep.subr.mxu1 %v8312_v0 }
  0x89   :  { %7098 = vmatmul.mubr.msk.f32.vlgmr.msra.gmra.mrb[18].mxu0 %vm431_vm4, %v226_v7  ;;  %7159 = vmatmul.mubr.msk.f32.gmra.mrb[28].mxu1 %vm1562_vm6, %v191_v8 }
  0x8a   :  { %7125 = vmatpush3.msk.msra.mxu0 %vm459_vm3, %v8447_v15  ;;  %7100 = vmatprep.mubr.msk.f32.mxu0 %vm8315_vm0, %v8312_v0  ;;  %v194_v15 = vld [vmem:[%s8684_s21 + $0x20] sm:$0xff]  ;;  %s8334_s21 = smov 18  }
  0x8b   :  { %7161 = vmatprep.mubr.msk.f32.mxu1 %vm8315_vm0, %v8312_v0  ;;  %7915 = vmatprep.subr.bf16.mxu0 %v8328_v11  ;;  %s6124_s24 = sld [smem:[%s10664_s0 + %s8334_s21]]  }
  0x8c   :  { %s6133_s21 = sld [smem:[%s10664_s0 + %s8340_s18]]  }
  0x8d   :  { %7101 = vmatmul.mubr.msk.f32.gmra.mrb[20].mxu0 %vm431_vm4, %v227_v9  ;;  %7162 = vmatmul.mubr.msk.f32.gmra.mrb[30].mxu1 %vm1562_vm6, %v192_v10  ;;  %s6137_s18 = sld [smem:[%s10664_s0 + %s8346_s14]]  }
  0x8e   :  { %7103 = vmatprep.mubr.msk.f32.mxu0 %vm8315_vm0, %v8312_v0  ;;  %7164 = vmatprep.mubr.msk.f32.mxu1 %vm8315_vm0, %v8312_v0  ;;  %s6142_s14 = sld [smem:[%s10664_s0 + %s8352_s10]]  }
  0x91   :  { %7104 = vmatmul.mubr.msk.f32.gmra.mrb[22].mxu0 %vm431_vm4, %v228_v12  ;;  %7165 = vmatmul.mubr.msk.f32.gmra.mrb[32].mxu1 %vm1562_vm6, %v193_v13  ;;  %v160_v56 = vld [vmem:[%s6124_s24] sm:$0xff]  ;;  %v161_v57 = vld [vmem:[%s6124_s24 + $0x8] sm:$0x3] }
  0x92   :  { %7106 = vmatprep.mubr.msk.f32.mxu0 %vm8315_vm0, %v8312_v0  ;;  %7167 = vmatprep.mubr.msk.f32.mxu1 %vm8315_vm0, %v8312_v0  ;;  %v7916_v58 = vpack.c.bf16 %v161_v57, %v160_v56 }
  0x95   :  { %7107 = vmatmul.mubr.msk.f32.gmra.mrb[24].mxu0 %vm431_vm4, %v229_v14  ;;  %7168 = vmatmul.mubr.msk.f32.gmra.mrb[34].mxu1 %vm1562_vm6, %v194_v15 }
  0x96   :  { %7109 = vmatprep.mubr.msk.f32.mxu0 %vm8315_vm0, %v8312_v0  ;;  %7170 = vmatprep.mubr.msk.f32.mxu1 %vm8315_vm0, %v8312_v0 }
  0x99   :  { %7110 = vmatmul.mubr.msk.f32.gmra.mrb[26].mxu0 %vm431_vm4, %v230_v16  ;;  %7171 = vmatmul.mubr.msk.f32.gmra.mrb[36].mxu1 %vm1562_vm6, %v195_v17 }
  0x9a   :  { %7112 = vmatprep.mubr.msk.f32.mxu0 %vm8315_vm0, %v8312_v0  ;;  %7173 = vmatprep.mubr.msk.f32.mxu1 %vm8315_vm0, %v8312_v0 }
  0x9d   :  { %7113 = vmatmul.mubr.msk.f32.gmra.mrb[28].mxu0 %vm431_vm4, %v231_v18  ;;  %7174 = vmatmul.mubr.msk.f32.gmra.mrb[38].mxu1 %vm1562_vm6, %v196_v19 }
  0x9e   :  { %7115 = vmatprep.mubr.msk.f32.mxu0 %vm8315_vm0, %v8312_v0  ;;  %7176 = vmatprep.mubr.msk.f32.mxu1 %vm8315_vm0, %v8312_v0 }
  0xa1   :  { %7116 = vmatmul.mubr.msk.f32.gmra.mrb[30].mxu0 %vm431_vm4, %v232_v20  ;;  %7177 = vmatmul.mubr.msk.f32.gmra.mrb[40].mxu1 %vm1562_vm6, %v197_v21 }
  0xa2   :  { %7118 = vmatprep.mubr.msk.f32.mxu0 %vm8315_vm0, %v8312_v0  ;;  %7179 = vmatprep.mubr.msk.f32.mxu1 %vm8315_vm0, %v8312_v0 }
  0xa5   :  { %7119 = vmatmul.mubr.msk.f32.gmra.mrb[32].mxu0 %vm431_vm4, %v233_v22  ;;  %7180 = vmatmul.mubr.msk.f32.gmra.mrb[42].mxu1 %vm1562_vm6, %v198_v23 }
  0xa6   :  { %7121 = vmatprep.mubr.msk.f32.mxu0 %vm8315_vm0, %v8312_v0  ;;  %7184 = vmatprep.mubr.msk.f32.mxu1 %vm8315_vm0, %v8312_v0 }
  0xa9   :  { %7122 = vmatmul.mubr.msk.f32.gmra.mrb[34].mxu0 %vm431_vm4, %v234_v24  ;;  %7185 = vmatmul.mubr.msk.f32.vlgmr.msra.gmra.mrb[44].mxu1 %vm1704_vm7, %v181_v25 }
  0xaa   :  { %7126 = vmatprep.mubr.msk.f32.mxu0 %vm8315_vm0, %v8312_v0  ;;  %7187 = vmatprep.mubr.msk.f32.mxu1 %vm8315_vm0, %v8312_v0 }
  0xab   :  { %7212 = vmatpush3.msra.mxu1 %v159_v26 }
  0xac   :  { %7919 = vmatprep.subr.bf16.mxu1 %v8328_v11 }
  0xad   :  { %7127 = vmatmul.mubr.msk.f32.vlgmr.msra.gmra.mrb[18].mxu0 %vm431_vm4, %v280_v27  ;;  %7188 = vmatmul.mubr.msk.f32.gmra.mrb[46].mxu1 %vm1704_vm7, %v182_v28 }
  0xae   :  { %7129 = vmatprep.mubr.msk.f32.mxu0 %vm8315_vm0, %v8312_v0  ;;  %7190 = vmatprep.mubr.msk.f32.mxu1 %vm8315_vm0, %v8312_v0 }
  0xaf   :  { %7918 = vmatpush3.bf16.msk.msra.mxu0 %vm8884_vm9, %v7916_v58 }
  0xb0   :  { %7923 = vmatprep.subr.bf16.mxu0 %v8328_v11 }
  0xb1   :  { %7130 = vmatmul.mubr.msk.f32.gmra.mrb[20].mxu0 %vm431_vm4, %v281_v29  ;;  %7191 = vmatmul.mubr.msk.f32.gmra.mrb[48].mxu1 %vm1704_vm7, %v183_v30 }
  0xb2   :  { %7132 = vmatprep.mubr.msk.f32.mxu0 %vm8315_vm0, %v8312_v0  ;;  %7193 = vmatprep.mubr.msk.f32.mxu1 %vm8315_vm0, %v8312_v0 }
  0xb5   :  { %7133 = vmatmul.mubr.msk.f32.gmra.mrb[22].mxu0 %vm431_vm4, %v282_v31  ;;  %7194 = vmatmul.mubr.msk.f32.gmra.mrb[50].mxu1 %vm1704_vm7, %v184_v32 }
  0xb6   :  { %7135 = vmatprep.mubr.msk.f32.mxu0 %vm8315_vm0, %v8312_v0  ;;  %7196 = vmatprep.mubr.msk.f32.mxu1 %vm8315_vm0, %v8312_v0 }
  0xb9   :  { %7136 = vmatmul.mubr.msk.f32.gmra.mrb[24].mxu0 %vm431_vm4, %v283_v33  ;;  %7197 = vmatmul.mubr.msk.f32.gmra.mrb[52].mxu1 %vm1704_vm7, %v185_v34 }
  0xba   :  { %7138 = vmatprep.mubr.msk.f32.mxu0 %vm8315_vm0, %v8312_v0  ;;  %7199 = vmatprep.mubr.msk.f32.mxu1 %vm8315_vm0, %v8312_v0 }
  0xbd   :  { %7139 = vmatmul.mubr.msk.f32.gmra.mrb[26].mxu0 %vm431_vm4, %v284_v35  ;;  %7200 = vmatmul.mubr.msk.f32.gmra.mrb[54].mxu1 %vm1704_vm7, %v186_v36 }
  0xbe   :  { %7141 = vmatprep.mubr.msk.f32.mxu0 %vm8315_vm0, %v8312_v0  ;;  %7202 = vmatprep.mubr.msk.f32.mxu1 %vm8315_vm0, %v8312_v0 }
  0xc1   :  { %7142 = vmatmul.mubr.msk.f32.gmra.mrb[28].mxu0 %vm431_vm4, %v285_v37  ;;  %7203 = vmatmul.mubr.msk.f32.gmra.mrb[56].mxu1 %vm1704_vm7, %v187_v38 }
  0xc2   :  { %7144 = vmatprep.mubr.msk.f32.mxu0 %vm8315_vm0, %v8312_v0  ;;  %7205 = vmatprep.mubr.msk.f32.mxu1 %vm8315_vm0, %v8312_v0 }
  0xc5   :  { %7145 = vmatmul.mubr.msk.f32.gmra.mrb[30].mxu0 %vm431_vm4, %v286_v39  ;;  %7206 = vmatmul.mubr.msk.f32.gmra.mrb[58].mxu1 %vm1704_vm7, %v188_v40 }
  0xc6   :  { %7147 = vmatprep.mubr.msk.f32.mxu0 %vm8315_vm0, %v8312_v0  ;;  %7208 = vmatprep.mubr.msk.f32.mxu1 %vm8315_vm0, %v8312_v0 }
  0xc9   :  { %7148 = vmatmul.mubr.msk.f32.gmra.mrb[32].mxu0 %vm431_vm4, %v287_v41  ;;  %7209 = vmatmul.mubr.msk.f32.gmra.mrb[60].mxu1 %vm1704_vm7, %v189_v42 }
  0xca   :  { %7150 = vmatprep.mubr.msk.f32.mxu0 %vm8315_vm0, %v8312_v0  ;;  %7213 = vmatprep.mubr.msk.f32.mxu1 %vm8315_vm0, %v8312_v0 }
  0xcd   :  { %7151 = vmatmul.mubr.msk.f32.gmra.mrb[34].mxu0 %vm431_vm4, %v288_v45  ;;  %7214 = vmatmul.mubr.msk.f32.vlgmr.msra.gmra.mrb[62].mxu1 %vm1704_vm7, %v199_v46 }
  0xce   :  { %7216 = vmatprep.mubr.msk.f32.mxu1 %vm8315_vm0, %v8312_v0  ;;  %7922 = vmatpush3.bf16.msk.msra.mxu1 %vm8884_vm9, %v8881_v47 }
  0xcf   :  { %7927 = vmatprep.subr.bf16.mxu1 %v8328_v11  ;;  %7244 = vmatprep.mubr.msk.f32.mxu0 %vm8315_vm0, %v8312_v0 }
  0xd1   :  { %7217 = vmatmul.mubr.msk.f32.gmra.mrb[64].mxu1 %vm1704_vm7, %v200_v49 }
  0xd2   :  { %7219 = vmatprep.mubr.msk.f32.mxu1 %vm8315_vm0, %v8312_v0 }
  0xd5   :  { %7220 = vmatmul.mubr.msk.f32.gmra.mrb[66].mxu1 %vm1704_vm7, %v201_v50 }
  0xd6   :  { %7222 = vmatprep.mubr.msk.f32.mxu1 %vm8315_vm0, %v8312_v0 }
  0xd9   :  { %7223 = vmatmul.mubr.msk.f32.gmra.mrb[68].mxu1 %vm1704_vm7, %v202_v51 }
  0xda   :  { %7225 = vmatprep.mubr.msk.f32.mxu1 %vm8315_vm0, %v8312_v0 }
  0xdc   :  { %v412_v53 = vpop.f32.mrb[0].mxu1 }
  0xdd   :  { %7226 = vmatmul.mubr.msk.f32.gmra.mrb[70].mxu1 %vm1704_vm7, %v203_v52  ;;  %v6911_v54 = vpop.f32.mrb[1].mxu1 }
  0xde   :  { %7228 = vmatprep.mubr.msk.f32.mxu1 %vm8315_vm0, %v8312_v0 }
  0xe0   :  { %v417_v59 = vpop.f32.mrb[2].mxu1 }
  0xe1   :  { %7229 = vmatmul.mubr.msk.f32.gmra.mrb[72].mxu1 %vm1704_vm7, %v204_v55  ;;  %v6914_v60 = vpop.f32.mrb[3].mxu1 }
  0xe2   :  { %7231 = vmatprep.mubr.msk.f32.mxu1 %vm8315_vm0, %v8312_v0 }
  0xe4   :  { %v422_v62 = vpop.f32.mrb[4].mxu1 }
  0xe5   :  { %7232 = vmatmul.mubr.msk.f32.gmra.mrb[74].mxu1 %vm1704_vm7, %v205_v61  ;;  %v6917_v63 = vpop.f32.mrb[5].mxu1 }
  0xe6   :  { %7234 = vmatprep.mubr.msk.f32.mxu1 %vm8315_vm0, %v8312_v0 }
  0xe8   :  { %v427_v2 = vpop.f32.mrb[6].mxu1 }
  0xe9   :  { %7235 = vmatmul.mubr.msk.f32.gmra.mrb[76].mxu1 %vm1704_vm7, %v206_v1  ;;  %v6920_v3 = vpop.f32.mrb[7].mxu1 }
  0xea   :  { %7237 = vmatprep.mubr.msk.f32.mxu1 %vm8315_vm0, %v8312_v0 }
  0xed   :  { %7238 = vmatmul.mubr.msk.f32.gmra.mrb[78].mxu1 %vm1704_vm7, %v207_v4 }
  0xee   :  { %7275 = vmatprep.mubr.msk.f32.mxu1 %vm8315_vm0, %v8312_v0 }
 0x114   :  { %v669_v5 = vpop.f32.mrb[0].mxu0 }
 0x115   :  { %v6954_v6 = vpop.f32.mrb[1].mxu0  ;;  %7276 = vmatmul.mubr.msk.f32.vlgmr.msra.gmra.mrb[80].mxu1 %vm2105_vm10, %v669_v5  ;;  %v1988_v26 = vmul.f32 %v669_v5, %v669_v5 }
 0x116   :  { %7278 = vmatprep.mubr.msk.f32.mxu1 %vm8315_vm0, %v8312_v0  ;;  %7930 = vmatpush3.bf16.msk.msra.mxu1 %vm8884_vm9, %v8881_v47 }
 0x117   :  { %7393 = vmatprep.subr.mxu1 %v8312_v0 }
 0x118   :  { %v674_v7 = vpop.f32.mrb[2].mxu0 }
 0x119   :  { %v6957_v8 = vpop.f32.mrb[3].mxu0  ;;  %7279 = vmatmul.mubr.msk.f32.gmra.mrb[82].mxu1 %vm2105_vm10, %v674_v7  ;;  %v1989_v33 = vmul.f32 %v674_v7, %v674_v7 }
 0x11a   :  { %7281 = vmatprep.mubr.msk.f32.mxu1 %vm8315_vm0, %v8312_v0 }
 0x11c   :  { %v679_v9 = vpop.f32.mrb[4].mxu0 }
 0x11d   :  { %v6960_v10 = vpop.f32.mrb[5].mxu0  ;;  %7282 = vmatmul.mubr.msk.f32.gmra.mrb[84].mxu1 %vm2105_vm10, %v679_v9  ;;  %v1990_v38 = vmul.f32 %v679_v9, %v679_v9 }
 0x11e   :  { %7284 = vmatprep.mubr.msk.f32.mxu1 %vm8315_vm0, %v8312_v0 }
 0x120   :  { %v684_v11 = vpop.f32.mrb[6].mxu0 }
 0x121   :  { %v6963_v12 = vpop.f32.mrb[7].mxu0  ;;  %7285 = vmatmul.mubr.msk.f32.gmra.mrb[86].mxu1 %vm2105_vm10, %v684_v11  ;;  %v1991_v43 = vmul.f32 %v684_v11, %v684_v11 }
 0x122   :  { %7287 = vmatprep.mubr.msk.f32.mxu1 %vm8315_vm0, %v8312_v0 }
 0x124   :  { %v689_v13 = vpop.f32.mrb[8].mxu0 }
 0x125   :  { %v6966_v14 = vpop.f32.mrb[9].mxu0  ;;  %7288 = vmatmul.mubr.msk.f32.gmra.mrb[88].mxu1 %vm2105_vm10, %v689_v13  ;;  %v1992_v50 = vmul.f32 %v689_v13, %v689_v13 }
 0x126   :  { %7290 = vmatprep.mubr.msk.f32.mxu1 %vm8315_vm0, %v8312_v0 }
 0x128   :  { %v694_v15 = vpop.f32.mrb[10].mxu0 }
 0x129   :  { %v7933_v16 = vadd.f32 %v694_v15, %v412_v53  ;;  %v6969_v17 = vpop.f32.mrb[11].mxu0 }
 0x12b   :  { %7291 = vmatmul.mubr.msk.f32.gmra.mrb[90].mxu1 %vm2105_vm10, %v7933_v16  ;;  %v1993_v55 = vmul.f32 %v7933_v16, %v7933_v16 }
 0x12c   :  { %v699_v18 = vpop.f32.mrb[12].mxu0  ;;  %7293 = vmatprep.mubr.msk.f32.mxu1 %vm8315_vm0, %v8312_v0 }
 0x12d   :  { %v7934_v19 = vadd.f32 %v699_v18, %v417_v59  ;;  %v6972_v20 = vpop.f32.mrb[13].mxu0 }
 0x12f   :  { %7294 = vmatmul.mubr.msk.f32.gmra.mrb[92].mxu1 %vm2105_vm10, %v7934_v19  ;;  %v1994_v60 = vmul.f32 %v7934_v19, %v7934_v19 }
 0x130   :  { %v704_v21 = vpop.f32.mrb[14].mxu0  ;;  %7296 = vmatprep.mubr.msk.f32.mxu1 %vm8315_vm0, %v8312_v0 }
 0x131   :  { %v7935_v22 = vadd.f32 %v704_v21, %v422_v62  ;;  %v6975_v23 = vpop.f32.mrb[15].mxu0 }
 0x133   :  { %7297 = vmatmul.mubr.msk.f32.gmra.mrb[94].mxu1 %vm2105_vm10, %v7935_v22 }
 0x134   :  { %v709_v24 = vpop.f32.mrb[16].mxu0  ;;  %v8962_v25 = vpop.f32.mrb[8].mxu1  ;;  %7299 = vmatprep.mubr.msk.f32.mxu1 %vm8315_vm0, %v8312_v0 }
 0x135   :  { %v7936_v27 = vadd.f32 %v709_v24, %v427_v2  ;;  %v1997_v28 = vmul.f32 %v8962_v25, %v8962_v25  ;;  %v6978_v29 = vpop.f32.mrb[17].mxu0  ;;  %v7041_v30 = vpop.f32.mrb[9].mxu1  ;;  %v1995_v2 = vmul.f32 %v7935_v22, %v7935_v22 }
 0x137   :  { %7300 = vmatmul.mubr.msk.f32.gmra.mrb[96].mxu1 %vm2105_vm10, %v7936_v27  ;;  %v8969_v31 = vadd.f32 %v1997_v28, %v1988_v26  ;;  %v1996_v7 = vmul.f32 %v7936_v27, %v7936_v27 }
 0x138   :  { %v8971_v32 = vpop.f32.mrb[10].mxu1  ;;  %7337 = vmatprep.mubr.msk.f32.mxu1 %vm8315_vm0, %v8312_v0 }
 0x139   :  { %v1998_v34 = vmul.f32 %v8971_v32, %v8971_v32  ;;  %v7044_v35 = vpop.f32.mrb[11].mxu1 }
 0x13b   :  { %v8977_v36 = vadd.f32 %v1998_v34, %v1989_v33 }
 0x13c   :  { %v8979_v37 = vpop.f32.mrb[12].mxu1 }
 0x13d   :  { %v1999_v39 = vmul.f32 %v8979_v37, %v8979_v37  ;;  %v7047_v40 = vpop.f32.mrb[13].mxu1 }
 0x13f   :  { %v8983_v41 = vadd.f32 %v1999_v39, %v1990_v38 }
 0x140   :  { %v8985_v42 = vpop.f32.mrb[14].mxu1 }
 0x141   :  { %v2000_v44 = vmul.f32 %v8985_v42, %v8985_v42  ;;  %v7050_v45 = vpop.f32.mrb[15].mxu1 }
 0x143   :  { %v8989_v46 = vadd.f32 %v2000_v44, %v1991_v43 }
 0x144   :  { %v8991_v49 = vpop.f32.mrb[16].mxu1 }
 0x145   :  { %v2001_v51 = vmul.f32 %v8991_v49, %v8991_v49  ;;  %v7053_v52 = vpop.f32.mrb[17].mxu1 }
 0x147   :  { %v8995_v53 = vadd.f32 %v2001_v51, %v1992_v50 }
 0x148   :  { %v8997_v54 = vpop.f32.mrb[18].mxu1 }
 0x149   :  { %v2002_v56 = vmul.f32 %v8997_v54, %v8997_v54  ;;  %v7056_v57 = vpop.f32.mrb[19].mxu1 }
 0x14b   :  { %v9001_v58 = vadd.f32 %v2002_v56, %v1993_v55 }
 0x14c   :  { %v9003_v59 = vpop.f32.mrb[20].mxu1 }
 0x14d   :  { %v2003_v61 = vmul.f32 %v9003_v59, %v9003_v59  ;;  %v7059_v62 = vpop.f32.mrb[21].mxu1 }
 0x14f   :  { %v9007_v63 = vadd.f32 %v2003_v61, %v1994_v60 }
 0x150   :  { %v9009_v1 = vpop.f32.mrb[22].mxu1 }
 0x151   :  { %v2004_v3 = vmul.f32 %v9009_v1, %v9009_v1  ;;  %v7062_v4 = vpop.f32.mrb[23].mxu1 }
 0x153   :  { %v9013_v5 = vadd.f32 %v2004_v3, %v1995_v2 }
 0x154   :  { %v9015_v6 = vpop.f32.mrb[24].mxu1 }
 0x155   :  { %v2005_v8 = vmul.f32 %v9015_v6, %v9015_v6  ;;  %v7065_v9 = vpop.f32.mrb[25].mxu1 }
 0x157   :  { %v9019_v10 = vadd.f32 %v2005_v8, %v1996_v7 }
 0x158   :  { %v1660_v11 = vpop.f32.mrb[26].mxu1 }
 0x159   :  { %v7157_v12 = vpop.f32.mrb[27].mxu1 }
 0x15c   :  { %v1665_v13 = vpop.f32.mrb[28].mxu1 }
 0x15d   :  { %v7160_v14 = vpop.f32.mrb[29].mxu1 }
 0x160   :  { %v1670_v15 = vpop.f32.mrb[30].mxu1 }
 0x161   :  { %v7163_v16 = vpop.f32.mrb[31].mxu1 }
 0x164   :  { %v1675_v17 = vpop.f32.mrb[32].mxu1 }
 0x165   :  { %v7166_v18 = vpop.f32.mrb[33].mxu1 }
 0x168   :  { %v1680_v19 = vpop.f32.mrb[34].mxu1 }
 0x169   :  { %v7169_v20 = vpop.f32.mrb[35].mxu1 }
 0x16c   :  { %v1685_v21 = vpop.f32.mrb[36].mxu1 }
 0x16d   :  { %v7172_v22 = vpop.f32.mrb[37].mxu1 }
 0x170   :  { %v9021_v23 = vpop.f32.mrb[38].mxu1 }
 0x171   :  { %v7175_v24 = vpop.f32.mrb[39].mxu1 }
 0x174   :  { %v9023_v26 = vpop.f32.mrb[40].mxu1 }
 0x175   :  { %v7178_v27 = vpop.f32.mrb[41].mxu1 }
 0x178   :  { %v9025_v28 = vpop.f32.mrb[42].mxu1 }
 0x179   :  { %v7181_v29 = vpop.f32.mrb[43].mxu1 }
 0x17c   :  { %v1798_v30 = vpop.f32.mrb[44].mxu1 }
 0x17d   :  { %v9027_v33 = vadd.f32 %v1798_v30, %v1660_v11  ;;  %v7186_v34 = vpop.f32.mrb[45].mxu1 }
 0x180   :  { %v1509_v35 = vpop.f32.mrb[18].mxu0  ;;  %v1803_v38 = vpop.f32.mrb[46].mxu1 }
 0x181   :  { %v2015_v39 = vmul.f32 %v1509_v35, %v1509_v35  ;;  %v7128_v40 = vpop.f32.mrb[19].mxu0  ;;  %7338 = vmatmul.mubr.msk.f32.vlgmr.msra.gmra.mrb[98].mxu1 %vm2105_vm10, %v1509_v35  ;;  %v9030_v43 = vadd.f32 %v1803_v38, %v1665_v13  ;;  %v7189_v44 = vpop.f32.mrb[47].mxu1 }
 0x182   :  { %7340 = vmatprep.mubr.msk.f32.mxu1 %vm8315_vm0, %v8312_v0 }
 0x183   :  { %v2024_v45 = vadd.f32 %v2015_v39, %v8969_v31 }
 0x184   :  { %v1514_v50 = vpop.f32.mrb[20].mxu0  ;;  %v1808_v51 = vpop.f32.mrb[48].mxu1 }
 0x185   :  { %v2033_v52 = vmax.f32 %v2024_v45, 1e-08  ;;  %v2016_v55 = vmul.f32 %v1514_v50, %v1514_v50  ;;  %v7131_v56 = vpop.f32.mrb[21].mxu0  ;;  %7341 = vmatmul.mubr.msk.f32.gmra.mrb[100].mxu1 %vm2105_vm10, %v1514_v50  ;;  %v9036_v57 = vadd.f32 %v1808_v51, %v1670_v15  ;;  %v7192_v60 = vpop.f32.mrb[49].mxu1 }
 0x186   :  { %7343 = vmatprep.mubr.msk.f32.mxu1 %vm8315_vm0, %v8312_v0 }
 0x187   :  { %8078 = vrsqrt.f32 %v2033_v52  ;;  %v2025_v61 = vadd.f32 %v2016_v55, %v8977_v36  ;;  %vm2044_vm11 = vcmp.eq.f32.partialorder %v2033_v52, inf  ;;  %v2047_v34 = vand.u32 2147483648, %v2033_v52 }
 0x188   :  { %v1519_v62 = vpop.f32.mrb[22].mxu0  ;;  %v1813_v2 = vpop.f32.mrb[50].mxu1  ;;  %vm2046_vm12 = vcmp.eq.f32.partialorder %v2033_v52, 0.0 }
 0x189   :  { %v9041_v3 = vmax.f32 %v2025_v61, 1e-08  ;;  %v2017_v31 = vmul.f32 %v1519_v62, %v1519_v62  ;;  %v7134_v4 = vpop.f32.mrb[23].mxu0  ;;  %7344 = vmatmul.mubr.msk.f32.gmra.mrb[102].mxu1 %vm2105_vm10, %v1519_v62  ;;  %v9044_v7 = vadd.f32 %v1813_v2, %v1675_v17  ;;  %v7195_v8 = vpop.f32.mrb[51].mxu1 }
 0x18a   :  { %7346 = vmatprep.mubr.msk.f32.mxu1 %vm8315_vm0, %v8312_v0 }
 0x18b   :  { %v2026_v9 = vadd.f32 %v2017_v31, %v8983_v41  ;;  %8080 = vrsqrt.f32 %v9041_v3  ;;  %vm2051_vm13 = vcmp.eq.f32.partialorder %v9041_v3, inf  ;;  %v2054_v56 = vand.u32 2147483648, %v9041_v3 }
 0x18c   :  { %v1524_v11 = vpop.f32.mrb[24].mxu0  ;;  %v1818_v36 = vpop.f32.mrb[52].mxu1  ;;  %vm2053_vm14 = vcmp.eq.f32.partialorder %v9041_v3, 0.0 }
 0x18d   :  { %v9050_v12 = vmax.f32 %v2026_v9, 1e-08  ;;  %v2018_v13 = vmul.f32 %v1524_v11, %v1524_v11  ;;  %v7137_v14 = vpop.f32.mrb[25].mxu0  ;;  %7347 = vmatmul.mubr.msk.f32.gmra.mrb[104].mxu1 %vm2105_vm10, %v1524_v11  ;;  %v9053_v15 = vadd.f32 %v1818_v36, %v1680_v19  ;;  %v7198_v16 = vpop.f32.mrb[53].mxu1 }
 0x18e   :  { %7349 = vmatprep.mubr.msk.f32.mxu1 %vm8315_vm0, %v8312_v0 }
 0x18f   :  { %v2027_v17 = vadd.f32 %v2018_v13, %v8989_v46  ;;  %8082 = vrsqrt.f32 %v9050_v12  ;;  %vm2058_vm15 = vcmp.eq.f32.partialorder %v9050_v12, inf  ;;  %v2061_v9 = vand.u32 2147483648, %v9050_v12 }
 0x190   :  { %v1529_v41 = vpop.f32.mrb[26].mxu0  ;;  %v1823_v18 = vpop.f32.mrb[54].mxu1  ;;  %vm2060_vm1 = vcmp.eq.f32.partialorder %v9050_v12, 0.0 }
 0x191   :  { %v8079_v20 = vpop.eup %8078  ;;  %v9059_v22 = vmax.f32 %v2027_v17, 1e-08  ;;  %v2019_v24 = vmul.f32 %v1529_v41, %v1529_v41  ;;  %v7140_v27 = vpop.f32.mrb[27].mxu0  ;;  %7350 = vmatmul.mubr.msk.f32.gmra.mrb[106].mxu1 %vm2105_vm10, %v1529_v41  ;;  %v9062_v29 = vadd.f32 %v1823_v18, %v1685_v21 }
 0x192   :  { %v7201_v19 = vpop.f32.mrb[55].mxu1  ;;  %7352 = vmatprep.mubr.msk.f32.mxu1 %vm8315_vm0, %v8312_v0  ;;  %v2043_v30 = vmul.f32 %v8079_v20, %v2033_v52 }
 0x193   :  { %v2028_v46 = vadd.f32 %v2019_v24, %v8995_v53  ;;  %8084 = vrsqrt.f32 %v9059_v22  ;;  %vm2065_vm2 = vcmp.eq.f32.partialorder %v9059_v22, inf  ;;  %v2068_v24 = vand.u32 2147483648, %v9059_v22 }
 0x194   :  { %v1534_v35 = vpop.f32.mrb[28].mxu0  ;;  %v2045_v38 = vsel %vm2044_vm11, %v2033_v52, %v2043_v30  ;;  %v1828_v39 = vpop.f32.mrb[56].mxu1  ;;  %vm2067_vm5 = vcmp.eq.f32.partialorder %v9059_v22, 0.0 }
 0x195   :  { %v8081_v40 = vpop.eup %8080  ;;  %v9068_v44 = vmax.f32 %v2028_v46, 1e-08  ;;  %v2020_v21 = vmul.f32 %v1534_v35, %v1534_v35  ;;  %v7143_v45 = vpop.f32.mrb[29].mxu0  ;;  %7353 = vmatmul.mubr.msk.f32.gmra.mrb[108].mxu1 %vm2105_vm10, %v1534_v35  ;;  %v2048_v50 = vsel %vm2046_vm12, %v2047_v34, %v2045_v38  ;;  %v9072_v51 = vadd.f32 %v1828_v39, %v9021_v23 }
 0x196   :  { %v7204_v53 = vpop.f32.mrb[57].mxu1  ;;  %7245 = vmatmul.mubr.msk.f32.vlgmr.msra.gmra.mrb[36].mxu0 %vm2105_vm10, %v2048_v50  ;;  %7355 = vmatprep.mubr.msk.f32.mxu1 %vm8315_vm0, %v8312_v0  ;;  %v2050_v52 = vmul.f32 %v8081_v40, %v9041_v3 }
 0x197   :  { %v2029_v55 = vadd.f32 %v2020_v21, %v9001_v58  ;;  %7247 = vmatprep.mubr.msk.f32.mxu0 %vm8315_vm0, %v8312_v0  ;;  %8086 = vrsqrt.f32 %v9068_v44  ;;  %7926 = vmatpush3.bf16.msk.msra.mxu0 %vm8884_vm9, %v8881_v47  ;;  %vm2072_vm6 = vcmp.eq.f32.partialorder %v9068_v44, inf  ;;  %v2075_v21 = vand.u32 2147483648, %v9068_v44 }
 0x198   :  { %v1539_v23 = vpop.f32.mrb[30].mxu0  ;;  %v2052_v60 = vsel %vm2051_vm13, %v9041_v3, %v2050_v52  ;;  %v1833_v61 = vpop.f32.mrb[58].mxu1  ;;  %7364 = vmatprep.subr.mxu0 %v8312_v0  ;;  %vm2074_vm8 = vcmp.eq.f32.partialorder %v9068_v44, 0.0 }
 0x199   :  { %v8083_v58 = vpop.eup %8082  ;;  %v9090_v62 = vmax.f32 %v2029_v55, 1e-08  ;;  %v2021_v2 = vmul.f32 %v1539_v23, %v1539_v23  ;;  %v7146_v31 = vpop.f32.mrb[31].mxu0  ;;  %7356 = vmatmul.mubr.msk.f32.gmra.mrb[110].mxu1 %vm2105_vm10, %v1539_v23  ;;  %v2055_v4 = vsel %vm2053_vm14, %v2054_v56, %v2052_v60  ;;  %v9094_v8 = vadd.f32 %v1833_v61, %v9023_v26 }
 0x19a   :  { %v7207_v47 = vpop.f32.mrb[59].mxu1  ;;  %7248 = vmatmul.mubr.msk.f32.gmra.mrb[38].mxu0 %vm2105_vm10, %v2055_v4  ;;  %7358 = vmatprep.mubr.msk.f32.mxu1 %vm8315_vm0, %v8312_v0  ;;  %v2057_v48 = vmul.f32 %v8083_v58, %v9050_v12 }
 0x19b   :  { %v2030_v3 = vadd.f32 %v2021_v2, %v9007_v63  ;;  %7250 = vmatprep.mubr.msk.f32.mxu0 %vm8315_vm0, %v8312_v0  ;;  %8088 = vrsqrt.f32 %v9090_v62  ;;  %vm2079_vm9 = vcmp.eq.f32.partialorder %v9090_v62, inf  ;;  %v2082_v23 = vand.u32 2147483648, %v9090_v62 }
 0x19c   :  { %v1544_v26 = vpop.f32.mrb[32].mxu0  ;;  %v2059_v11 = vsel %vm2058_vm15, %v9050_v12, %v2057_v48  ;;  %v1838_v36 = vpop.f32.mrb[60].mxu1  ;;  %vm2081_vm11 = vcmp.eq.f32.partialorder %v9090_v62, 0.0 }
 0x19d   :  { %v8085_v13 = vpop.eup %8084  ;;  %v9108_v14 = vmax.f32 %v2030_v3, 1e-08  ;;  %v2022_v16 = vmul.f32 %v1544_v26, %v1544_v26  ;;  %v7149_v63 = vpop.f32.mrb[33].mxu0  ;;  %7359 = vmatmul.mubr.msk.f32.gmra.mrb[112].mxu1 %vm2105_vm10, %v1544_v26  ;;  %v2062_v17 = vsel %vm2060_vm1, %v2061_v9, %v2059_v11  ;;  %v9112_v41 = vadd.f32 %v1838_v36, %v9025_v28 }
 0x19e   :  { %v7210_v18 = vpop.f32.mrb[61].mxu1  ;;  %7251 = vmatmul.mubr.msk.f32.gmra.mrb[40].mxu0 %vm2105_vm10, %v2062_v17  ;;  %7361 = vmatprep.mubr.msk.f32.mxu1 %vm8315_vm0, %v8312_v0  ;;  %v2064_v12 = vmul.f32 %v8085_v13, %v9059_v22 }
 0x19f   :  { %v2031_v20 = vadd.f32 %v2022_v16, %v9013_v5  ;;  %7253 = vmatprep.mubr.msk.f32.mxu0 %vm8315_vm0, %v8312_v0  ;;  %8090 = vrsqrt.f32 %v9108_v14  ;;  %vm2086_vm12 = vcmp.eq.f32.partialorder %v9108_v14, inf  ;;  %v2089_v4 = vand.u32 2147483648, %v9108_v14 }
 0x1a0   :  { %v1549_v28 = vpop.f32.mrb[34].mxu0  ;;  %v2066_v27 = vsel %vm2065_vm2, %v9059_v22, %v2064_v12  ;;  %v1935_v19 = vpop.f32.mrb[62].mxu1  ;;  %vm2088_vm13 = vcmp.eq.f32.partialorder %v9108_v14, 0.0 }
 0x1a1   :  { %v8087_v30 = vpop.eup %8086  ;;  %v2040_v46 = vmax.f32 %v2031_v20, 1e-08  ;;  %v2023_v34 = vmul.f32 %v1549_v28, %v1549_v28  ;;  %v7152_v35 = vpop.f32.mrb[35].mxu0  ;;  %7362 = vmatmul.mubr.msk.f32.gmra.mrb[114].mxu1 %vm2105_vm10, %v1549_v28  ;;  %v2069_v5 = vsel %vm2067_vm5, %v2068_v24, %v2066_v27  ;;  %v9128_v38 = vadd.f32 %v1935_v19, %v9027_v33 }
 0x1a2   :  { %v7215_v39 = vpop.f32.mrb[63].mxu1  ;;  %7254 = vmatmul.mubr.msk.f32.gmra.mrb[42].mxu0 %vm2105_vm10, %v2069_v5  ;;  %v2071_v40 = vmul.f32 %v8087_v30, %v9068_v44  ;;  %7395 = vmatprep.mubr.msk.f32.mxu1 %vm8315_vm0, %v8312_v0 }
 0x1a3   :  { %v2032_v22 = vadd.f32 %v2023_v34, %v9019_v10  ;;  %7256 = vmatprep.mubr.msk.f32.mxu0 %vm8315_vm0, %v8312_v0  ;;  %8092 = vrsqrt.f32 %v2040_v46  ;;  %vm2093_vm14 = vcmp.eq.f32.partialorder %v2040_v46, inf  ;;  %v2096_v11 = vand.u32 2147483648, %v2040_v46 }
 0x1a4   :  { %v2073_v33 = vsel %vm2072_vm6, %v9068_v44, %v2071_v40  ;;  %v1940_v45 = vpop.f32.mrb[64].mxu1  ;;  %vm2095_vm15 = vcmp.eq.f32.partialorder %v2040_v46, 0.0 }
 0x1a5   :  { %v8089_v50 = vpop.eup %8088  ;;  %v2041_v53 = vmax.f32 %v2032_v22, 1e-08  ;;  %v2076_v52 = vsel %vm2074_vm8, %v2075_v21, %v2073_v33  ;;  %v9142_v55 = vadd.f32 %v1940_v45, %v9030_v43  ;;  %v7218_v10 = vpop.f32.mrb[65].mxu1 }
 0x1a6   :  { %7257 = vmatmul.mubr.msk.f32.gmra.mrb[44].mxu0 %vm2105_vm10, %v2076_v52  ;;  %v2078_v56 = vmul.f32 %v8089_v50, %v9090_v62  ;;  %v9251_v52 = vld [vmem:[%s6129_s2] sm:$0xf] }
 0x1a7   :  { %7259 = vmatprep.mubr.msk.f32.mxu0 %vm8315_vm0, %v8312_v0  ;;  %8094 = vrsqrt.f32 %v2041_v53  ;;  %vm2100_vm1 = vcmp.eq.f32.partialorder %v2041_v53, inf  ;;  %v2103_v18 = vand.u32 2147483648, %v2041_v53  ;;  %vm2102_vm2 = vcmp.eq.f32.partialorder %v2041_v53, 0.0  ;;  %7394 = vmatpush3.msk.msra.mxu1 %vm459_vm3, %v9251_v52 }
 0x1a8   :  { %v2080_v44 = vsel %vm2079_vm9, %v9090_v62, %v2078_v56  ;;  %v1945_v60 = vpop.f32.mrb[66].mxu1  ;;  %7451 = vmatprep.subr.mxu1 %v8312_v0 }
 0x1a9   :  { %v8091_v43 = vpop.eup %8090  ;;  %v2083_v61 = vsel %vm2081_vm11, %v2082_v23, %v2080_v44  ;;  %v9153_v58 = vadd.f32 %v1945_v60, %v9036_v57  ;;  %v7221_v2 = vpop.f32.mrb[67].mxu1 }
 0x1aa   :  { %7260 = vmatmul.mubr.msk.f32.gmra.mrb[46].mxu0 %vm2105_vm10, %v2083_v61  ;;  %v2085_v31 = vmul.f32 %v8091_v43, %v9108_v14 }
 0x1ab   :  { %7262 = vmatprep.mubr.msk.f32.mxu0 %vm8315_vm0, %v8312_v0 }
 0x1ac   :  { %v2087_v62 = vsel %vm2086_vm12, %v9108_v14, %v2085_v31  ;;  %v1950_v47 = vpop.f32.mrb[68].mxu1 }
 0x1ad   :  { %v8093_v48 = vpop.eup %8092  ;;  %v2090_v57 = vsel %vm2088_vm13, %v2089_v4, %v2087_v62  ;;  %v9164_v3 = vadd.f32 %v1950_v47, %v9044_v7  ;;  %v7224_v9 = vpop.f32.mrb[69].mxu1  ;;  %v9271_v47 = vld [vmem:[%s6125_s6] ss:$0 sm:$0xff] }
 0x1ae   :  { %7263 = vmatmul.mubr.msk.f32.gmra.mrb[48].mxu0 %vm2105_vm10, %v2090_v57  ;;  %v2092_v26 = vmul.f32 %v8093_v48, %v2040_v46 }
 0x1af   :  { %7265 = vmatprep.mubr.msk.f32.mxu0 %vm8315_vm0, %v8312_v0 }
 0x1b0   :  { %v2094_v36 = vsel %vm2093_vm14, %v2040_v46, %v2092_v26  ;;  %v1955_v13 = vpop.f32.mrb[70].mxu1 }
 0x1b1   :  { %v8095_v16 = vpop.eup %8094  ;;  %v2097_v14 = vsel %vm2095_vm15, %v2096_v11, %v2094_v36  ;;  %v9170_v63 = vadd.f32 %v1955_v13, %v9053_v15  ;;  %v7227_v17 = vpop.f32.mrb[71].mxu1 }
 0x1b2   :  { %7266 = vmatmul.mubr.msk.f32.gmra.mrb[50].mxu0 %vm2105_vm10, %v2097_v14  ;;  %v2099_v7 = vmul.f32 %v8095_v16, %v2041_v53 }
 0x1b3   :  { %7268 = vmatprep.mubr.msk.f32.mxu0 %vm8315_vm0, %v8312_v0 }
 0x1b4   :  { %v2101_v12 = vsel %vm2100_vm1, %v2041_v53, %v2099_v7  ;;  %v1960_v20 = vpop.f32.mrb[72].mxu1 }
 0x1b5   :  { %v2104_v24 = vsel %vm2102_vm2, %v2103_v18, %v2101_v12  ;;  %v9176_v28 = vadd.f32 %v1960_v20, %v9062_v29  ;;  %v7230_v27 = vpop.f32.mrb[73].mxu1 }
 0x1b6   :  { %7269 = vmatmul.mubr.msk.f32.gmra.mrb[52].mxu0 %vm2105_vm10, %v2104_v24 }
 0x1b7   :  { %7306 = vmatprep.mubr.msk.f32.mxu0 %vm8315_vm0, %v8312_v0 }
 0x1b8   :  { %v1965_v15 = vpop.f32.mrb[74].mxu1 }
 0x1b9   :  { %v9182_v19 = vadd.f32 %v1965_v15, %v9072_v51  ;;  %v7233_v30 = vpop.f32.mrb[75].mxu1 }
 0x1ba   :  { %7307 = vmatmul.mubr.msk.f32.vlgmr.msra.gmra.mrb[54].mxu0 %vm2105_vm10, %v8962_v25 }
 0x1bb   :  { %7309 = vmatprep.mubr.msk.f32.mxu0 %vm8315_vm0, %v8312_v0 }
 0x1bc   :  { %v1970_v46 = vpop.f32.mrb[76].mxu1 }
 0x1bd   :  { %v9189_v29 = vadd.f32 %v1970_v46, %v9094_v8  ;;  %v7236_v34 = vpop.f32.mrb[77].mxu1 }
 0x1be   :  { %7310 = vmatmul.mubr.msk.f32.gmra.mrb[56].mxu0 %vm2105_vm10, %v8971_v32 }
 0x1bf   :  { %7312 = vmatprep.mubr.msk.f32.mxu0 %vm8315_vm0, %v8312_v0 }
 0x1c0   :  { %v1975_v51 = vpop.f32.mrb[78].mxu1 }
 0x1c1   :  { %v9196_v35 = vadd.f32 %v1975_v51, %v9112_v41  ;;  %v7239_v5 = vpop.f32.mrb[79].mxu1 }
 0x1c2   :  { %7313 = vmatmul.mubr.msk.f32.gmra.mrb[58].mxu0 %vm2105_vm10, %v8979_v37 }
 0x1c3   :  { %7315 = vmatprep.mubr.msk.f32.mxu0 %vm8315_vm0, %v8312_v0 }
 0x1c6   :  { %7316 = vmatmul.mubr.msk.f32.gmra.mrb[60].mxu0 %vm2105_vm10, %v8985_v42  ;;  %v165_v42 = vld [vmem:[%s6127_s28] sm:$0xff] }
 0x1c7   :  { %7318 = vmatprep.mubr.msk.f32.mxu0 %vm8315_vm0, %v8312_v0  ;;  %7365 = vmatpush3.msra.mxu0 %v165_v42 }
 0x1c8   :  { %7422 = vmatprep.subr.mxu0 %v8312_v0 }
 0x1ca   :  { %7319 = vmatmul.mubr.msk.f32.gmra.mrb[62].mxu0 %vm2105_vm10, %v8991_v49 }
 0x1cb   :  { %7321 = vmatprep.mubr.msk.f32.mxu0 %vm8315_vm0, %v8312_v0 }
 0x1ce   :  { %7322 = vmatmul.mubr.msk.f32.gmra.mrb[64].mxu0 %vm2105_vm10, %v8997_v54 }
 0x1cf   :  { %7324 = vmatprep.mubr.msk.f32.mxu0 %vm8315_vm0, %v8312_v0 }
 0x1d2   :  { %7325 = vmatmul.mubr.msk.f32.gmra.mrb[66].mxu0 %vm2105_vm10, %v9003_v59 }
 0x1d3   :  { %7327 = vmatprep.mubr.msk.f32.mxu0 %vm8315_vm0, %v8312_v0 }
 0x1d6   :  { %7328 = vmatmul.mubr.msk.f32.gmra.mrb[68].mxu0 %vm2105_vm10, %v9009_v1 }
 0x1d7   :  { %7330 = vmatprep.mubr.msk.f32.mxu0 %vm8315_vm0, %v8312_v0 }
 0x1da   :  { %7331 = vmatmul.mubr.msk.f32.gmra.mrb[70].mxu0 %vm2105_vm10, %v9015_v6 }
 0x1db   :  { %7366 = vmatprep.mubr.msk.f32.mxu0 %vm8315_vm0, %v8312_v0 }
 0x1e8   :  { %v9229_v25 = vpop.f32.mrb[80].mxu1 }
 0x1e9   :  { %v7277_v32 = vpop.f32.mrb[81].mxu1 }
 0x1ec   :  { %v9231_v37 = vpop.f32.mrb[82].mxu1 }
 0x1ed   :  { %v7280_v49 = vpop.f32.mrb[83].mxu1 }
 0x1f0   :  { %v9234_v54 = vpop.f32.mrb[84].mxu1 }
 0x1f1   :  { %v7283_v59 = vpop.f32.mrb[85].mxu1 }
 0x1f4   :  { %v9236_v1 = vpop.f32.mrb[86].mxu1 }
 0x1f5   :  { %v7286_v6 = vpop.f32.mrb[87].mxu1 }
 0x1f8   :  { %v9238_v8 = vpop.f32.mrb[88].mxu1 }
 0x1f9   :  { %v7289_v41 = vpop.f32.mrb[89].mxu1 }
 0x1fe   :  { %v9240_v39 = vpop.f32.mrb[90].mxu1 }
 0x1ff   :  { %v7292_v40 = vpop.f32.mrb[91].mxu1 }
 0x202   :  { %v9242_v22 = vpop.f32.mrb[92].mxu1 }
 0x203   :  { %v7295_v21 = vpop.f32.mrb[93].mxu1 }
 0x206   :  { %v9244_v33 = vpop.f32.mrb[94].mxu1 }
 0x207   :  { %v7298_v45 = vpop.f32.mrb[95].mxu1 }
 0x20a   :  { %v9246_v50 = vpop.f32.mrb[96].mxu1 }
 0x20b   :  { %v7301_v53 = vpop.f32.mrb[97].mxu1 }
 0x254   :  { %v9256_v10 = vpop.f32.mrb[98].mxu1 }
 0x255   :  { %v7339_v56 = vpop.f32.mrb[99].mxu1 }
 0x258   :  { %v9258_v23 = vpop.f32.mrb[100].mxu1 }
 0x259   :  { %v7342_v44 = vpop.f32.mrb[101].mxu1 }
 0x25c   :  { %v9260_v60 = vpop.f32.mrb[102].mxu1 }
 0x25d   :  { %v7345_v43 = vpop.f32.mrb[103].mxu1 }
 0x260   :  { %v9262_v61 = vpop.f32.mrb[104].mxu1 }
 0x261   :  { %v7348_v2 = vpop.f32.mrb[105].mxu1 }
 0x264   :  { %v9267_v31 = vpop.f32.mrb[106].mxu1 }
 0x265   :  { %v7351_v4 = vpop.f32.mrb[107].mxu1 }
 0x268   :  { %v9269_v62 = vpop.f32.mrb[108].mxu1 }
 0x269   :  { %v2202_v48 = vpop.f32.mrb[36].mxu0  ;;  %v7354_v57 = vpop.f32.mrb[109].mxu1 }
 0x26a   :  { %v2246_v9 = vadd.f32 %v2202_v48, %v9128_v38  ;;  %v7246_v26 = vpop.f32.mrb[37].mxu0 }
 0x26c   :  { %v9275_v11 = vadd.f32 %v9271_v47, %v2246_v9  ;;  %v9277_v36 = vpop.f32.mrb[110].mxu1 }
 0x26d   :  { %v2207_v13 = vpop.f32.mrb[38].mxu0  ;;  %v7357_v16 = vpop.f32.mrb[111].mxu1 }
 0x26e   :  { %v6303_v14 = vmul.f32 -1.442695, %v9275_v11  ;;  %v2247_v17 = vadd.f32 %v2207_v13, %v9142_v55  ;;  %v7249_v7 = vpop.f32.mrb[39].mxu0 }
 0x270   :  { %8096 = vpow2.f32 %v6303_v14  ;;  %v9282_v18 = vadd.f32 %v9271_v47, %v2247_v17  ;;  %v9284_v12 = vpop.f32.mrb[112].mxu1 }
 0x271   :  { %v2212_v38 = vpop.f32.mrb[40].mxu0  ;;  %v7360_v20 = vpop.f32.mrb[113].mxu1 }
 0x272   :  { %v6304_v24 = vmul.f32 -1.442695, %v9282_v18  ;;  %v2248_v27 = vadd.f32 %v2212_v38, %v9153_v58  ;;  %v7252_v15 = vpop.f32.mrb[41].mxu0 }
 0x274   :  { %8098 = vpow2.f32 %v6304_v24  ;;  %v9289_v30 = vadd.f32 %v9271_v47, %v2248_v27  ;;  %v9291_v46 = vpop.f32.mrb[114].mxu1 }
 0x275   :  { %v2217_v55 = vpop.f32.mrb[42].mxu0  ;;  %v7363_v34 = vpop.f32.mrb[115].mxu1 }
 0x276   :  { %v6305_v51 = vmul.f32 -1.442695, %v9289_v30  ;;  %v2249_v5 = vadd.f32 %v2217_v55, %v9164_v3  ;;  %v7255_v32 = vpop.f32.mrb[43].mxu0 }
 0x278   :  { %8100 = vpow2.f32 %v6305_v51  ;;  %v9296_v42 = vadd.f32 %v9271_v47, %v2249_v5 }
 0x279   :  { %v2222_v49 = vpop.f32.mrb[44].mxu0 }
 0x27a   :  { %v8097_v58 = vpop.eup %8096  ;;  %v6306_v59 = vmul.f32 -1.442695, %v9296_v42  ;;  %v2250_v6 = vadd.f32 %v2222_v49, %v9170_v63  ;;  %v7258_v41 = vpop.f32.mrb[45].mxu0 }
 0x27b   :  { %v2711_v40 = vadd.f32 1.0, %v8097_v58 }
 0x27c   :  { %8102 = vpow2.f32 %v6306_v59  ;;  %v9301_v21 = vadd.f32 %v9271_v47, %v2250_v6 }
 0x27d   :  { %8104 = vrcp.f32 %v2711_v40  ;;  %v2227_v45 = vpop.f32.mrb[46].mxu0 }
 0x27e   :  { %v8099_v3 = vpop.eup %8098  ;;  %v6307_v53 = vmul.f32 -1.442695, %v9301_v21  ;;  %v2251_v56 = vadd.f32 %v2227_v45, %v9176_v28  ;;  %v7261_v44 = vpop.f32.mrb[47].mxu0 }
 0x27f   :  { %v2712_v43 = vadd.f32 1.0, %v8099_v3 }
 0x280   :  { %8106 = vpow2.f32 %v6307_v53  ;;  %v9306_v2 = vadd.f32 %v9271_v47, %v2251_v56 }
 0x281   :  { %8108 = vrcp.f32 %v2712_v43  ;;  %v2232_v63 = vpop.f32.mrb[48].mxu0 }
 0x282   :  { %v8101_v4 = vpop.eup %8100  ;;  %v6308_v48 = vmul.f32 -1.442695, %v9306_v2  ;;  %v2252_v57 = vadd.f32 %v2232_v63, %v9182_v19  ;;  %v7264_v9 = vpop.f32.mrb[49].mxu0 }
 0x283   :  { %v2713_v26 = vadd.f32 1.0, %v8101_v4 }
 0x284   :  { %8110 = vpow2.f32 %v6308_v48  ;;  %v9311_v13 = vadd.f32 %v9271_v47, %v2252_v57 }
 0x285   :  { %8112 = vrcp.f32 %v2713_v26  ;;  %v2237_v28 = vpop.f32.mrb[50].mxu0 }
 0x286   :  { %v8103_v16 = vpop.eup %8102  ;;  %v6309_v14 = vmul.f32 -1.442695, %v9311_v13  ;;  %v2253_v17 = vadd.f32 %v2237_v28, %v9189_v29  ;;  %v7267_v7 = vpop.f32.mrb[51].mxu0 }
 0x287   :  { %v8105_v38 = vpop.eup %8104  ;;  %v2714_v20 = vadd.f32 1.0, %v8103_v16 }
 0x288   :  { %8114 = vpow2.f32 %v6309_v14  ;;  %v9316_v24 = vadd.f32 %v9271_v47, %v2253_v17  ;;  %7367 = vmatmul.mubr.msk.f32.vlgmr.msra.gmra.mrb[72].mxu0 %vm1704_vm7, %v8105_v38 }
 0x289   :  { %8116 = vrcp.f32 %v2714_v20  ;;  %v2242_v19 = vpop.f32.mrb[52].mxu0  ;;  %7369 = vmatprep.mubr.msk.f32.mxu0 %vm8315_vm0, %v8312_v0  ;;  %7423 = vmatpush3.msk.msra.mxu0 %vm459_vm3, %v9251_v52 }
 0x28a   :  { %v8107_v27 = vpop.eup %8106  ;;  %v6310_v29 = vmul.f32 -1.442695, %v9316_v24  ;;  %v2254_v15 = vadd.f32 %v2242_v19, %v9196_v35  ;;  %v7270_v55 = vpop.f32.mrb[53].mxu0  ;;  %7480 = vmatprep.subr.mxu0 %v8312_v0 }
 0x28b   :  { %v8109_v34 = vpop.eup %8108  ;;  %v2715_v51 = vadd.f32 1.0, %v8107_v27 }
 0x28c   :  { %8118 = vpow2.f32 %v6310_v29  ;;  %v9327_v5 = vadd.f32 %v9271_v47, %v2254_v15  ;;  %7370 = vmatmul.mubr.msk.f32.gmra.mrb[74].mxu0 %vm1704_vm7, %v8109_v34 }
 0x28d   :  { %8120 = vrcp.f32 %v2715_v51  ;;  %v9330_v32 = vpop.f32.mrb[54].mxu0  ;;  %7372 = vmatprep.mubr.msk.f32.mxu0 %vm8315_vm0, %v8312_v0  ;;  %v9375_v51 = vld [vmem:[%s6128_s12] ss:$0 sm:$0xff] }
 0x28e   :  { %v8111_v49 = vpop.eup %8110  ;;  %v6311_v35 = vmul.f32 -1.442695, %v9327_v5  ;;  %v7308_v58 = vpop.f32.mrb[55].mxu0 }
 0x28f   :  { %v8113_v59 = vpop.eup %8112  ;;  %v2716_v6 = vadd.f32 1.0, %v8111_v49 }
 0x290   :  { %8122 = vpow2.f32 %v6311_v35  ;;  %7373 = vmatmul.mubr.msk.f32.gmra.mrb[76].mxu0 %vm1704_vm7, %v8113_v59 }
 0x291   :  { %8124 = vrcp.f32 %v2716_v6  ;;  %v9336_v47 = vpop.f32.mrb[56].mxu0  ;;  %7375 = vmatprep.mubr.msk.f32.mxu0 %vm8315_vm0, %v8312_v0 }
 0x292   :  { %v8115_v41 = vpop.eup %8114  ;;  %v7311_v40 = vpop.f32.mrb[57].mxu0 }
 0x293   :  { %v8117_v45 = vpop.eup %8116  ;;  %v2717_v3 = vadd.f32 1.0, %v8115_v41 }
 0x294   :  { %7376 = vmatmul.mubr.msk.f32.gmra.mrb[78].mxu0 %vm1704_vm7, %v8117_v45 }
 0x295   :  { %8126 = vrcp.f32 %v2717_v3  ;;  %v9341_v53 = vpop.f32.mrb[58].mxu0  ;;  %7378 = vmatprep.mubr.msk.f32.mxu0 %vm8315_vm0, %v8312_v0 }
 0x296   :  { %v8119_v56 = vpop.eup %8118  ;;  %v7314_v44 = vpop.f32.mrb[59].mxu0 }
 0x297   :  { %v8121_v43 = vpop.eup %8120  ;;  %v2718_v63 = vadd.f32 1.0, %v8119_v56 }
 0x298   :  { %7379 = vmatmul.mubr.msk.f32.gmra.mrb[80].mxu0 %vm1704_vm7, %v8121_v43 }
 0x299   :  { %8128 = vrcp.f32 %v2718_v63  ;;  %v9346_v4 = vpop.f32.mrb[60].mxu0  ;;  %7381 = vmatprep.mubr.msk.f32.mxu0 %vm8315_vm0, %v8312_v0 }
 0x29a   :  { %v8123_v48 = vpop.eup %8122  ;;  %v7317_v57 = vpop.f32.mrb[61].mxu0 }
 0x29b   :  { %v8125_v9 = vpop.eup %8124  ;;  %v2719_v26 = vadd.f32 1.0, %v8123_v48 }
 0x29c   :  { %7382 = vmatmul.mubr.msk.f32.gmra.mrb[82].mxu0 %vm1704_vm7, %v8125_v9 }
 0x29d   :  { %8130 = vrcp.f32 %v2719_v26  ;;  %v9351_v28 = vpop.f32.mrb[62].mxu0  ;;  %7384 = vmatprep.mubr.msk.f32.mxu0 %vm8315_vm0, %v8312_v0 }
 0x29e   :  { %v7320_v16 = vpop.f32.mrb[63].mxu0 }
 0x29f   :  { %v8127_v14 = vpop.eup %8126 }
 0x2a0   :  { %7385 = vmatmul.mubr.msk.f32.gmra.mrb[84].mxu0 %vm1704_vm7, %v8127_v14 }
 0x2a1   :  { %v9356_v17 = vpop.f32.mrb[64].mxu0  ;;  %7387 = vmatprep.mubr.msk.f32.mxu0 %vm8315_vm0, %v8312_v0 }
 0x2a2   :  { %v7323_v7 = vpop.f32.mrb[65].mxu0 }
 0x2a3   :  { %v8129_v38 = vpop.eup %8128 }
 0x2a4   :  { %7388 = vmatmul.mubr.msk.f32.gmra.mrb[86].mxu0 %vm1704_vm7, %v8129_v38 }
 0x2a5   :  { %v9361_v20 = vpop.f32.mrb[66].mxu0  ;;  %7390 = vmatprep.mubr.msk.f32.mxu0 %vm8315_vm0, %v8312_v0 }
 0x2a6   :  { %v7326_v19 = vpop.f32.mrb[67].mxu0 }
 0x2a7   :  { %v8131_v27 = vpop.eup %8130 }
 0x2a8   :  { %7391 = vmatmul.mubr.msk.f32.gmra.mrb[88].mxu0 %vm1704_vm7, %v8131_v27 }
 0x2a9   :  { %v9366_v29 = vpop.f32.mrb[68].mxu0  ;;  %7424 = vmatprep.mubr.msk.f32.mxu0 %vm8315_vm0, %v8312_v0 }
 0x2aa   :  { %v7329_v15 = vpop.f32.mrb[69].mxu0 }
 0x2ad   :  { %v9370_v55 = vpop.f32.mrb[70].mxu0 }
 0x2ae   :  { %v7332_v34 = vpop.f32.mrb[71].mxu0 }
 0x35b   :  { %v2837_v49 = vpop.f32.mrb[72].mxu0 }
 0x35c   :  { %v2838_v35 = vadd.f32 %v9375_v51, %v2837_v49  ;;  %v7368_v58 = vpop.f32.mrb[73].mxu0 }
 0x35e   :  { %v6322_v59 = vmul.f32 -1.442695, %v2838_v35 }
 0x35f   :  { %v2842_v6 = vpop.f32.mrb[74].mxu0 }
 0x360   :  { %8132 = vpow2.f32 %v6322_v59  ;;  %v2843_v41 = vadd.f32 %v9375_v51, %v2842_v6  ;;  %v7371_v40 = vpop.f32.mrb[75].mxu0 }
 0x362   :  { %v6323_v45 = vmul.f32 -1.442695, %v2843_v41 }
 0x363   :  { %v2847_v3 = vpop.f32.mrb[76].mxu0 }
 0x364   :  { %8134 = vpow2.f32 %v6323_v45  ;;  %v2848_v56 = vadd.f32 %v9375_v51, %v2847_v3  ;;  %v7374_v44 = vpop.f32.mrb[77].mxu0 }
 0x366   :  { %v6324_v43 = vmul.f32 -1.442695, %v2848_v56 }
 0x367   :  { %v2852_v63 = vpop.f32.mrb[78].mxu0 }
 0x368   :  { %8136 = vpow2.f32 %v6324_v43  ;;  %v2853_v48 = vadd.f32 %v9375_v51, %v2852_v63  ;;  %v7377_v57 = vpop.f32.mrb[79].mxu0 }
 0x36a   :  { %v8133_v9 = vpop.eup %8132  ;;  %v6325_v26 = vmul.f32 -1.442695, %v2853_v48 }
 0x36b   :  { %v2908_v16 = vadd.f32 1.0, %v8133_v9  ;;  %v2857_v14 = vpop.f32.mrb[80].mxu0 }
 0x36c   :  { %8138 = vpow2.f32 %v6325_v26  ;;  %v2858_v7 = vadd.f32 %v9375_v51, %v2857_v14  ;;  %v7380_v38 = vpop.f32.mrb[81].mxu0 }
 0x36d   :  { %8140 = vrcp.f32 %v2908_v16 }
 0x36e   :  { %v8135_v19 = vpop.eup %8134  ;;  %v6326_v27 = vmul.f32 -1.442695, %v2858_v7 }
 0x36f   :  { %v2909_v15 = vadd.f32 1.0, %v8135_v19  ;;  %v2862_v34 = vpop.f32.mrb[82].mxu0 }
 0x370   :  { %8142 = vpow2.f32 %v6326_v27  ;;  %v2863_v49 = vadd.f32 %v9375_v51, %v2862_v34  ;;  %v7383_v35 = vpop.f32.mrb[83].mxu0 }
 0x371   :  { %8144 = vrcp.f32 %v2909_v15 }
 0x372   :  { %v8137_v58 = vpop.eup %8136  ;;  %v6327_v59 = vmul.f32 -1.442695, %v2863_v49 }
 0x373   :  { %v2910_v6 = vadd.f32 1.0, %v8137_v58  ;;  %v2867_v41 = vpop.f32.mrb[84].mxu0 }
 0x374   :  { %8146 = vpow2.f32 %v6327_v59  ;;  %v2868_v40 = vadd.f32 %v9375_v51, %v2867_v41  ;;  %v7386_v45 = vpop.f32.mrb[85].mxu0 }
 0x375   :  { %8148 = vrcp.f32 %v2910_v6 }
 0x376   :  { %v8139_v3 = vpop.eup %8138  ;;  %v6328_v56 = vmul.f32 -1.442695, %v2868_v40 }
 0x377   :  { %v8141_v44 = vpop.eup %8140  ;;  %v2911_v43 = vadd.f32 1.0, %v8139_v3  ;;  %v2872_v63 = vpop.f32.mrb[86].mxu0 }
 0x378   :  { %8150 = vpow2.f32 %v6328_v56  ;;  %v2873_v48 = vadd.f32 %v9375_v51, %v2872_v63  ;;  %v7389_v57 = vpop.f32.mrb[87].mxu0  ;;  %v2935_v9 = vmul.f32 %v8141_v44, %v9229_v25  ;;  %v2944_v26 = vmul.f32 %v8141_v44, %v9330_v32 }
 0x379   :  { %8152 = vrcp.f32 %v2911_v43  ;;  %v9388_v16 = vmul.f32 %v8141_v44, %v9256_v10 }
 0x37a   :  { %v8143_v14 = vpop.eup %8142  ;;  %v6329_v7 = vmul.f32 -1.442695, %v2873_v48  ;;  %7396 = vmatmul.mubr.msk.f32.vlgmr.msra.gmra.mrb[116].mxu1 %vm431_vm4, %v2935_v9  ;;  %7425 = vmatmul.mubr.msk.f32.vlgmr.msra.gmra.mrb[90].mxu0 %vm431_vm4, %v2944_v26  ;;  %v2966_v9 = vmax.f32 %v9301_v21, 0.0  ;;  %v2969_v21 = vmax.f32 %v9316_v24, 0.0 }
 0x37b   :  { %v8145_v38 = vpop.eup %8144  ;;  %v2912_v19 = vadd.f32 1.0, %v8143_v14  ;;  %v2877_v27 = vpop.f32.mrb[88].mxu0  ;;  %7452 = vmatpush3.msk.msra.mxu1 %vm459_vm3, %v9251_v52  ;;  %7398 = vmatprep.mubr.msk.f32.mxu1 %vm8315_vm0, %v8312_v0 }
 0x37c   :  { %8154 = vpow2.f32 %v6329_v7  ;;  %v2878_v25 = vadd.f32 %v9375_v51, %v2877_v27  ;;  %v7392_v10 = vpop.f32.mrb[89].mxu0  ;;  %7427 = vmatprep.mubr.msk.f32.mxu0 %vm8315_vm0, %v8312_v0  ;;  %v2936_v32 = vmul.f32 %v8145_v38, %v9231_v37  ;;  %v2945_v15 = vmul.f32 %v8145_v38, %v9336_v47  ;;  %7509 = vmatprep.subr.mxu1 %v8312_v0 }
 0x37d   :  { %8156 = vrcp.f32 %v2912_v19  ;;  %v9403_v34 = vmul.f32 %v8145_v38, %v9258_v23 }
 0x37e   :  { %v8147_v52 = vpop.eup %8146  ;;  %v6330_v49 = vmul.f32 -1.442695, %v2878_v25  ;;  %7399 = vmatmul.mubr.msk.f32.gmra.mrb[118].mxu1 %vm431_vm4, %v2936_v32  ;;  %7428 = vmatmul.mubr.msk.f32.gmra.mrb[92].mxu0 %vm431_vm4, %v2945_v15 }
 0x37f   :  { %v8149_v51 = vpop.eup %8148  ;;  %v2913_v35 = vadd.f32 1.0, %v8147_v52  ;;  %7401 = vmatprep.mubr.msk.f32.mxu1 %vm8315_vm0, %v8312_v0  ;;  %7430 = vmatprep.mubr.msk.f32.mxu0 %vm8315_vm0, %v8312_v0 }
 0x380   :  { %8158 = vpow2.f32 %v6330_v49  ;;  %v2937_v37 = vmul.f32 %v8149_v51, %v9234_v54  ;;  %v2946_v23 = vmul.f32 %v8149_v51, %v9341_v53  ;;  %v9414_v47 = vmul.f32 %v8149_v51, %v9260_v60 }
 0x381   :  { %8160 = vrcp.f32 %v2913_v35 }
 0x382   :  { %v8151_v58 = vpop.eup %8150  ;;  %7402 = vmatmul.mubr.msk.f32.gmra.mrb[120].mxu1 %vm431_vm4, %v2937_v37  ;;  %7431 = vmatmul.mubr.msk.f32.gmra.mrb[94].mxu0 %vm431_vm4, %v2946_v23 }
 0x383   :  { %v8153_v59 = vpop.eup %8152  ;;  %v2914_v6 = vadd.f32 1.0, %v8151_v58  ;;  %7404 = vmatprep.mubr.msk.f32.mxu1 %vm8315_vm0, %v8312_v0  ;;  %7433 = vmatprep.mubr.msk.f32.mxu0 %vm8315_vm0, %v8312_v0 }
 0x384   :  { %v2938_v54 = vmul.f32 %v8153_v59, %v9236_v1  ;;  %v2947_v53 = vmul.f32 %v8153_v59, %v9346_v4  ;;  %v9425_v60 = vmul.f32 %v8153_v59, %v9262_v61 }
 0x385   :  { %8162 = vrcp.f32 %v2914_v6 }
 0x386   :  { %v8155_v41 = vpop.eup %8154  ;;  %7405 = vmatmul.mubr.msk.f32.gmra.mrb[122].mxu1 %vm431_vm4, %v2938_v54  ;;  %7434 = vmatmul.mubr.msk.f32.gmra.mrb[96].mxu0 %vm431_vm4, %v2947_v53 }
 0x387   :  { %v8157_v40 = vpop.eup %8156  ;;  %v2915_v45 = vadd.f32 1.0, %v8155_v41  ;;  %7407 = vmatprep.mubr.msk.f32.mxu1 %vm8315_vm0, %v8312_v0  ;;  %7436 = vmatprep.mubr.msk.f32.mxu0 %vm8315_vm0, %v8312_v0 }
 0x388   :  { %v2939_v1 = vmul.f32 %v8157_v40, %v9238_v8  ;;  %v2948_v4 = vmul.f32 %v8157_v40, %v9351_v28  ;;  %v2957_v61 = vmul.f32 %v8157_v40, %v9267_v31 }
 0x389   :  { %8164 = vrcp.f32 %v2915_v45 }
 0x38a   :  { %v8159_v3 = vpop.eup %8158  ;;  %7408 = vmatmul.mubr.msk.f32.gmra.mrb[124].mxu1 %vm431_vm4, %v2939_v1  ;;  %7437 = vmatmul.mubr.msk.f32.gmra.mrb[98].mxu0 %vm431_vm4, %v2948_v4 }
 0x38b   :  { %v8161_v56 = vpop.eup %8160  ;;  %v2916_v44 = vadd.f32 1.0, %v8159_v3  ;;  %7410 = vmatprep.mubr.msk.f32.mxu1 %vm8315_vm0, %v8312_v0  ;;  %7439 = vmatprep.mubr.msk.f32.mxu0 %vm8315_vm0, %v8312_v0 }
 0x38c   :  { %v2940_v8 = vmul.f32 %v8161_v56, %v9240_v39  ;;  %v2949_v28 = vmul.f32 %v8161_v56, %v9356_v17  ;;  %v2958_v31 = vmul.f32 %v8161_v56, %v9269_v62 }
 0x38d   :  { %8166 = vrcp.f32 %v2916_v44 }
 0x38e   :  { %7411 = vmatmul.mubr.msk.f32.gmra.mrb[126].mxu1 %vm431_vm4, %v2940_v8  ;;  %7440 = vmatmul.mubr.msk.f32.gmra.mrb[100].mxu0 %vm431_vm4, %v2949_v28 }
 0x38f   :  { %v8163_v43 = vpop.eup %8162  ;;  %7413 = vmatprep.mubr.msk.f32.mxu1 %vm8315_vm0, %v8312_v0  ;;  %7442 = vmatprep.mubr.msk.f32.mxu0 %vm8315_vm0, %v8312_v0 }
 0x390   :  { %v2941_v63 = vmul.f32 %v8163_v43, %v9242_v22  ;;  %v2950_v39 = vmul.f32 %v8163_v43, %v9361_v20  ;;  %v2959_v17 = vmul.f32 %v8163_v43, %v9277_v36 }
 0x392   :  { %7414 = vmatmul.mubr.msk.f32.gmra.mrb[128].mxu1 %vm431_vm4, %v2941_v63  ;;  %7443 = vmatmul.mubr.msk.f32.gmra.mrb[102].mxu0 %vm431_vm4, %v2950_v39 }
 0x393   :  { %v8165_v62 = vpop.eup %8164  ;;  %7416 = vmatprep.mubr.msk.f32.mxu1 %vm8315_vm0, %v8312_v0  ;;  %7445 = vmatprep.mubr.msk.f32.mxu0 %vm8315_vm0, %v8312_v0 }
 0x394   :  { %v2942_v48 = vmul.f32 %v8165_v62, %v9244_v33  ;;  %v2951_v57 = vmul.f32 %v8165_v62, %v9366_v29  ;;  %v2960_v22 = vmul.f32 %v8165_v62, %v9284_v12  ;;  %v168_v29 = vld [vmem:[%s6130_s16] sm:$0xff] }
 0x396   :  { %7417 = vmatmul.mubr.msk.f32.gmra.mrb[130].mxu1 %vm431_vm4, %v2942_v48  ;;  %7446 = vmatmul.mubr.msk.f32.gmra.mrb[104].mxu0 %vm431_vm4, %v2951_v57 }
 0x397   :  { %v8167_v36 = vpop.eup %8166  ;;  %7419 = vmatprep.mubr.msk.f32.mxu1 %vm8315_vm0, %v8312_v0  ;;  %7448 = vmatprep.mubr.msk.f32.mxu0 %vm8315_vm0, %v8312_v0 }
 0x398   :  { %v2943_v33 = vmul.f32 %v8167_v36, %v9246_v50  ;;  %v2952_v12 = vmul.f32 %v8167_v36, %v9370_v55  ;;  %v2961_v20 = vmul.f32 %v8167_v36, %v9291_v46  ;;  %v2962_v50 = vmax.f32 %v9275_v11, 0.0 }
 0x399   :  { %v2963_v46 = vmax.f32 %v9282_v18, 0.0  ;;  %v2964_v55 = vmax.f32 %v9289_v30, 0.0  ;;  %v2965_v11 = vmax.f32 %v9296_v42, 0.0  ;;  %v9529_v18 = vld [vmem:[%s6133_s21] sm:$0xf]  ;;  %v2967_v30 = vmax.f32 %v9306_v2, 0.0 }
 0x39a   :  { %7420 = vmatmul.mubr.msk.f32.gmra.mrb[132].mxu1 %vm431_vm4, %v2943_v33  ;;  %7449 = vmatmul.mubr.msk.f32.gmra.mrb[106].mxu0 %vm431_vm4, %v2952_v12  ;;  %v2968_v42 = vmax.f32 %v9311_v13, 0.0  ;;  %v2970_v2 = vmax.f32 %v9327_v5, 0.0  ;;  %v169_v13 = vld [vmem:[%s6131_s25] sm:$0xf] }
 0x39b   :  { %7453 = vmatprep.mubr.msk.f32.mxu1 %vm8315_vm0, %v8312_v0  ;;  %7482 = vmatprep.mubr.msk.f32.mxu0 %vm8315_vm0, %v8312_v0 }
 0x39c   :  { %7481 = vmatpush3.msk.msra.mxu0 %vm459_vm3, %v169_v13 }
 0x39d   :  { %7538 = vmatprep.subr.mxu0 %v8312_v0 }
 0x39e   :  { %7454 = vmatmul.mubr.msk.f32.vlgmr.msra.gmra.mrb[134].mxu1 %vm431_vm4, %v9388_v16 }
 0x39f   :  { %7456 = vmatprep.mubr.msk.f32.mxu1 %vm8315_vm0, %v8312_v0  ;;  %7510 = vmatpush3.msra.mxu1 %v168_v29 }
 0x3a0   :  { %7567 = vmatprep.subr.mxu1 %v8312_v0 }
 0x3a2   :  { %7457 = vmatmul.mubr.msk.f32.gmra.mrb[136].mxu1 %vm431_vm4, %v9403_v34 }
 0x3a3   :  { %7459 = vmatprep.mubr.msk.f32.mxu1 %vm8315_vm0, %v8312_v0 }
 0x3a6   :  { %7460 = vmatmul.mubr.msk.f32.gmra.mrb[138].mxu1 %vm431_vm4, %v9414_v47 }
 0x3a7   :  { %7462 = vmatprep.mubr.msk.f32.mxu1 %vm8315_vm0, %v8312_v0 }
 0x3aa   :  { %7463 = vmatmul.mubr.msk.f32.gmra.mrb[140].mxu1 %vm431_vm4, %v9425_v60 }
 0x3ab   :  { %7465 = vmatprep.mubr.msk.f32.mxu1 %vm8315_vm0, %v8312_v0 }
 0x3ae   :  { %7466 = vmatmul.mubr.msk.f32.gmra.mrb[142].mxu1 %vm431_vm4, %v2957_v61 }
 0x3af   :  { %7468 = vmatprep.mubr.msk.f32.mxu1 %vm8315_vm0, %v8312_v0 }
 0x3b2   :  { %7469 = vmatmul.mubr.msk.f32.gmra.mrb[144].mxu1 %vm431_vm4, %v2958_v31 }
 0x3b3   :  { %7471 = vmatprep.mubr.msk.f32.mxu1 %vm8315_vm0, %v8312_v0 }
 0x3b6   :  { %7472 = vmatmul.mubr.msk.f32.gmra.mrb[146].mxu1 %vm431_vm4, %v2959_v17 }
 0x3b7   :  { %7474 = vmatprep.mubr.msk.f32.mxu1 %vm8315_vm0, %v8312_v0 }
 0x3ba   :  { %7475 = vmatmul.mubr.msk.f32.gmra.mrb[148].mxu1 %vm431_vm4, %v2960_v22 }
 0x3bb   :  { %7477 = vmatprep.mubr.msk.f32.mxu1 %vm8315_vm0, %v8312_v0 }
 0x3be   :  { %7478 = vmatmul.mubr.msk.f32.gmra.mrb[150].mxu1 %vm431_vm4, %v2961_v20 }
 0x3bf   :  { %7511 = vmatprep.mubr.msk.f32.mxu1 %vm8315_vm0, %v8312_v0 }
 0x3c2   :  { %7512 = vmatmul.mubr.msk.f32.vlgmr.msra.gmra.mrb[152].mxu1 %vm1704_vm7, %v2962_v50 }
 0x3c3   :  { %7514 = vmatprep.mubr.msk.f32.mxu1 %vm8315_vm0, %v8312_v0  ;;  %7568 = vmatpush3.msk.msra.mxu1 %vm459_vm3, %v9529_v18 }
 0x3c4   :  { %7625 = vmatprep.subr.mxu1 %v8312_v0 }
 0x3c6   :  { %7515 = vmatmul.mubr.msk.f32.gmra.mrb[154].mxu1 %vm1704_vm7, %v2963_v46 }
 0x3c7   :  { %7517 = vmatprep.mubr.msk.f32.mxu1 %vm8315_vm0, %v8312_v0 }
 0x3ca   :  { %7518 = vmatmul.mubr.msk.f32.gmra.mrb[156].mxu1 %vm1704_vm7, %v2964_v55 }
 0x3cb   :  { %7520 = vmatprep.mubr.msk.f32.mxu1 %vm8315_vm0, %v8312_v0 }
 0x3ce   :  { %7521 = vmatmul.mubr.msk.f32.gmra.mrb[158].mxu1 %vm1704_vm7, %v2965_v11 }
 0x3cf   :  { %7523 = vmatprep.mubr.msk.f32.mxu1 %vm8315_vm0, %v8312_v0 }
 0x3d2   :  { %7524 = vmatmul.mubr.msk.f32.gmra.mrb[160].mxu1 %vm1704_vm7, %v2966_v9 }
 0x3d3   :  { %7526 = vmatprep.mubr.msk.f32.mxu1 %vm8315_vm0, %v8312_v0 }
 0x3d6   :  { %7527 = vmatmul.mubr.msk.f32.gmra.mrb[162].mxu1 %vm1704_vm7, %v2967_v30 }
 0x3d7   :  { %7529 = vmatprep.mubr.msk.f32.mxu1 %vm8315_vm0, %v8312_v0 }
 0x3da   :  { %7530 = vmatmul.mubr.msk.f32.gmra.mrb[164].mxu1 %vm1704_vm7, %v2968_v42 }
 0x3db   :  { %7532 = vmatprep.mubr.msk.f32.mxu1 %vm8315_vm0, %v8312_v0 }
 0x3de   :  { %7533 = vmatmul.mubr.msk.f32.gmra.mrb[166].mxu1 %vm1704_vm7, %v2969_v21 }
 0x3df   :  { %7535 = vmatprep.mubr.msk.f32.mxu1 %vm8315_vm0, %v8312_v0 }
 0x3e2   :  { %7536 = vmatmul.mubr.msk.f32.gmra.mrb[168].mxu1 %vm1704_vm7, %v2970_v2 }
 0x3e3   :  { %7569 = vmatprep.mubr.msk.f32.mxu1 %vm8315_vm0, %v8312_v0 }
 0x44d   :  { %v9562_v24 = vpop.f32.mrb[116].mxu1  ;;  %v3204_v26 = vpop.f32.mrb[90].mxu0 }
 0x44e   :  { %v3385_v5 = vmul.f32 %v9562_v24, %v9562_v24  ;;  %v3394_v16 = vmul.f32 %v3204_v26, %v3204_v26  ;;  %v7397_v14 = vpop.f32.mrb[117].mxu1  ;;  %v7426_v7 = vpop.f32.mrb[91].mxu0  ;;  %7570 = vmatmul.mubr.msk.f32.vlgmr.msra.gmra.mrb[170].mxu1 %vm431_vm4, %v3204_v26 }
 0x44f   :  { %7572 = vmatprep.mubr.msk.f32.mxu1 %vm8315_vm0, %v8312_v0 }
 0x450   :  { %v9569_v38 = vadd.f32 %v3394_v16, %v3385_v5 }
 0x451   :  { %v9571_v19 = vpop.f32.mrb[118].mxu1  ;;  %v3209_v27 = vpop.f32.mrb[92].mxu0 }
 0x452   :  { %v3386_v25 = vmul.f32 %v9571_v19, %v9571_v19  ;;  %v3395_v10 = vmul.f32 %v3209_v27, %v3209_v27  ;;  %v7400_v32 = vpop.f32.mrb[119].mxu1  ;;  %v7429_v15 = vpop.f32.mrb[93].mxu0  ;;  %7573 = vmatmul.mubr.msk.f32.gmra.mrb[172].mxu1 %vm431_vm4, %v3209_v27 }
 0x453   :  { %7575 = vmatprep.mubr.msk.f32.mxu1 %vm8315_vm0, %v8312_v0 }
 0x454   :  { %v9578_v34 = vadd.f32 %v3395_v10, %v3386_v25 }
 0x455   :  { %v9580_v52 = vpop.f32.mrb[120].mxu1  ;;  %v3214_v49 = vpop.f32.mrb[94].mxu0 }
 0x456   :  { %v3387_v51 = vmul.f32 %v9580_v52, %v9580_v52  ;;  %v3396_v35 = vmul.f32 %v3214_v49, %v3214_v49  ;;  %v7403_v37 = vpop.f32.mrb[121].mxu1  ;;  %v7432_v23 = vpop.f32.mrb[95].mxu0  ;;  %7576 = vmatmul.mubr.msk.f32.gmra.mrb[174].mxu1 %vm431_vm4, %v3214_v49 }
 0x457   :  { %7578 = vmatprep.mubr.msk.f32.mxu1 %vm8315_vm0, %v8312_v0 }
 0x458   :  { %v9587_v47 = vadd.f32 %v3396_v35, %v3387_v51 }
 0x459   :  { %v9589_v58 = vpop.f32.mrb[122].mxu1  ;;  %v3219_v59 = vpop.f32.mrb[96].mxu0 }
 0x45a   :  { %v3388_v6 = vmul.f32 %v9589_v58, %v9589_v58  ;;  %v3397_v54 = vmul.f32 %v3219_v59, %v3219_v59  ;;  %v7406_v53 = vpop.f32.mrb[123].mxu1  ;;  %v7435_v60 = vpop.f32.mrb[97].mxu0  ;;  %7579 = vmatmul.mubr.msk.f32.gmra.mrb[176].mxu1 %vm431_vm4, %v3219_v59 }
 0x45b   :  { %7581 = vmatprep.mubr.msk.f32.mxu1 %vm8315_vm0, %v8312_v0 }
 0x45c   :  { %v9596_v41 = vadd.f32 %v3397_v54, %v3388_v6 }
 0x45d   :  { %v9598_v40 = vpop.f32.mrb[124].mxu1  ;;  %v3224_v45 = vpop.f32.mrb[98].mxu0 }
 0x45e   :  { %v3389_v1 = vmul.f32 %v9598_v40, %v9598_v40  ;;  %v3398_v4 = vmul.f32 %v3224_v45, %v3224_v45  ;;  %v7409_v61 = vpop.f32.mrb[125].mxu1  ;;  %v7438_v3 = vpop.f32.mrb[99].mxu0  ;;  %7582 = vmatmul.mubr.msk.f32.gmra.mrb[178].mxu1 %vm431_vm4, %v3224_v45 }
 0x45f   :  { %7584 = vmatprep.mubr.msk.f32.mxu1 %vm8315_vm0, %v8312_v0 }
 0x460   :  { %v9605_v56 = vadd.f32 %v3398_v4, %v3389_v1 }
 0x461   :  { %v9607_v44 = vpop.f32.mrb[126].mxu1  ;;  %v3229_v8 = vpop.f32.mrb[100].mxu0 }
 0x462   :  { %v3390_v28 = vmul.f32 %v9607_v44, %v9607_v44  ;;  %v3399_v31 = vmul.f32 %v3229_v8, %v3229_v8  ;;  %v7412_v43 = vpop.f32.mrb[127].mxu1  ;;  %v7441_v63 = vpop.f32.mrb[101].mxu0  ;;  %7585 = vmatmul.mubr.msk.f32.gmra.mrb[180].mxu1 %vm431_vm4, %v3229_v8 }
 0x463   :  { %7587 = vmatprep.mubr.msk.f32.mxu1 %vm8315_vm0, %v8312_v0 }
 0x464   :  { %v9614_v39 = vadd.f32 %v3399_v31, %v3390_v28 }
 0x465   :  { %v9616_v17 = vpop.f32.mrb[128].mxu1  ;;  %v3234_v62 = vpop.f32.mrb[102].mxu0 }
 0x466   :  { %v3391_v48 = vmul.f32 %v9616_v17, %v9616_v17  ;;  %v3400_v57 = vmul.f32 %v3234_v62, %v3234_v62  ;;  %v7415_v22 = vpop.f32.mrb[129].mxu1  ;;  %v7444_v36 = vpop.f32.mrb[103].mxu0  ;;  %7588 = vmatmul.mubr.msk.f32.gmra.mrb[182].mxu1 %vm431_vm4, %v3234_v62 }
 0x467   :  { %7590 = vmatprep.mubr.msk.f32.mxu1 %vm8315_vm0, %v8312_v0 }
 0x468   :  { %v9623_v33 = vadd.f32 %v3400_v57, %v3391_v48 }
 0x469   :  { %v9625_v12 = vpop.f32.mrb[130].mxu1  ;;  %v3239_v20 = vpop.f32.mrb[104].mxu0 }
 0x46a   :  { %v3392_v29 = vmul.f32 %v9625_v12, %v9625_v12  ;;  %v3401_v50 = vmul.f32 %v3239_v20, %v3239_v20  ;;  %v7418_v46 = vpop.f32.mrb[131].mxu1  ;;  %v7447_v55 = vpop.f32.mrb[105].mxu0  ;;  %7591 = vmatmul.mubr.msk.f32.gmra.mrb[184].mxu1 %vm431_vm4, %v3239_v20 }
 0x46b   :  { %7593 = vmatprep.mubr.msk.f32.mxu1 %vm8315_vm0, %v8312_v0 }
 0x46c   :  { %v9632_v11 = vadd.f32 %v3401_v50, %v3392_v29 }
 0x46d   :  { %v9634_v9 = vpop.f32.mrb[132].mxu1  ;;  %v3244_v30 = vpop.f32.mrb[106].mxu0 }
 0x46e   :  { %v3393_v42 = vmul.f32 %v9634_v9, %v9634_v9  ;;  %v3402_v21 = vmul.f32 %v3244_v30, %v3244_v30  ;;  %v7421_v2 = vpop.f32.mrb[133].mxu1  ;;  %v7450_v13 = vpop.f32.mrb[107].mxu0  ;;  %7594 = vmatmul.mubr.msk.f32.gmra.mrb[186].mxu1 %vm431_vm4, %v3244_v30 }
 0x46f   :  { %7627 = vmatprep.mubr.msk.f32.mxu1 %vm8315_vm0, %v8312_v0 }
 0x470   :  { %v9641_v26 = vadd.f32 %v3402_v21, %v3393_v42 }
 0x471   :  { %v9643_v5 = vpop.f32.mrb[134].mxu1 }
 0x472   :  { %v3412_v16 = vmul.f32 %v9643_v5, %v9643_v5  ;;  %v7455_v14 = vpop.f32.mrb[135].mxu1 }
 0x474   :  { %v3421_v7 = vadd.f32 %v3412_v16, %v9569_v38 }
 0x475   :  { %v9648_v27 = vpop.f32.mrb[136].mxu1 }
 0x476   :  { %v3430_v25 = vmax.f32 %v3421_v7, 1e-08  ;;  %v3413_v10 = vmul.f32 %v9648_v27, %v9648_v27  ;;  %v7458_v32 = vpop.f32.mrb[137].mxu1 }
 0x478   :  { %8168 = vrsqrt.f32 %v3430_v25  ;;  %v3422_v15 = vadd.f32 %v3413_v10, %v9578_v34  ;;  %vm3441_vm10 = vcmp.eq.f32.partialorder %v3430_v25, inf  ;;  %v3444_v3 = vand.u32 2147483648, %v3430_v25 }
 0x479   :  { %v9653_v49 = vpop.f32.mrb[138].mxu1  ;;  %vm3443_vm5 = vcmp.eq.f32.partialorder %v3430_v25, 0.0 }
 0x47a   :  { %v3431_v51 = vmax.f32 %v3422_v15, 1e-08  ;;  %v3414_v35 = vmul.f32 %v9653_v49, %v9653_v49  ;;  %v7461_v37 = vpop.f32.mrb[139].mxu1 }
 0x47c   :  { %v3423_v23 = vadd.f32 %v3414_v35, %v9587_v47  ;;  %8170 = vrsqrt.f32 %v3431_v51  ;;  %vm3448_vm6 = vcmp.eq.f32.partialorder %v3431_v51, inf  ;;  %v3451_v57 = vand.u32 2147483648, %v3431_v51 }
 0x47d   :  { %v9658_v38 = vpop.f32.mrb[140].mxu1  ;;  %vm3450_vm8 = vcmp.eq.f32.partialorder %v3431_v51, 0.0 }
 0x47e   :  { %v3432_v59 = vmax.f32 %v3423_v23, 1e-08  ;;  %v3415_v6 = vmul.f32 %v9658_v38, %v9658_v38  ;;  %v7464_v54 = vpop.f32.mrb[141].mxu1 }
 0x480   :  { %v3424_v53 = vadd.f32 %v3415_v6, %v9596_v41  ;;  %8172 = vrsqrt.f32 %v3432_v59  ;;  %vm3455_vm9 = vcmp.eq.f32.partialorder %v3432_v59, inf  ;;  %v3458_v42 = vand.u32 2147483648, %v3432_v59 }
 0x481   :  { %v9663_v34 = vpop.f32.mrb[142].mxu1  ;;  %vm3457_vm11 = vcmp.eq.f32.partialorder %v3432_v59, 0.0 }
 0x482   :  { %v8169_v60 = vpop.eup %8168  ;;  %v9665_v45 = vmax.f32 %v3424_v53, 1e-08  ;;  %v3416_v1 = vmul.f32 %v9663_v34, %v9663_v34  ;;  %v7467_v47 = vpop.f32.mrb[143].mxu1 }
 0x483   :  { %v3440_v4 = vmul.f32 %v8169_v60, %v3430_v25 }
 0x484   :  { %v3425_v61 = vadd.f32 %v3416_v1, %v9605_v56  ;;  %8174 = vrsqrt.f32 %v9665_v45  ;;  %vm3462_vm12 = vcmp.eq.f32.partialorder %v9665_v45, inf  ;;  %v3465_v32 = vand.u32 2147483648, %v9665_v45 }
 0x485   :  { %v9671_v8 = vpop.f32.mrb[144].mxu1  ;;  %v3442_v41 = vsel %vm3441_vm10, %v3430_v25, %v3440_v4  ;;  %vm3464_vm13 = vcmp.eq.f32.partialorder %v9665_v45, 0.0 }
 0x486   :  { %v8171_v28 = vpop.eup %8170  ;;  %v9673_v31 = vmax.f32 %v3425_v61, 1e-08  ;;  %v3417_v43 = vmul.f32 %v9671_v8, %v9671_v8  ;;  %v7470_v63 = vpop.f32.mrb[145].mxu1  ;;  %v3445_v62 = vsel %vm3443_vm5, %v3444_v3, %v3442_v41 }
 0x487   :  { %7483 = vmatmul.mubr.msk.f32.vlgmr.msra.gmra.mrb[108].mxu0 %vm431_vm4, %v3445_v62  ;;  %v3447_v48 = vmul.f32 %v8171_v28, %v3431_v51 }
 0x488   :  { %v3426_v56 = vadd.f32 %v3417_v43, %v9614_v39  ;;  %7485 = vmatprep.mubr.msk.f32.mxu0 %vm8315_vm0, %v8312_v0  ;;  %8176 = vrsqrt.f32 %v9673_v31  ;;  %7539 = vmatpush3.msk.msra.mxu0 %vm459_vm3, %v9529_v18  ;;  %vm3469_vm14 = vcmp.eq.f32.partialorder %v9673_v31, inf  ;;  %v3472_v53 = vand.u32 2147483648, %v9673_v31 }
 0x489   :  { %v9684_v22 = vpop.f32.mrb[146].mxu1  ;;  %v3449_v36 = vsel %vm3448_vm6, %v3431_v51, %v3447_v48  ;;  %7596 = vmatprep.subr.mxu0 %v8312_v0  ;;  %vm3471_vm15 = vcmp.eq.f32.partialorder %v9673_v31, 0.0 }
 0x48a   :  { %v8173_v20 = vpop.eup %8172  ;;  %v3435_v29 = vmax.f32 %v3426_v56, 1e-08  ;;  %v3418_v39 = vmul.f32 %v9684_v22, %v9684_v22  ;;  %v7473_v50 = vpop.f32.mrb[147].mxu1  ;;  %v3452_v46 = vsel %vm3450_vm8, %v3451_v57, %v3449_v36 }
 0x48b   :  { %7486 = vmatmul.mubr.msk.f32.gmra.mrb[110].mxu0 %vm431_vm4, %v3452_v46  ;;  %v3454_v55 = vmul.f32 %v8173_v20, %v3432_v59 }
 0x48c   :  { %v3427_v30 = vadd.f32 %v3418_v39, %v9623_v33  ;;  %7488 = vmatprep.mubr.msk.f32.mxu0 %vm8315_vm0, %v8312_v0  ;;  %8178 = vrsqrt.f32 %v3435_v29  ;;  %vm3476_vm1 = vcmp.eq.f32.partialorder %v3435_v29, inf  ;;  %v3479_v3 = vand.u32 2147483648, %v3435_v29 }
 0x48d   :  { %v9693_v21 = vpop.f32.mrb[148].mxu1  ;;  %v3456_v2 = vsel %vm3455_vm9, %v3432_v59, %v3454_v55  ;;  %vm3478_vm2 = vcmp.eq.f32.partialorder %v3435_v29, 0.0 }
 0x48e   :  { %v8175_v13 = vpop.eup %8174  ;;  %v3436_v16 = vmax.f32 %v3427_v30, 1e-08  ;;  %v3419_v14 = vmul.f32 %v9693_v21, %v9693_v21  ;;  %v7476_v7 = vpop.f32.mrb[149].mxu1  ;;  %v3459_v25 = vsel %vm3457_vm11, %v3458_v42, %v3456_v2 }
 0x48f   :  { %7489 = vmatmul.mubr.msk.f32.gmra.mrb[112].mxu0 %vm431_vm4, %v3459_v25  ;;  %v3461_v33 = vmul.f32 %v8175_v13, %v9665_v45 }
 0x490   :  { %v3428_v10 = vadd.f32 %v3419_v14, %v9632_v11  ;;  %7491 = vmatprep.mubr.msk.f32.mxu0 %vm8315_vm0, %v8312_v0  ;;  %8180 = vrsqrt.f32 %v3436_v16  ;;  %vm3483_vm10 = vcmp.eq.f32.partialorder %v3436_v16, inf  ;;  %v3486_v48 = vand.u32 2147483648, %v3436_v16 }
 0x491   :  { %v9704_v15 = vpop.f32.mrb[150].mxu1  ;;  %v3463_v51 = vsel %vm3462_vm12, %v9665_v45, %v3461_v33  ;;  %vm3485_vm5 = vcmp.eq.f32.partialorder %v3436_v16, 0.0 }
 0x492   :  { %v8177_v35 = vpop.eup %8176  ;;  %v3437_v37 = vmax.f32 %v3428_v10, 1e-08  ;;  %v3420_v23 = vmul.f32 %v9704_v15, %v9704_v15  ;;  %v7479_v11 = vpop.f32.mrb[151].mxu1  ;;  %v3466_v59 = vsel %vm3464_vm13, %v3465_v32, %v3463_v51 }
 0x493   :  { %7492 = vmatmul.mubr.msk.f32.gmra.mrb[114].mxu0 %vm431_vm4, %v3466_v59  ;;  %v3468_v6 = vmul.f32 %v8177_v35, %v9673_v31 }
 0x494   :  { %v3429_v54 = vadd.f32 %v3420_v23, %v9641_v26  ;;  %7494 = vmatprep.mubr.msk.f32.mxu0 %vm8315_vm0, %v8312_v0  ;;  %8182 = vrsqrt.f32 %v3437_v37  ;;  %vm3490_vm6 = vcmp.eq.f32.partialorder %v3437_v37, inf  ;;  %v3493_v50 = vand.u32 2147483648, %v3437_v37 }
 0x495   :  { %v9717_v60 = vpop.f32.mrb[152].mxu1  ;;  %v3470_v45 = vsel %vm3469_vm14, %v9673_v31, %v3468_v6  ;;  %vm3492_vm8 = vcmp.eq.f32.partialorder %v3437_v37, 0.0  ;;  %v9852_v6 = vld [vmem:[%s6136_s3] sm:$0xf] }
 0x496   :  { %v8179_v1 = vpop.eup %8178  ;;  %v3438_v47 = vmax.f32 %v3429_v54, 1e-08  ;;  %v7513_v4 = vpop.f32.mrb[153].mxu1  ;;  %v3473_v61 = vsel %vm3471_vm15, %v3472_v53, %v3470_v45  ;;  %v9860_v54 = vld [vmem:[%s6132_s7] ss:$0 sm:$0xff] }
 0x497   :  { %7495 = vmatmul.mubr.msk.f32.gmra.mrb[116].mxu0 %vm431_vm4, %v3473_v61  ;;  %v3475_v26 = vmul.f32 %v8179_v1, %v3435_v29 }
 0x498   :  { %7497 = vmatprep.mubr.msk.f32.mxu0 %vm8315_vm0, %v8312_v0  ;;  %8184 = vrsqrt.f32 %v3438_v47  ;;  %vm3497_vm9 = vcmp.eq.f32.partialorder %v3438_v47, inf  ;;  %vm3499_vm11 = vcmp.eq.f32.partialorder %v3438_v47, 0.0 }
 0x499   :  { %v9724_v41 = vpop.f32.mrb[154].mxu1  ;;  %v3477_v28 = vsel %vm3476_vm1, %v3435_v29, %v3475_v26 }
 0x49a   :  { %v8181_v43 = vpop.eup %8180  ;;  %v7516_v63 = vpop.f32.mrb[155].mxu1  ;;  %v3480_v31 = vsel %vm3478_vm2, %v3479_v3, %v3477_v28 }
 0x49b   :  { %7498 = vmatmul.mubr.msk.f32.gmra.mrb[118].mxu0 %vm431_vm4, %v3480_v31  ;;  %v3482_v62 = vmul.f32 %v8181_v43, %v3436_v16 }
 0x49c   :  { %7500 = vmatprep.mubr.msk.f32.mxu0 %vm8315_vm0, %v8312_v0 }
 0x49d   :  { %v9729_v56 = vpop.f32.mrb[156].mxu1  ;;  %v3484_v57 = vsel %vm3483_vm10, %v3436_v16, %v3482_v62  ;;  %v3500_v16 = vand.u32 2147483648, %v3438_v47 }
 0x49e   :  { %v8183_v36 = vpop.eup %8182  ;;  %v7519_v20 = vpop.f32.mrb[157].mxu1  ;;  %v3487_v39 = vsel %vm3485_vm5, %v3486_v48, %v3484_v57 }
 0x49f   :  { %7501 = vmatmul.mubr.msk.f32.gmra.mrb[120].mxu0 %vm431_vm4, %v3487_v39  ;;  %v3489_v29 = vmul.f32 %v8183_v36, %v3437_v37 }
 0x4a0   :  { %7503 = vmatprep.mubr.msk.f32.mxu0 %vm8315_vm0, %v8312_v0 }
 0x4a1   :  { %v9734_v46 = vpop.f32.mrb[158].mxu1  ;;  %v3491_v55 = vsel %vm3490_vm6, %v3437_v37, %v3489_v29 }
 0x4a2   :  { %v8185_v30 = vpop.eup %8184  ;;  %v7522_v42 = vpop.f32.mrb[159].mxu1  ;;  %v3494_v2 = vsel %vm3492_vm8, %v3493_v50, %v3491_v55 }
 0x4a3   :  { %7504 = vmatmul.mubr.msk.f32.gmra.mrb[122].mxu0 %vm431_vm4, %v3494_v2  ;;  %v3496_v13 = vmul.f32 %v8185_v30, %v3438_v47 }
 0x4a4   :  { %7506 = vmatprep.mubr.msk.f32.mxu0 %vm8315_vm0, %v8312_v0 }
 0x4a5   :  { %v9739_v14 = vpop.f32.mrb[160].mxu1  ;;  %v3498_v7 = vsel %vm3497_vm9, %v3438_v47, %v3496_v13 }
 0x4a6   :  { %v7525_v25 = vpop.f32.mrb[161].mxu1  ;;  %v3501_v33 = vsel %vm3499_vm11, %v3500_v16, %v3498_v7 }
 0x4a7   :  { %7507 = vmatmul.mubr.msk.f32.gmra.mrb[124].mxu0 %vm431_vm4, %v3501_v33 }
 0x4a8   :  { %7540 = vmatprep.mubr.msk.f32.mxu0 %vm8315_vm0, %v8312_v0 }
 0x4a9   :  { %v9744_v10 = vpop.f32.mrb[162].mxu1 }
 0x4aa   :  { %v7528_v32 = vpop.f32.mrb[163].mxu1 }
 0x4ab   :  { %7541 = vmatmul.mubr.msk.f32.vlgmr.msra.gmra.mrb[126].mxu0 %vm431_vm4, %v9562_v24 }
 0x4ac   :  { %7543 = vmatprep.mubr.msk.f32.mxu0 %vm8315_vm0, %v8312_v0  ;;  %7597 = vmatpush3.msk.msra.mxu0 %vm459_vm3, %v9529_v18 }
 0x4ad   :  { %v9752_v51 = vpop.f32.mrb[164].mxu1  ;;  %7654 = vmatprep.subr.mxu0 %v8312_v0 }
 0x4ae   :  { %v7531_v35 = vpop.f32.mrb[165].mxu1 }
 0x4af   :  { %7544 = vmatmul.mubr.msk.f32.gmra.mrb[128].mxu0 %vm431_vm4, %v9571_v19  ;;  %v172_v19 = vld [vmem:[%s6134_s29] sm:$0xff] }
 0x4b0   :  { %7546 = vmatprep.mubr.msk.f32.mxu0 %vm8315_vm0, %v8312_v0  ;;  %7626 = vmatpush3.msra.mxu1 %v172_v19 }
 0x4b1   :  { %v9759_v37 = vpop.f32.mrb[166].mxu1  ;;  %7683 = vmatprep.subr.mxu1 %v8312_v0 }
 0x4b2   :  { %v7534_v24 = vpop.f32.mrb[167].mxu1 }
 0x4b3   :  { %7547 = vmatmul.mubr.msk.f32.gmra.mrb[130].mxu0 %vm431_vm4, %v9580_v52 }
 0x4b4   :  { %7549 = vmatprep.mubr.msk.f32.mxu0 %vm8315_vm0, %v8312_v0 }
 0x4b5   :  { %v9765_v18 = vpop.f32.mrb[168].mxu1 }
 0x4b6   :  { %v7537_v23 = vpop.f32.mrb[169].mxu1 }
 0x4b7   :  { %7550 = vmatmul.mubr.msk.f32.gmra.mrb[132].mxu0 %vm431_vm4, %v9589_v58 }
 0x4b8   :  { %7552 = vmatprep.mubr.msk.f32.mxu0 %vm8315_vm0, %v8312_v0 }
 0x4bb   :  { %7553 = vmatmul.mubr.msk.f32.gmra.mrb[134].mxu0 %vm431_vm4, %v9598_v40 }
 0x4bc   :  { %7555 = vmatprep.mubr.msk.f32.mxu0 %vm8315_vm0, %v8312_v0 }
 0x4bf   :  { %7556 = vmatmul.mubr.msk.f32.gmra.mrb[136].mxu0 %vm431_vm4, %v9607_v44 }
 0x4c0   :  { %7558 = vmatprep.mubr.msk.f32.mxu0 %vm8315_vm0, %v8312_v0 }
 0x4c3   :  { %7559 = vmatmul.mubr.msk.f32.gmra.mrb[138].mxu0 %vm431_vm4, %v9616_v17 }
 0x4c4   :  { %7561 = vmatprep.mubr.msk.f32.mxu0 %vm8315_vm0, %v8312_v0 }
 0x4c7   :  { %7562 = vmatmul.mubr.msk.f32.gmra.mrb[140].mxu0 %vm431_vm4, %v9625_v12 }
 0x4c8   :  { %7564 = vmatprep.mubr.msk.f32.mxu0 %vm8315_vm0, %v8312_v0 }
 0x4cb   :  { %7565 = vmatmul.mubr.msk.f32.gmra.mrb[142].mxu0 %vm431_vm4, %v9634_v9 }
 0x4cc   :  { %7598 = vmatprep.mubr.msk.f32.mxu0 %vm8315_vm0, %v8312_v0 }
 0x4cf   :  { %7599 = vmatmul.mubr.msk.f32.vlgmr.msra.gmra.mrb[144].mxu0 %vm431_vm4, %v9643_v5 }
 0x4d0   :  { %7601 = vmatprep.mubr.msk.f32.mxu0 %vm8315_vm0, %v8312_v0  ;;  %7655 = vmatpush3.msk.msra.mxu0 %vm459_vm3, %v9852_v6 }
 0x4d1   :  { %7712 = vmatprep.subr.mxu0 %v8312_v0 }
 0x4d3   :  { %7602 = vmatmul.mubr.msk.f32.gmra.mrb[146].mxu0 %vm431_vm4, %v9648_v27 }
 0x4d4   :  { %7604 = vmatprep.mubr.msk.f32.mxu0 %vm8315_vm0, %v8312_v0 }
 0x4d7   :  { %7605 = vmatmul.mubr.msk.f32.gmra.mrb[148].mxu0 %vm431_vm4, %v9653_v49 }
 0x4d8   :  { %7607 = vmatprep.mubr.msk.f32.mxu0 %vm8315_vm0, %v8312_v0 }
 0x4db   :  { %7608 = vmatmul.mubr.msk.f32.gmra.mrb[150].mxu0 %vm431_vm4, %v9658_v38 }
 0x4dc   :  { %7610 = vmatprep.mubr.msk.f32.mxu0 %vm8315_vm0, %v8312_v0 }
 0x4df   :  { %7611 = vmatmul.mubr.msk.f32.gmra.mrb[152].mxu0 %vm431_vm4, %v9663_v34 }
 0x4e0   :  { %7613 = vmatprep.mubr.msk.f32.mxu0 %vm8315_vm0, %v8312_v0 }
 0x4e3   :  { %7614 = vmatmul.mubr.msk.f32.gmra.mrb[154].mxu0 %vm431_vm4, %v9671_v8 }
 0x4e4   :  { %7616 = vmatprep.mubr.msk.f32.mxu0 %vm8315_vm0, %v8312_v0 }
 0x4e7   :  { %7617 = vmatmul.mubr.msk.f32.gmra.mrb[156].mxu0 %vm431_vm4, %v9684_v22 }
 0x4e8   :  { %7619 = vmatprep.mubr.msk.f32.mxu0 %vm8315_vm0, %v8312_v0 }
 0x4eb   :  { %7620 = vmatmul.mubr.msk.f32.gmra.mrb[158].mxu0 %vm431_vm4, %v9693_v21 }
 0x4ec   :  { %7622 = vmatprep.mubr.msk.f32.mxu0 %vm8315_vm0, %v8312_v0 }
 0x4ef   :  { %7623 = vmatmul.mubr.msk.f32.gmra.mrb[160].mxu0 %vm431_vm4, %v9704_v15 }
 0x4f0   :  { %7656 = vmatprep.mubr.msk.f32.mxu0 %vm8315_vm0, %v8312_v0 }
 0x521   :  { %v9831_v52 = vpop.f32.mrb[170].mxu1 }
 0x522   :  { %v7571_v58 = vpop.f32.mrb[171].mxu1 }
 0x525   :  { %v9833_v40 = vpop.f32.mrb[172].mxu1 }
 0x526   :  { %v7574_v44 = vpop.f32.mrb[173].mxu1 }
 0x529   :  { %v9835_v17 = vpop.f32.mrb[174].mxu1 }
 0x52a   :  { %v7577_v12 = vpop.f32.mrb[175].mxu1 }
 0x52d   :  { %v9837_v9 = vpop.f32.mrb[176].mxu1 }
 0x52e   :  { %v7580_v5 = vpop.f32.mrb[177].mxu1 }
 0x531   :  { %v9839_v27 = vpop.f32.mrb[178].mxu1 }
 0x532   :  { %v7583_v49 = vpop.f32.mrb[179].mxu1 }
 0x535   :  { %v9841_v38 = vpop.f32.mrb[180].mxu1 }
 0x536   :  { %v7586_v34 = vpop.f32.mrb[181].mxu1 }
 0x539   :  { %v9843_v8 = vpop.f32.mrb[182].mxu1 }
 0x53a   :  { %v7589_v22 = vpop.f32.mrb[183].mxu1 }
 0x53d   :  { %v9845_v21 = vpop.f32.mrb[184].mxu1 }
 0x53e   :  { %v7592_v15 = vpop.f32.mrb[185].mxu1 }
 0x541   :  { %v9847_v11 = vpop.f32.mrb[186].mxu1 }
 0x542   :  { %v7595_v59 = vpop.f32.mrb[187].mxu1 }
 0x55a   :  { %v3598_v53 = vpop.f32.mrb[108].mxu0 }
 0x55b   :  { %v3736_v45 = vadd.f32 %v9717_v60, %v3598_v53  ;;  %v7484_v1 = vpop.f32.mrb[109].mxu0 }
 0x55d   :  { %v9864_v47 = vadd.f32 %v9860_v54, %v3736_v45 }
 0x55e   :  { %v3603_v4 = vpop.f32.mrb[110].mxu0 }
 0x55f   :  { %v6411_v61 = vmul.f32 -1.442695, %v9864_v47  ;;  %v3741_v26 = vadd.f32 %v9724_v41, %v3603_v4  ;;  %v7487_v3 = vpop.f32.mrb[111].mxu0 }
 0x561   :  { %8186 = vpow2.f32 %v6411_v61  ;;  %v9869_v28 = vadd.f32 %v9860_v54, %v3741_v26 }
 0x562   :  { %v3608_v43 = vpop.f32.mrb[112].mxu0 }
 0x563   :  { %v6412_v63 = vmul.f32 -1.442695, %v9869_v28  ;;  %v3746_v31 = vadd.f32 %v9729_v56, %v3608_v43  ;;  %v7490_v60 = vpop.f32.mrb[113].mxu0 }
 0x565   :  { %8188 = vpow2.f32 %v6412_v63  ;;  %v9874_v62 = vadd.f32 %v9860_v54, %v3746_v31 }
 0x566   :  { %v3613_v48 = vpop.f32.mrb[114].mxu0 }
 0x567   :  { %v6413_v57 = vmul.f32 -1.442695, %v9874_v62  ;;  %v3751_v41 = vadd.f32 %v9734_v46, %v3613_v48  ;;  %v7493_v36 = vpop.f32.mrb[115].mxu0 }
 0x569   :  { %8190 = vpow2.f32 %v6413_v57  ;;  %v9879_v20 = vadd.f32 %v9860_v54, %v3751_v41 }
 0x56a   :  { %v3618_v39 = vpop.f32.mrb[116].mxu0 }
 0x56b   :  { %v8187_v29 = vpop.eup %8186  ;;  %v6414_v50 = vmul.f32 -1.442695, %v9879_v20  ;;  %v3756_v56 = vadd.f32 %v9739_v14, %v3618_v39  ;;  %v7496_v55 = vpop.f32.mrb[117].mxu0 }
 0x56c   :  { %v4235_v30 = vadd.f32 1.0, %v8187_v29 }
 0x56d   :  { %8192 = vpow2.f32 %v6414_v50  ;;  %v9884_v42 = vadd.f32 %v9860_v54, %v3756_v56 }
 0x56e   :  { %8194 = vrcp.f32 %v4235_v30  ;;  %v3623_v2 = vpop.f32.mrb[118].mxu0 }
 0x56f   :  { %v8189_v46 = vpop.eup %8188  ;;  %v6415_v13 = vmul.f32 -1.442695, %v9884_v42  ;;  %v3761_v16 = vadd.f32 %v9744_v10, %v3623_v2  ;;  %v7499_v7 = vpop.f32.mrb[119].mxu0 }
 0x570   :  { %v4236_v25 = vadd.f32 1.0, %v8189_v46 }
 0x571   :  { %8196 = vpow2.f32 %v6415_v13  ;;  %v9889_v33 = vadd.f32 %v9860_v54, %v3761_v16 }
 0x572   :  { %8198 = vrcp.f32 %v4236_v25  ;;  %v3628_v14 = vpop.f32.mrb[120].mxu0 }
 0x573   :  { %v8191_v32 = vpop.eup %8190  ;;  %v6416_v35 = vmul.f32 -1.442695, %v9889_v33  ;;  %v3766_v24 = vadd.f32 %v9752_v51, %v3628_v14  ;;  %v7502_v23 = vpop.f32.mrb[121].mxu0 }
 0x574   :  { %v4237_v19 = vadd.f32 1.0, %v8191_v32 }
 0x575   :  { %8200 = vpow2.f32 %v6416_v35  ;;  %v9894_v58 = vadd.f32 %v9860_v54, %v3766_v24 }
 0x576   :  { %8202 = vrcp.f32 %v4237_v19  ;;  %v3633_v10 = vpop.f32.mrb[122].mxu0 }
 0x577   :  { %v8193_v44 = vpop.eup %8192  ;;  %v6417_v12 = vmul.f32 -1.442695, %v9894_v58  ;;  %v3771_v5 = vadd.f32 %v9759_v37, %v3633_v10  ;;  %v7505_v49 = vpop.f32.mrb[123].mxu0 }
 0x578   :  { %v8195_v34 = vpop.eup %8194  ;;  %v4238_v22 = vadd.f32 1.0, %v8193_v44 }
 0x579   :  { %8204 = vpow2.f32 %v6417_v12  ;;  %v9899_v15 = vadd.f32 %v9860_v54, %v3771_v5  ;;  %7628 = vmatmul.mubr.msk.f32.vlgmr.msra.gmra.mrb[188].mxu1 %vm1704_vm7, %v8195_v34 }
 0x57a   :  { %8206 = vrcp.f32 %v4238_v22  ;;  %v3638_v51 = vpop.f32.mrb[124].mxu0  ;;  %7630 = vmatprep.mubr.msk.f32.mxu1 %vm8315_vm0, %v8312_v0  ;;  %7684 = vmatpush3.msk.msra.mxu1 %vm459_vm3, %v9852_v6 }
 0x57b   :  { %v8197_v59 = vpop.eup %8196  ;;  %v6418_v37 = vmul.f32 -1.442695, %v9899_v15  ;;  %v3776_v53 = vadd.f32 %v9765_v18, %v3638_v51  ;;  %v7508_v45 = vpop.f32.mrb[125].mxu0  ;;  %7741 = vmatprep.subr.mxu1 %v8312_v0 }
 0x57c   :  { %v8199_v1 = vpop.eup %8198  ;;  %v4239_v4 = vadd.f32 1.0, %v8197_v59 }
 0x57d   :  { %8208 = vpow2.f32 %v6418_v37  ;;  %v9910_v61 = vadd.f32 %v9860_v54, %v3776_v53  ;;  %7631 = vmatmul.mubr.msk.f32.gmra.mrb[190].mxu1 %vm1704_vm7, %v8199_v1 }
 0x57e   :  { %8210 = vrcp.f32 %v4239_v4  ;;  %v9913_v26 = vpop.f32.mrb[126].mxu0  ;;  %7633 = vmatprep.mubr.msk.f32.mxu1 %vm8315_vm0, %v8312_v0 }
 0x57f   :  { %v8201_v3 = vpop.eup %8200  ;;  %v6419_v18 = vmul.f32 -1.442695, %v9910_v61  ;;  %v7542_v43 = vpop.f32.mrb[127].mxu0 }
 0x580   :  { %v8203_v63 = vpop.eup %8202  ;;  %v4240_v31 = vadd.f32 1.0, %v8201_v3 }
 0x581   :  { %8212 = vpow2.f32 %v6419_v18  ;;  %7634 = vmatmul.mubr.msk.f32.gmra.mrb[192].mxu1 %vm1704_vm7, %v8203_v63 }
 0x582   :  { %8214 = vrcp.f32 %v4240_v31  ;;  %v9919_v54 = vpop.f32.mrb[128].mxu0  ;;  %7636 = vmatprep.mubr.msk.f32.mxu1 %vm8315_vm0, %v8312_v0 }
 0x583   :  { %v8205_v60 = vpop.eup %8204  ;;  %v7545_v48 = vpop.f32.mrb[129].mxu0 }
 0x584   :  { %v8207_v57 = vpop.eup %8206  ;;  %v4241_v41 = vadd.f32 1.0, %v8205_v60 }
 0x585   :  { %7637 = vmatmul.mubr.msk.f32.gmra.mrb[194].mxu1 %vm1704_vm7, %v8207_v57 }
 0x586   :  { %8216 = vrcp.f32 %v4241_v41  ;;  %v9924_v36 = vpop.f32.mrb[130].mxu0  ;;  %7639 = vmatprep.mubr.msk.f32.mxu1 %vm8315_vm0, %v8312_v0  ;;  %v9976_v41 = vld [vmem:[%s6135_s13] ss:$0 sm:$0xff] }
 0x587   :  { %v8209_v39 = vpop.eup %8208  ;;  %v7548_v29 = vpop.f32.mrb[131].mxu0 }
 0x588   :  { %v8211_v50 = vpop.eup %8210  ;;  %v4242_v56 = vadd.f32 1.0, %v8209_v39 }
 0x589   :  { %7640 = vmatmul.mubr.msk.f32.gmra.mrb[196].mxu1 %vm1704_vm7, %v8211_v50 }
 0x58a   :  { %8218 = vrcp.f32 %v4242_v56  ;;  %v9929_v55 = vpop.f32.mrb[132].mxu0  ;;  %7642 = vmatprep.mubr.msk.f32.mxu1 %vm8315_vm0, %v8312_v0 }
 0x58b   :  { %v8213_v30 = vpop.eup %8212  ;;  %v7551_v2 = vpop.f32.mrb[133].mxu0 }
 0x58c   :  { %v8215_v46 = vpop.eup %8214  ;;  %v4243_v13 = vadd.f32 1.0, %v8213_v30 }
 0x58d   :  { %7643 = vmatmul.mubr.msk.f32.gmra.mrb[198].mxu1 %vm1704_vm7, %v8215_v46 }
 0x58e   :  { %8220 = vrcp.f32 %v4243_v13  ;;  %v9934_v16 = vpop.f32.mrb[134].mxu0  ;;  %7645 = vmatprep.mubr.msk.f32.mxu1 %vm8315_vm0, %v8312_v0 }
 0x58f   :  { %v7554_v7 = vpop.f32.mrb[135].mxu0 }
 0x590   :  { %v8217_v25 = vpop.eup %8216 }
 0x591   :  { %7646 = vmatmul.mubr.msk.f32.gmra.mrb[200].mxu1 %vm1704_vm7, %v8217_v25 }
 0x592   :  { %v9939_v14 = vpop.f32.mrb[136].mxu0  ;;  %7648 = vmatprep.mubr.msk.f32.mxu1 %vm8315_vm0, %v8312_v0 }
 0x593   :  { %v7557_v32 = vpop.f32.mrb[137].mxu0 }
 0x594   :  { %v8219_v35 = vpop.eup %8218 }
 0x595   :  { %7649 = vmatmul.mubr.msk.f32.gmra.mrb[202].mxu1 %vm1704_vm7, %v8219_v35 }
 0x596   :  { %v9944_v24 = vpop.f32.mrb[138].mxu0  ;;  %7651 = vmatprep.mubr.msk.f32.mxu1 %vm8315_vm0, %v8312_v0 }
 0x597   :  { %v7560_v23 = vpop.f32.mrb[139].mxu0 }
 0x598   :  { %v8221_v19 = vpop.eup %8220 }
 0x599   :  { %7652 = vmatmul.mubr.msk.f32.gmra.mrb[204].mxu1 %vm1704_vm7, %v8221_v19 }
 0x59a   :  { %v9949_v10 = vpop.f32.mrb[140].mxu0  ;;  %7685 = vmatprep.mubr.msk.f32.mxu1 %vm8315_vm0, %v8312_v0 }
 0x59b   :  { %v7563_v44 = vpop.f32.mrb[141].mxu0 }
 0x59e   :  { %v9953_v12 = vpop.f32.mrb[142].mxu0 }
 0x59f   :  { %v7566_v5 = vpop.f32.mrb[143].mxu0 }
 0x5a2   :  { %v9955_v49 = vpop.f32.mrb[144].mxu0 }
 0x5a3   :  { %v7600_v34 = vpop.f32.mrb[145].mxu0 }
 0x5a6   :  { %v9957_v22 = vpop.f32.mrb[146].mxu0 }
 0x5a7   :  { %v7603_v51 = vpop.f32.mrb[147].mxu0 }
 0x5aa   :  { %v9959_v59 = vpop.f32.mrb[148].mxu0 }
 0x5ab   :  { %v7606_v37 = vpop.f32.mrb[149].mxu0 }
 0x5ae   :  { %v9961_v53 = vpop.f32.mrb[150].mxu0 }
 0x5af   :  { %v7609_v45 = vpop.f32.mrb[151].mxu0 }
 0x5b2   :  { %v9963_v1 = vpop.f32.mrb[152].mxu0 }
 0x5b3   :  { %v7612_v4 = vpop.f32.mrb[153].mxu0 }
 0x5b6   :  { %v9965_v3 = vpop.f32.mrb[154].mxu0 }
 0x5b7   :  { %v7615_v18 = vpop.f32.mrb[155].mxu0 }
 0x5ba   :  { %v9967_v43 = vpop.f32.mrb[156].mxu0 }
 0x5bb   :  { %v7618_v63 = vpop.f32.mrb[157].mxu0 }
 0x5be   :  { %v9969_v31 = vpop.f32.mrb[158].mxu0 }
 0x5bf   :  { %v7621_v60 = vpop.f32.mrb[159].mxu0 }
 0x5c2   :  { %v9971_v48 = vpop.f32.mrb[160].mxu0 }
 0x5c3   :  { %v7624_v57 = vpop.f32.mrb[161].mxu0 }
 0x64c   :  { %v4361_v39 = vpop.f32.mrb[188].mxu1 }
 0x64d   :  { %v4362_v29 = vadd.f32 %v9976_v41, %v4361_v39  ;;  %v7629_v50 = vpop.f32.mrb[189].mxu1 }
 0x64f   :  { %v6430_v56 = vmul.f32 -1.442695, %v4362_v29 }
 0x650   :  { %v4366_v30 = vpop.f32.mrb[190].mxu1 }
 0x651   :  { %8222 = vpow2.f32 %v6430_v56  ;;  %v4367_v2 = vadd.f32 %v9976_v41, %v4366_v30  ;;  %v7632_v46 = vpop.f32.mrb[191].mxu1 }
 0x653   :  { %v6431_v13 = vmul.f32 -1.442695, %v4367_v2 }
 0x654   :  { %v4371_v7 = vpop.f32.mrb[192].mxu1 }
 0x655   :  { %8224 = vpow2.f32 %v6431_v13  ;;  %v4372_v25 = vadd.f32 %v9976_v41, %v4371_v7  ;;  %v7635_v32 = vpop.f32.mrb[193].mxu1 }
 0x657   :  { %v6432_v35 = vmul.f32 -1.442695, %v4372_v25 }
 0x658   :  { %v4376_v23 = vpop.f32.mrb[194].mxu1 }
 0x659   :  { %8226 = vpow2.f32 %v6432_v35  ;;  %v4377_v19 = vadd.f32 %v9976_v41, %v4376_v23  ;;  %v7638_v44 = vpop.f32.mrb[195].mxu1 }
 0x65b   :  { %v8223_v5 = vpop.eup %8222  ;;  %v6433_v34 = vmul.f32 -1.442695, %v4377_v19 }
 0x65c   :  { %v4432_v51 = vadd.f32 1.0, %v8223_v5  ;;  %v4381_v37 = vpop.f32.mrb[196].mxu1 }
 0x65d   :  { %8228 = vpow2.f32 %v6433_v34  ;;  %v4382_v45 = vadd.f32 %v9976_v41, %v4381_v37  ;;  %v7641_v4 = vpop.f32.mrb[197].mxu1 }
 0x65e   :  { %8230 = vrcp.f32 %v4432_v51 }
 0x65f   :  { %v8225_v18 = vpop.eup %8224  ;;  %v6434_v63 = vmul.f32 -1.442695, %v4382_v45 }
 0x660   :  { %v4433_v60 = vadd.f32 1.0, %v8225_v18  ;;  %v4386_v57 = vpop.f32.mrb[198].mxu1 }
 0x661   :  { %8232 = vpow2.f32 %v6434_v63  ;;  %v4387_v39 = vadd.f32 %v9976_v41, %v4386_v57  ;;  %v7644_v29 = vpop.f32.mrb[199].mxu1 }
 0x662   :  { %8234 = vrcp.f32 %v4433_v60 }
 0x663   :  { %v8227_v50 = vpop.eup %8226  ;;  %v6435_v56 = vmul.f32 -1.442695, %v4387_v39 }
 0x664   :  { %v4434_v30 = vadd.f32 1.0, %v8227_v50  ;;  %v4391_v2 = vpop.f32.mrb[200].mxu1 }
 0x665   :  { %8236 = vpow2.f32 %v6435_v56  ;;  %v4392_v46 = vadd.f32 %v9976_v41, %v4391_v2  ;;  %v7647_v13 = vpop.f32.mrb[201].mxu1 }
 0x666   :  { %8238 = vrcp.f32 %v4434_v30 }
 0x667   :  { %v8229_v7 = vpop.eup %8228  ;;  %v6436_v25 = vmul.f32 -1.442695, %v4392_v46 }
 0x668   :  { %v8231_v32 = vpop.eup %8230  ;;  %v4435_v35 = vadd.f32 1.0, %v8229_v7  ;;  %v4396_v23 = vpop.f32.mrb[202].mxu1 }
 0x669   :  { %8240 = vpow2.f32 %v6436_v25  ;;  %v4397_v19 = vadd.f32 %v9976_v41, %v4396_v23  ;;  %v7650_v44 = vpop.f32.mrb[203].mxu1  ;;  %v4459_v5 = vmul.f32 %v8231_v32, %v9913_v26  ;;  %v4468_v34 = vmul.f32 %v8231_v32, %v9831_v52 }
 0x66a   :  { %8242 = vrcp.f32 %v4435_v35  ;;  %v9989_v51 = vmul.f32 %v8231_v32, %v9955_v49 }
 0x66b   :  { %v8233_v37 = vpop.eup %8232  ;;  %v6437_v45 = vmul.f32 -1.442695, %v4397_v19  ;;  %7657 = vmatmul.mubr.msk.f32.vlgmr.msra.gmra.mrb[162].mxu0 %vm431_vm4, %v4459_v5  ;;  %7686 = vmatmul.mubr.msk.f32.vlgmr.msra.gmra.mrb[206].mxu1 %vm431_vm4, %v4468_v34  ;;  %v4490_v5 = vmax.f32 %v9884_v42, 0.0  ;;  %v4493_v42 = vmax.f32 %v9899_v15, 0.0 }
 0x66c   :  { %v8235_v4 = vpop.eup %8234  ;;  %v4436_v18 = vadd.f32 1.0, %v8233_v37  ;;  %v4401_v63 = vpop.f32.mrb[204].mxu1  ;;  %7713 = vmatpush3.msk.msra.mxu0 %vm459_vm3, %v9852_v6  ;;  %7659 = vmatprep.mubr.msk.f32.mxu0 %vm8315_vm0, %v8312_v0 }
 0x66d   :  { %8244 = vpow2.f32 %v6437_v45  ;;  %v4402_v52 = vadd.f32 %v9976_v41, %v4401_v63  ;;  %v7653_v26 = vpop.f32.mrb[205].mxu1  ;;  %7688 = vmatprep.mubr.msk.f32.mxu1 %vm8315_vm0, %v8312_v0  ;;  %v4460_v49 = vmul.f32 %v8235_v4, %v9919_v54  ;;  %v4469_v60 = vmul.f32 %v8235_v4, %v9833_v40  ;;  %7770 = vmatprep.subr.mxu0 %v8312_v0 }
 0x66e   :  { %8246 = vrcp.f32 %v4436_v18  ;;  %v10004_v57 = vmul.f32 %v8235_v4, %v9957_v22 }
 0x66f   :  { %v8237_v6 = vpop.eup %8236  ;;  %v6438_v39 = vmul.f32 -1.442695, %v4402_v52  ;;  %7660 = vmatmul.mubr.msk.f32.gmra.mrb[164].mxu0 %vm431_vm4, %v4460_v49  ;;  %7689 = vmatmul.mubr.msk.f32.gmra.mrb[208].mxu1 %vm431_vm4, %v4469_v60 }
 0x670   :  { %v8239_v41 = vpop.eup %8238  ;;  %v4437_v29 = vadd.f32 1.0, %v8237_v6  ;;  %7662 = vmatprep.mubr.msk.f32.mxu0 %vm8315_vm0, %v8312_v0  ;;  %7691 = vmatprep.mubr.msk.f32.mxu1 %vm8315_vm0, %v8312_v0 }
 0x671   :  { %8248 = vpow2.f32 %v6438_v39  ;;  %v4461_v40 = vmul.f32 %v8239_v41, %v9924_v36  ;;  %v4470_v54 = vmul.f32 %v8239_v41, %v9835_v17  ;;  %v10015_v22 = vmul.f32 %v8239_v41, %v9959_v59 }
 0x672   :  { %8250 = vrcp.f32 %v4437_v29 }
 0x673   :  { %v8241_v50 = vpop.eup %8240  ;;  %7663 = vmatmul.mubr.msk.f32.gmra.mrb[166].mxu0 %vm431_vm4, %v4461_v40  ;;  %7692 = vmatmul.mubr.msk.f32.gmra.mrb[210].mxu1 %vm431_vm4, %v4470_v54 }
 0x674   :  { %v8243_v56 = vpop.eup %8242  ;;  %v4438_v30 = vadd.f32 1.0, %v8241_v50  ;;  %7665 = vmatprep.mubr.msk.f32.mxu0 %vm8315_vm0, %v8312_v0  ;;  %7694 = vmatprep.mubr.msk.f32.mxu1 %vm8315_vm0, %v8312_v0 }
 0x675   :  { %v4462_v36 = vmul.f32 %v8243_v56, %v9929_v55  ;;  %v4471_v17 = vmul.f32 %v8243_v56, %v9837_v9  ;;  %v10026_v59 = vmul.f32 %v8243_v56, %v9961_v53 }
 0x676   :  { %8252 = vrcp.f32 %v4438_v30 }
 0x677   :  { %v8245_v2 = vpop.eup %8244  ;;  %7666 = vmatmul.mubr.msk.f32.gmra.mrb[168].mxu0 %vm431_vm4, %v4462_v36  ;;  %7695 = vmatmul.mubr.msk.f32.gmra.mrb[212].mxu1 %vm431_vm4, %v4471_v17 }
 0x678   :  { %v8247_v46 = vpop.eup %8246  ;;  %v4439_v13 = vadd.f32 1.0, %v8245_v2  ;;  %7668 = vmatprep.mubr.msk.f32.mxu0 %vm8315_vm0, %v8312_v0  ;;  %7697 = vmatprep.mubr.msk.f32.mxu1 %vm8315_vm0, %v8312_v0 }
 0x679   :  { %v4463_v55 = vmul.f32 %v8247_v46, %v9934_v16  ;;  %v4472_v9 = vmul.f32 %v8247_v46, %v9839_v27  ;;  %v4481_v53 = vmul.f32 %v8247_v46, %v9963_v1 }
 0x67a   :  { %8254 = vrcp.f32 %v4439_v13 }
 0x67b   :  { %v8249_v7 = vpop.eup %8248  ;;  %7669 = vmatmul.mubr.msk.f32.gmra.mrb[170].mxu0 %vm431_vm4, %v4463_v55  ;;  %7698 = vmatmul.mubr.msk.f32.gmra.mrb[214].mxu1 %vm431_vm4, %v4472_v9 }
 0x67c   :  { %v8251_v25 = vpop.eup %8250  ;;  %v4440_v32 = vadd.f32 1.0, %v8249_v7  ;;  %7671 = vmatprep.mubr.msk.f32.mxu0 %vm8315_vm0, %v8312_v0  ;;  %7700 = vmatprep.mubr.msk.f32.mxu1 %vm8315_vm0, %v8312_v0 }
 0x67d   :  { %v4464_v16 = vmul.f32 %v8251_v25, %v9939_v14  ;;  %v4473_v27 = vmul.f32 %v8251_v25, %v9841_v38  ;;  %v4482_v1 = vmul.f32 %v8251_v25, %v9965_v3 }
 0x67e   :  { %8256 = vrcp.f32 %v4440_v32 }
 0x67f   :  { %7672 = vmatmul.mubr.msk.f32.gmra.mrb[172].mxu0 %vm431_vm4, %v4464_v16  ;;  %7701 = vmatmul.mubr.msk.f32.gmra.mrb[216].mxu1 %vm431_vm4, %v4473_v27 }
 0x680   :  { %v8253_v35 = vpop.eup %8252  ;;  %7674 = vmatprep.mubr.msk.f32.mxu0 %vm8315_vm0, %v8312_v0  ;;  %7703 = vmatprep.mubr.msk.f32.mxu1 %vm8315_vm0, %v8312_v0 }
 0x681   :  { %v4465_v23 = vmul.f32 %v8253_v35, %v9944_v24  ;;  %v4474_v14 = vmul.f32 %v8253_v35, %v9843_v8  ;;  %v4483_v38 = vmul.f32 %v8253_v35, %v9967_v43 }
 0x683   :  { %7675 = vmatmul.mubr.msk.f32.gmra.mrb[174].mxu0 %vm431_vm4, %v4465_v23  ;;  %7704 = vmatmul.mubr.msk.f32.gmra.mrb[218].mxu1 %vm431_vm4, %v4474_v14 }
 0x684   :  { %v8255_v3 = vpop.eup %8254  ;;  %7677 = vmatprep.mubr.msk.f32.mxu0 %vm8315_vm0, %v8312_v0  ;;  %7706 = vmatprep.mubr.msk.f32.mxu1 %vm8315_vm0, %v8312_v0 }
 0x685   :  { %v4466_v19 = vmul.f32 %v8255_v3, %v9949_v10  ;;  %v4475_v44 = vmul.f32 %v8255_v3, %v9845_v21  ;;  %v4484_v24 = vmul.f32 %v8255_v3, %v9969_v31  ;;  %v175_v31 = vld [vmem:[%s6137_s18] sm:$0xff] }
 0x687   :  { %7678 = vmatmul.mubr.msk.f32.gmra.mrb[176].mxu0 %vm431_vm4, %v4466_v19  ;;  %7707 = vmatmul.mubr.msk.f32.gmra.mrb[220].mxu1 %vm431_vm4, %v4475_v44 }
 0x688   :  { %v8257_v8 = vpop.eup %8256  ;;  %7680 = vmatprep.mubr.msk.f32.mxu0 %vm8315_vm0, %v8312_v0  ;;  %7709 = vmatprep.mubr.msk.f32.mxu1 %vm8315_vm0, %v8312_v0 }
 0x689   :  { %v4467_v21 = vmul.f32 %v8257_v8, %v9953_v12  ;;  %v4476_v10 = vmul.f32 %v8257_v8, %v9847_v11  ;;  %v4485_v43 = vmul.f32 %v8257_v8, %v9971_v48  ;;  %v4486_v11 = vmax.f32 %v9864_v47, 0.0 }
 0x68a   :  { %v4487_v12 = vmax.f32 %v9869_v28, 0.0  ;;  %v4488_v48 = vmax.f32 %v9874_v62, 0.0  ;;  %v4489_v47 = vmax.f32 %v9879_v20, 0.0  ;;  %v10130_v28 = vld [vmem:[%s6140_s22] sm:$0xf]  ;;  %v4491_v62 = vmax.f32 %v9889_v33, 0.0 }
 0x68b   :  { %7681 = vmatmul.mubr.msk.f32.gmra.mrb[178].mxu0 %vm431_vm4, %v4467_v21  ;;  %7710 = vmatmul.mubr.msk.f32.gmra.mrb[222].mxu1 %vm431_vm4, %v4476_v10  ;;  %v4492_v20 = vmax.f32 %v9894_v58, 0.0  ;;  %v4494_v33 = vmax.f32 %v9910_v61, 0.0  ;;  %v176_v58 = vld [vmem:[%s6138_s26] sm:$0xf] }
 0x68c   :  { %7714 = vmatprep.mubr.msk.f32.mxu0 %vm8315_vm0, %v8312_v0  ;;  %7743 = vmatprep.mubr.msk.f32.mxu1 %vm8315_vm0, %v8312_v0 }
 0x68d   :  { %7742 = vmatpush3.msk.msra.mxu1 %vm459_vm3, %v176_v58 }
 0x68e   :  { %7799 = vmatprep.subr.mxu1 %v8312_v0 }
 0x68f   :  { %7715 = vmatmul.mubr.msk.f32.vlgmr.msra.gmra.mrb[180].mxu0 %vm431_vm4, %v9989_v51 }
 0x690   :  { %7717 = vmatprep.mubr.msk.f32.mxu0 %vm8315_vm0, %v8312_v0  ;;  %7771 = vmatpush3.msra.mxu0 %v175_v31 }
 0x691   :  { %7828 = vmatprep.subr.mxu0 %v8312_v0 }
 0x693   :  { %7718 = vmatmul.mubr.msk.f32.gmra.mrb[182].mxu0 %vm431_vm4, %v10004_v57 }
 0x694   :  { %7720 = vmatprep.mubr.msk.f32.mxu0 %vm8315_vm0, %v8312_v0 }
 0x697   :  { %7721 = vmatmul.mubr.msk.f32.gmra.mrb[184].mxu0 %vm431_vm4, %v10015_v22 }
 0x698   :  { %7723 = vmatprep.mubr.msk.f32.mxu0 %vm8315_vm0, %v8312_v0 }
 0x69b   :  { %7724 = vmatmul.mubr.msk.f32.gmra.mrb[186].mxu0 %vm431_vm4, %v10026_v59 }
 0x69c   :  { %7726 = vmatprep.mubr.msk.f32.mxu0 %vm8315_vm0, %v8312_v0 }
 0x69f   :  { %7727 = vmatmul.mubr.msk.f32.gmra.mrb[188].mxu0 %vm431_vm4, %v4481_v53 }
 0x6a0   :  { %7729 = vmatprep.mubr.msk.f32.mxu0 %vm8315_vm0, %v8312_v0 }
 0x6a3   :  { %7730 = vmatmul.mubr.msk.f32.gmra.mrb[190].mxu0 %vm431_vm4, %v4482_v1 }
 0x6a4   :  { %7732 = vmatprep.mubr.msk.f32.mxu0 %vm8315_vm0, %v8312_v0 }
 0x6a7   :  { %7733 = vmatmul.mubr.msk.f32.gmra.mrb[192].mxu0 %vm431_vm4, %v4483_v38 }
 0x6a8   :  { %7735 = vmatprep.mubr.msk.f32.mxu0 %vm8315_vm0, %v8312_v0 }
 0x6ab   :  { %7736 = vmatmul.mubr.msk.f32.gmra.mrb[194].mxu0 %vm431_vm4, %v4484_v24 }
 0x6ac   :  { %7738 = vmatprep.mubr.msk.f32.mxu0 %vm8315_vm0, %v8312_v0 }
 0x6af   :  { %7739 = vmatmul.mubr.msk.f32.gmra.mrb[196].mxu0 %vm431_vm4, %v4485_v43 }
 0x6b0   :  { %7772 = vmatprep.mubr.msk.f32.mxu0 %vm8315_vm0, %v8312_v0 }
 0x6b3   :  { %7773 = vmatmul.mubr.msk.f32.vlgmr.msra.gmra.mrb[198].mxu0 %vm1704_vm7, %v4486_v11 }
 0x6b4   :  { %7775 = vmatprep.mubr.msk.f32.mxu0 %vm8315_vm0, %v8312_v0  ;;  %7829 = vmatpush3.msk.msra.mxu0 %vm459_vm3, %v10130_v28 }
 0x6b5   :  { %7886 = vmatprep.subr.mxu0 %v8312_v0 }
 0x6b7   :  { %7776 = vmatmul.mubr.msk.f32.gmra.mrb[200].mxu0 %vm1704_vm7, %v4487_v12 }
 0x6b8   :  { %7778 = vmatprep.mubr.msk.f32.mxu0 %vm8315_vm0, %v8312_v0 }
 0x6bb   :  { %7779 = vmatmul.mubr.msk.f32.gmra.mrb[202].mxu0 %vm1704_vm7, %v4488_v48 }
 0x6bc   :  { %7781 = vmatprep.mubr.msk.f32.mxu0 %vm8315_vm0, %v8312_v0 }
 0x6bf   :  { %7782 = vmatmul.mubr.msk.f32.gmra.mrb[204].mxu0 %vm1704_vm7, %v4489_v47 }
 0x6c0   :  { %7784 = vmatprep.mubr.msk.f32.mxu0 %vm8315_vm0, %v8312_v0 }
 0x6c3   :  { %7785 = vmatmul.mubr.msk.f32.gmra.mrb[206].mxu0 %vm1704_vm7, %v4490_v5 }
 0x6c4   :  { %7787 = vmatprep.mubr.msk.f32.mxu0 %vm8315_vm0, %v8312_v0 }
 0x6c7   :  { %7788 = vmatmul.mubr.msk.f32.gmra.mrb[208].mxu0 %vm1704_vm7, %v4491_v62 }
 0x6c8   :  { %7790 = vmatprep.mubr.msk.f32.mxu0 %vm8315_vm0, %v8312_v0 }
 0x6cb   :  { %7791 = vmatmul.mubr.msk.f32.gmra.mrb[210].mxu0 %vm1704_vm7, %v4492_v20 }
 0x6cc   :  { %7793 = vmatprep.mubr.msk.f32.mxu0 %vm8315_vm0, %v8312_v0 }
 0x6cf   :  { %7794 = vmatmul.mubr.msk.f32.gmra.mrb[212].mxu0 %vm1704_vm7, %v4493_v42 }
 0x6d0   :  { %7796 = vmatprep.mubr.msk.f32.mxu0 %vm8315_vm0, %v8312_v0 }
 0x6d3   :  { %7797 = vmatmul.mubr.msk.f32.gmra.mrb[214].mxu0 %vm1704_vm7, %v4494_v33 }
 0x6d4   :  { %7830 = vmatprep.mubr.msk.f32.mxu0 %vm8315_vm0, %v8312_v0 }
 0x73e   :  { %v10163_v15 = vpop.f32.mrb[162].mxu0  ;;  %v4728_v34 = vpop.f32.mrb[206].mxu1 }
 0x73f   :  { %v4909_v61 = vmul.f32 %v10163_v15, %v10163_v15  ;;  %v4918_v51 = vmul.f32 %v4728_v34, %v4728_v34  ;;  %v7658_v37 = vpop.f32.mrb[163].mxu0  ;;  %v7687_v45 = vpop.f32.mrb[207].mxu1  ;;  %7831 = vmatmul.mubr.msk.f32.vlgmr.msra.gmra.mrb[216].mxu0 %vm431_vm4, %v4728_v34 }
 0x740   :  { %7833 = vmatprep.mubr.msk.f32.mxu0 %vm8315_vm0, %v8312_v0 }
 0x741   :  { %v10170_v4 = vadd.f32 %v4918_v51, %v4909_v61 }
 0x742   :  { %v10172_v18 = vpop.f32.mrb[164].mxu0  ;;  %v4733_v63 = vpop.f32.mrb[208].mxu1 }
 0x743   :  { %v4910_v52 = vmul.f32 %v10172_v18, %v10172_v18  ;;  %v4919_v26 = vmul.f32 %v4733_v63, %v4733_v63  ;;  %v7661_v49 = vpop.f32.mrb[165].mxu0  ;;  %v7690_v60 = vpop.f32.mrb[209].mxu1  ;;  %7834 = vmatmul.mubr.msk.f32.gmra.mrb[218].mxu0 %vm431_vm4, %v4733_v63 }
 0x744   :  { %7836 = vmatprep.mubr.msk.f32.mxu0 %vm8315_vm0, %v8312_v0 }
 0x745   :  { %v10179_v57 = vadd.f32 %v4919_v26, %v4910_v52 }
 0x746   :  { %v10181_v6 = vpop.f32.mrb[166].mxu0  ;;  %v4738_v39 = vpop.f32.mrb[210].mxu1 }
 0x747   :  { %v4911_v41 = vmul.f32 %v10181_v6, %v10181_v6  ;;  %v4920_v29 = vmul.f32 %v4738_v39, %v4738_v39  ;;  %v7664_v40 = vpop.f32.mrb[167].mxu0  ;;  %v7693_v54 = vpop.f32.mrb[211].mxu1  ;;  %7837 = vmatmul.mubr.msk.f32.gmra.mrb[220].mxu0 %vm431_vm4, %v4738_v39 }
 0x748   :  { %7839 = vmatprep.mubr.msk.f32.mxu0 %vm8315_vm0, %v8312_v0 }
 0x749   :  { %v10188_v22 = vadd.f32 %v4920_v29, %v4911_v41 }
 0x74a   :  { %v10190_v50 = vpop.f32.mrb[168].mxu0  ;;  %v4743_v56 = vpop.f32.mrb[212].mxu1 }
 0x74b   :  { %v4912_v30 = vmul.f32 %v10190_v50, %v10190_v50  ;;  %v4921_v36 = vmul.f32 %v4743_v56, %v4743_v56  ;;  %v7667_v17 = vpop.f32.mrb[169].mxu0  ;;  %v7696_v59 = vpop.f32.mrb[213].mxu1  ;;  %7840 = vmatmul.mubr.msk.f32.gmra.mrb[222].mxu0 %vm431_vm4, %v4743_v56 }
 0x74c   :  { %7842 = vmatprep.mubr.msk.f32.mxu0 %vm8315_vm0, %v8312_v0 }
 0x74d   :  { %v10197_v2 = vadd.f32 %v4921_v36, %v4912_v30 }
 0x74e   :  { %v10199_v46 = vpop.f32.mrb[170].mxu0  ;;  %v4748_v13 = vpop.f32.mrb[214].mxu1 }
 0x74f   :  { %v4913_v55 = vmul.f32 %v10199_v46, %v10199_v46  ;;  %v4922_v9 = vmul.f32 %v4748_v13, %v4748_v13  ;;  %v7670_v53 = vpop.f32.mrb[171].mxu0  ;;  %v7699_v7 = vpop.f32.mrb[215].mxu1  ;;  %7843 = vmatmul.mubr.msk.f32.gmra.mrb[224].mxu0 %vm431_vm4, %v4748_v13 }
 0x750   :  { %7845 = vmatprep.mubr.msk.f32.mxu0 %vm8315_vm0, %v8312_v0 }
 0x751   :  { %v10206_v25 = vadd.f32 %v4922_v9, %v4913_v55 }
 0x752   :  { %v10208_v32 = vpop.f32.mrb[172].mxu0  ;;  %v4753_v16 = vpop.f32.mrb[216].mxu1 }
 0x753   :  { %v4914_v27 = vmul.f32 %v10208_v32, %v10208_v32  ;;  %v4923_v1 = vmul.f32 %v4753_v16, %v4753_v16  ;;  %v7673_v35 = vpop.f32.mrb[173].mxu0  ;;  %v7702_v23 = vpop.f32.mrb[217].mxu1  ;;  %7846 = vmatmul.mubr.msk.f32.gmra.mrb[226].mxu0 %vm431_vm4, %v4753_v16 }
 0x754   :  { %7848 = vmatprep.mubr.msk.f32.mxu0 %vm8315_vm0, %v8312_v0 }
 0x755   :  { %v10215_v14 = vadd.f32 %v4923_v1, %v4914_v27 }
 0x756   :  { %v10217_v38 = vpop.f32.mrb[174].mxu0  ;;  %v4758_v3 = vpop.f32.mrb[218].mxu1 }
 0x757   :  { %v4915_v19 = vmul.f32 %v10217_v38, %v10217_v38  ;;  %v4924_v44 = vmul.f32 %v4758_v3, %v4758_v3  ;;  %v7676_v24 = vpop.f32.mrb[175].mxu0  ;;  %v7705_v8 = vpop.f32.mrb[219].mxu1  ;;  %7849 = vmatmul.mubr.msk.f32.gmra.mrb[228].mxu0 %vm431_vm4, %v4758_v3 }
 0x758   :  { %7851 = vmatprep.mubr.msk.f32.mxu0 %vm8315_vm0, %v8312_v0 }
 0x759   :  { %v10224_v21 = vadd.f32 %v4924_v44, %v4915_v19 }
 0x75a   :  { %v10226_v10 = vpop.f32.mrb[176].mxu0  ;;  %v4763_v43 = vpop.f32.mrb[220].mxu1 }
 0x75b   :  { %v4916_v31 = vmul.f32 %v10226_v10, %v10226_v10  ;;  %v4925_v11 = vmul.f32 %v4763_v43, %v4763_v43  ;;  %v7679_v12 = vpop.f32.mrb[177].mxu0  ;;  %v7708_v48 = vpop.f32.mrb[221].mxu1  ;;  %7852 = vmatmul.mubr.msk.f32.gmra.mrb[230].mxu0 %vm431_vm4, %v4763_v43 }
 0x75c   :  { %7854 = vmatprep.mubr.msk.f32.mxu0 %vm8315_vm0, %v8312_v0 }
 0x75d   :  { %v10233_v47 = vadd.f32 %v4925_v11, %v4916_v31 }
 0x75e   :  { %v10235_v5 = vpop.f32.mrb[178].mxu0  ;;  %v4768_v62 = vpop.f32.mrb[222].mxu1 }
 0x75f   :  { %v4917_v20 = vmul.f32 %v10235_v5, %v10235_v5  ;;  %v4926_v42 = vmul.f32 %v4768_v62, %v4768_v62  ;;  %v7682_v33 = vpop.f32.mrb[179].mxu0  ;;  %v7711_v58 = vpop.f32.mrb[223].mxu1  ;;  %7855 = vmatmul.mubr.msk.f32.gmra.mrb[232].mxu0 %vm431_vm4, %v4768_v62 }
 0x760   :  { %7888 = vmatprep.mubr.msk.f32.mxu0 %vm8315_vm0, %v8312_v0 }
 0x761   :  { %v10242_v34 = vadd.f32 %v4926_v42, %v4917_v20 }
 0x762   :  { %v10244_v61 = vpop.f32.mrb[180].mxu0 }
 0x763   :  { %v4936_v51 = vmul.f32 %v10244_v61, %v10244_v61  ;;  %v7716_v37 = vpop.f32.mrb[181].mxu0 }
 0x765   :  { %v4945_v45 = vadd.f32 %v4936_v51, %v10170_v4 }
 0x766   :  { %v10249_v63 = vpop.f32.mrb[182].mxu0 }
 0x767   :  { %v4954_v52 = vmax.f32 %v4945_v45, 1e-08  ;;  %v4937_v26 = vmul.f32 %v10249_v63, %v10249_v63  ;;  %v7719_v49 = vpop.f32.mrb[183].mxu0 }
 0x769   :  { %8258 = vrsqrt.f32 %v4954_v52  ;;  %v4946_v60 = vadd.f32 %v4937_v26, %v10179_v57  ;;  %vm4965_vm12 = vcmp.eq.f32.partialorder %v4954_v52, inf  ;;  %v4968_v7 = vand.u32 2147483648, %v4954_v52 }
 0x76a   :  { %v10254_v39 = vpop.f32.mrb[184].mxu0  ;;  %vm4967_vm13 = vcmp.eq.f32.partialorder %v4954_v52, 0.0 }
 0x76b   :  { %v4955_v41 = vmax.f32 %v4946_v60, 1e-08  ;;  %v4938_v29 = vmul.f32 %v10254_v39, %v10254_v39  ;;  %v7722_v40 = vpop.f32.mrb[185].mxu0 }
 0x76d   :  { %v4947_v54 = vadd.f32 %v4938_v29, %v10188_v22  ;;  %8260 = vrsqrt.f32 %v4955_v41  ;;  %vm4972_vm14 = vcmp.eq.f32.partialorder %v4955_v41, inf  ;;  %v4975_v44 = vand.u32 2147483648, %v4955_v41 }
 0x76e   :  { %v10259_v4 = vpop.f32.mrb[186].mxu0  ;;  %vm4974_vm15 = vcmp.eq.f32.partialorder %v4955_v41, 0.0 }
 0x76f   :  { %v4956_v56 = vmax.f32 %v4947_v54, 1e-08  ;;  %v4939_v30 = vmul.f32 %v10259_v4, %v10259_v4  ;;  %v7725_v36 = vpop.f32.mrb[187].mxu0 }
 0x771   :  { %v4948_v17 = vadd.f32 %v4939_v30, %v10197_v2  ;;  %8262 = vrsqrt.f32 %v4956_v56  ;;  %vm4979_vm1 = vcmp.eq.f32.partialorder %v4956_v56, inf  ;;  %v4982_v20 = vand.u32 2147483648, %v4956_v56 }
 0x772   :  { %v10264_v57 = vpop.f32.mrb[188].mxu0  ;;  %vm4981_vm2 = vcmp.eq.f32.partialorder %v4956_v56, 0.0 }
 0x773   :  { %v8259_v59 = vpop.eup %8258  ;;  %v10266_v13 = vmax.f32 %v4948_v17, 1e-08  ;;  %v4940_v55 = vmul.f32 %v10264_v57, %v10264_v57  ;;  %v7728_v22 = vpop.f32.mrb[189].mxu0 }
 0x774   :  { %v4964_v9 = vmul.f32 %v8259_v59, %v4954_v52 }
 0x775   :  { %v4949_v53 = vadd.f32 %v4940_v55, %v10206_v25  ;;  %8264 = vrsqrt.f32 %v10266_v13  ;;  %vm4986_vm10 = vcmp.eq.f32.partialorder %v10266_v13, inf  ;;  %v4989_v49 = vand.u32 2147483648, %v10266_v13 }
 0x776   :  { %v10272_v16 = vpop.f32.mrb[190].mxu0  ;;  %v4966_v2 = vsel %vm4965_vm12, %v4954_v52, %v4964_v9  ;;  %vm4988_vm5 = vcmp.eq.f32.partialorder %v10266_v13, 0.0 }
 0x777   :  { %v8261_v27 = vpop.eup %8260  ;;  %v10274_v1 = vmax.f32 %v4949_v53, 1e-08  ;;  %v4941_v35 = vmul.f32 %v10272_v16, %v10272_v16  ;;  %v7731_v23 = vpop.f32.mrb[191].mxu0  ;;  %v4969_v3 = vsel %vm4967_vm13, %v4968_v7, %v4966_v2 }
 0x778   :  { %7744 = vmatmul.mubr.msk.f32.vlgmr.msra.gmra.mrb[224].mxu1 %vm431_vm4, %v4969_v3  ;;  %v4971_v19 = vmul.f32 %v8261_v27, %v4955_v41 }
 0x779   :  { %v4950_v25 = vadd.f32 %v4941_v35, %v10215_v14  ;;  %7746 = vmatprep.mubr.msk.f32.mxu1 %vm8315_vm0, %v8312_v0  ;;  %8266 = vrsqrt.f32 %v10274_v1  ;;  %7800 = vmatpush3.msk.msra.mxu1 %vm459_vm3, %v10130_v28  ;;  %vm4993_vm6 = vcmp.eq.f32.partialorder %v10274_v1, inf  ;;  %v4996_v17 = vand.u32 2147483648, %v10274_v1 }
 0x77a   :  { %v10285_v24 = vpop.f32.mrb[192].mxu0  ;;  %v4973_v8 = vsel %vm4972_vm14, %v4955_v41, %v4971_v19  ;;  %7857 = vmatprep.subr.mxu1 %v8312_v0  ;;  %vm4995_vm8 = vcmp.eq.f32.partialorder %v10274_v1, 0.0 }
 0x77b   :  { %v8263_v43 = vpop.eup %8262  ;;  %v4959_v31 = vmax.f32 %v4950_v25, 1e-08  ;;  %v4942_v14 = vmul.f32 %v10285_v24, %v10285_v24  ;;  %v7734_v11 = vpop.f32.mrb[193].mxu0  ;;  %v4976_v12 = vsel %vm4974_vm15, %v4975_v44, %v4973_v8 }
 0x77c   :  { %7747 = vmatmul.mubr.msk.f32.gmra.mrb[226].mxu1 %vm431_vm4, %v4976_v12  ;;  %v4978_v48 = vmul.f32 %v8263_v43, %v4956_v56 }
 0x77d   :  { %v4951_v62 = vadd.f32 %v4942_v14, %v10224_v21  ;;  %7749 = vmatprep.mubr.msk.f32.mxu1 %vm8315_vm0, %v8312_v0  ;;  %8268 = vrsqrt.f32 %v4959_v31  ;;  %vm5000_vm9 = vcmp.eq.f32.partialorder %v4959_v31, inf  ;;  %v5003_v7 = vand.u32 2147483648, %v4959_v31 }
 0x77e   :  { %v10294_v42 = vpop.f32.mrb[194].mxu0  ;;  %v4980_v33 = vsel %vm4979_vm1, %v4956_v56, %v4978_v48  ;;  %vm5002_vm11 = vcmp.eq.f32.partialorder %v4959_v31, 0.0 }
 0x77f   :  { %v8265_v58 = vpop.eup %8264  ;;  %v4960_v51 = vmax.f32 %v4951_v62, 1e-08  ;;  %v4943_v37 = vmul.f32 %v10294_v42, %v10294_v42  ;;  %v7737_v45 = vpop.f32.mrb[195].mxu0  ;;  %v4983_v52 = vsel %vm4981_vm2, %v4982_v20, %v4980_v33 }
 0x780   :  { %7750 = vmatmul.mubr.msk.f32.gmra.mrb[228].mxu1 %vm431_vm4, %v4983_v52  ;;  %v4985_v21 = vmul.f32 %v8265_v58, %v10266_v13 }
 0x781   :  { %v4952_v26 = vadd.f32 %v4943_v37, %v10233_v47  ;;  %7752 = vmatprep.mubr.msk.f32.mxu1 %vm8315_vm0, %v8312_v0  ;;  %8270 = vrsqrt.f32 %v4960_v51  ;;  %vm5007_vm12 = vcmp.eq.f32.partialorder %v4960_v51, inf  ;;  %v5010_v19 = vand.u32 2147483648, %v4960_v51 }
 0x782   :  { %v10305_v60 = vpop.f32.mrb[196].mxu0  ;;  %v4987_v41 = vsel %vm4986_vm10, %v10266_v13, %v4985_v21  ;;  %vm5009_vm13 = vcmp.eq.f32.partialorder %v4960_v51, 0.0 }
 0x783   :  { %v8267_v29 = vpop.eup %8266  ;;  %v4961_v40 = vmax.f32 %v4952_v26, 1e-08  ;;  %v4944_v54 = vmul.f32 %v10305_v60, %v10305_v60  ;;  %v7740_v47 = vpop.f32.mrb[197].mxu0  ;;  %v4990_v56 = vsel %vm4988_vm5, %v4989_v49, %v4987_v41 }
 0x784   :  { %7753 = vmatmul.mubr.msk.f32.gmra.mrb[230].mxu1 %vm431_vm4, %v4990_v56  ;;  %v4992_v30 = vmul.f32 %v8267_v29, %v10274_v1 }
 0x785   :  { %v4953_v36 = vadd.f32 %v4944_v54, %v10242_v34  ;;  %7755 = vmatprep.mubr.msk.f32.mxu1 %vm8315_vm0, %v8312_v0  ;;  %8272 = vrsqrt.f32 %v4961_v40  ;;  %vm5014_vm14 = vcmp.eq.f32.partialorder %v4961_v40, inf  ;;  %v5017_v11 = vand.u32 2147483648, %v4961_v40 }
 0x786   :  { %v10318_v59 = vpop.f32.mrb[198].mxu0  ;;  %v4994_v13 = vsel %vm4993_vm6, %v10274_v1, %v4992_v30  ;;  %vm5016_vm15 = vcmp.eq.f32.partialorder %v4961_v40, 0.0  ;;  %v6488_v30 = vld [vmem:[%s6139_s4] ss:$0 sm:$0xff] }
 0x787   :  { %v8269_v55 = vpop.eup %8268  ;;  %v4962_v22 = vmax.f32 %v4953_v36, 1e-08  ;;  %v7774_v9 = vpop.f32.mrb[199].mxu0  ;;  %v4997_v53 = vsel %vm4995_vm8, %v4996_v17, %v4994_v13 }
 0x788   :  { %7756 = vmatmul.mubr.msk.f32.gmra.mrb[232].mxu1 %vm431_vm4, %v4997_v53  ;;  %v4999_v34 = vmul.f32 %v8269_v55, %v4959_v31 }
 0x789   :  { %7758 = vmatprep.mubr.msk.f32.mxu1 %vm8315_vm0, %v8312_v0  ;;  %8274 = vrsqrt.f32 %v4962_v22  ;;  %vm5021_vm1 = vcmp.eq.f32.partialorder %v4962_v22, inf  ;;  %vm5023_vm2 = vcmp.eq.f32.partialorder %v4962_v22, 0.0 }
 0x78a   :  { %v10325_v2 = vpop.f32.mrb[200].mxu0  ;;  %v5001_v27 = vsel %vm5000_vm9, %v4959_v31, %v4999_v34 }
 0x78b   :  { %v8271_v35 = vpop.eup %8270  ;;  %v7777_v23 = vpop.f32.mrb[201].mxu0  ;;  %v5004_v1 = vsel %vm5002_vm11, %v5003_v7, %v5001_v27 }
 0x78c   :  { %7759 = vmatmul.mubr.msk.f32.gmra.mrb[234].mxu1 %vm431_vm4, %v5004_v1  ;;  %v5006_v3 = vmul.f32 %v8271_v35, %v4960_v51 }
 0x78d   :  { %7761 = vmatprep.mubr.msk.f32.mxu1 %vm8315_vm0, %v8312_v0 }
 0x78e   :  { %v10330_v25 = vpop.f32.mrb[202].mxu0  ;;  %v5008_v44 = vsel %vm5007_vm12, %v4960_v51, %v5006_v3  ;;  %v5024_v51 = vand.u32 2147483648, %v4962_v22 }
 0x78f   :  { %v8273_v8 = vpop.eup %8272  ;;  %v7780_v43 = vpop.f32.mrb[203].mxu0  ;;  %v5011_v14 = vsel %vm5009_vm13, %v5010_v19, %v5008_v44 }
 0x790   :  { %7762 = vmatmul.mubr.msk.f32.gmra.mrb[236].mxu1 %vm431_vm4, %v5011_v14  ;;  %v5013_v31 = vmul.f32 %v8273_v8, %v4961_v40 }
 0x791   :  { %7764 = vmatprep.mubr.msk.f32.mxu1 %vm8315_vm0, %v8312_v0 }
 0x792   :  { %v10335_v12 = vpop.f32.mrb[204].mxu0  ;;  %v5015_v48 = vsel %vm5014_vm14, %v4961_v40, %v5013_v31 }
 0x793   :  { %v8275_v62 = vpop.eup %8274  ;;  %v7783_v20 = vpop.f32.mrb[205].mxu0  ;;  %v5018_v33 = vsel %vm5016_vm15, %v5017_v11, %v5015_v48 }
 0x794   :  { %7765 = vmatmul.mubr.msk.f32.gmra.mrb[238].mxu1 %vm431_vm4, %v5018_v33  ;;  %v5020_v58 = vmul.f32 %v8275_v62, %v4962_v22 }
 0x795   :  { %7767 = vmatprep.mubr.msk.f32.mxu1 %vm8315_vm0, %v8312_v0 }
 0x796   :  { %v10340_v37 = vpop.f32.mrb[206].mxu0  ;;  %v5022_v45 = vsel %vm5021_vm1, %v4962_v22, %v5020_v58 }
 0x797   :  { %v7786_v52 = vpop.f32.mrb[207].mxu0  ;;  %v5025_v21 = vsel %vm5023_vm2, %v5024_v51, %v5022_v45 }
 0x798   :  { %7768 = vmatmul.mubr.msk.f32.gmra.mrb[240].mxu1 %vm431_vm4, %v5025_v21 }
 0x799   :  { %7801 = vmatprep.mubr.msk.f32.mxu1 %vm8315_vm0, %v8312_v0 }
 0x79a   :  { %v10345_v26 = vpop.f32.mrb[208].mxu0 }
 0x79b   :  { %v7789_v49 = vpop.f32.mrb[209].mxu0 }
 0x79c   :  { %7802 = vmatmul.mubr.msk.f32.vlgmr.msra.gmra.mrb[242].mxu1 %vm431_vm4, %v10163_v15 }
 0x79d   :  { %7804 = vmatprep.mubr.msk.f32.mxu1 %vm8315_vm0, %v8312_v0  ;;  %7858 = vmatpush3.msk.msra.mxu1 %vm459_vm3, %v10130_v28  ;;  %vm6047_vm3 = vcmask 130144  }
 0x79e   :  { %v10353_v41 = vpop.f32.mrb[210].mxu0 }
 0x79f   :  { %v7792_v29 = vpop.f32.mrb[211].mxu0 }
 0x7a0   :  { %7805 = vmatmul.mubr.msk.f32.gmra.mrb[244].mxu1 %vm431_vm4, %v10172_v18  ;;  %v179_v18 = vld [vmem:[%s6141_s30] sm:$0xff] }
 0x7a1   :  { %7807 = vmatprep.mubr.msk.f32.mxu1 %vm8315_vm0, %v8312_v0  ;;  %7887 = vmatpush3.msra.mxu0 %v179_v18 }
 0x7a2   :  { %v10359_v40 = vpop.f32.mrb[212].mxu0 }
 0x7a3   :  { %v7795_v54 = vpop.f32.mrb[213].mxu0 }
 0x7a4   :  { %7808 = vmatmul.mubr.msk.f32.gmra.mrb[246].mxu1 %vm431_vm4, %v10181_v6 }
 0x7a5   :  { %7810 = vmatprep.mubr.msk.f32.mxu1 %vm8315_vm0, %v8312_v0 }
 0x7a6   :  { %v10365_v15 = vpop.f32.mrb[214].mxu0 }
 0x7a7   :  { %v7798_v28 = vpop.f32.mrb[215].mxu0 }
 0x7a8   :  { %7811 = vmatmul.mubr.msk.f32.gmra.mrb[248].mxu1 %vm431_vm4, %v10190_v50 }
 0x7a9   :  { %7813 = vmatprep.mubr.msk.f32.mxu1 %vm8315_vm0, %v8312_v0 }
 0x7ac   :  { %7814 = vmatmul.mubr.msk.f32.gmra.mrb[250].mxu1 %vm431_vm4, %v10199_v46 }
 0x7ad   :  { %7816 = vmatprep.mubr.msk.f32.mxu1 %vm8315_vm0, %v8312_v0 }
 0x7b0   :  { %7817 = vmatmul.mubr.msk.f32.gmra.mrb[252].mxu1 %vm431_vm4, %v10208_v32 }
 0x7b1   :  { %7819 = vmatprep.mubr.msk.f32.mxu1 %vm8315_vm0, %v8312_v0 }
 0x7b4   :  { %7820 = vmatmul.mubr.msk.f32.gmra.mrb[254].mxu1 %vm431_vm4, %v10217_v38 }
 0x7b5   :  { %7822 = vmatprep.mubr.msk.f32.mxu1 %vm8315_vm0, %v8312_v0 }
 0x7b8   :  { %7823 = vmatmul.mubr.msk.f32.gmra.mrb[0].mxu1 %vm431_vm4, %v10226_v10 }
 0x7b9   :  { %7825 = vmatprep.mubr.msk.f32.mxu1 %vm8315_vm0, %v8312_v0 }
 0x7bc   :  { %7826 = vmatmul.mubr.msk.f32.gmra.mrb[2].mxu1 %vm431_vm4, %v10235_v5 }
 0x7bd   :  { %7859 = vmatprep.mubr.msk.f32.mxu1 %vm8315_vm0, %v8312_v0 }
 0x7c0   :  { %7860 = vmatmul.mubr.msk.f32.vlgmr.msra.gmra.mrb[4].mxu1 %vm431_vm4, %v10244_v61 }
 0x7c1   :  { %7862 = vmatprep.mubr.msk.f32.mxu1 %vm8315_vm0, %v8312_v0 }
 0x7c4   :  { %7863 = vmatmul.mubr.msk.f32.gmra.mrb[6].mxu1 %vm431_vm4, %v10249_v63 }
 0x7c5   :  { %7865 = vmatprep.mubr.msk.f32.mxu1 %vm8315_vm0, %v8312_v0 }
 0x7c8   :  { %7866 = vmatmul.mubr.msk.f32.gmra.mrb[8].mxu1 %vm431_vm4, %v10254_v39 }
 0x7c9   :  { %7868 = vmatprep.mubr.msk.f32.mxu1 %vm8315_vm0, %v8312_v0 }
 0x7cc   :  { %7869 = vmatmul.mubr.msk.f32.gmra.mrb[10].mxu1 %vm431_vm4, %v10259_v4 }
 0x7cd   :  { %7871 = vmatprep.mubr.msk.f32.mxu1 %vm8315_vm0, %v8312_v0 }
 0x7d0   :  { %7872 = vmatmul.mubr.msk.f32.gmra.mrb[12].mxu1 %vm431_vm4, %v10264_v57 }
 0x7d1   :  { %7874 = vmatprep.mubr.msk.f32.mxu1 %vm8315_vm0, %v8312_v0 }
 0x7d4   :  { %7875 = vmatmul.mubr.msk.f32.gmra.mrb[14].mxu1 %vm431_vm4, %v10272_v16 }
 0x7d5   :  { %7877 = vmatprep.mubr.msk.f32.mxu1 %vm8315_vm0, %v8312_v0 }
 0x7d8   :  { %7878 = vmatmul.mubr.msk.f32.gmra.mrb[16].mxu1 %vm431_vm4, %v10285_v24 }
 0x7d9   :  { %7880 = vmatprep.mubr.msk.f32.mxu1 %vm8315_vm0, %v8312_v0 }
 0x7dc   :  { %7881 = vmatmul.mubr.msk.f32.gmra.mrb[18].mxu1 %vm431_vm4, %v10294_v42 }
 0x7dd   :  { %7883 = vmatprep.mubr.msk.f32.mxu1 %vm8315_vm0, %v8312_v0 }
 0x7e0   :  { %7884 = vmatmul.mubr.msk.f32.gmra.mrb[20].mxu1 %vm431_vm4, %v10305_v60  ;;  %vm6093_vm4 = vcmask 162944  }
 0x812   :  { %v10428_v6 = vpop.f32.mrb[216].mxu0 }
 0x813   :  { %v7832_v50 = vpop.f32.mrb[217].mxu0 }
 0x816   :  { %v10430_v46 = vpop.f32.mrb[218].mxu0 }
 0x817   :  { %v7835_v32 = vpop.f32.mrb[219].mxu0 }
 0x81a   :  { %v10432_v38 = vpop.f32.mrb[220].mxu0 }
 0x81b   :  { %v7838_v10 = vpop.f32.mrb[221].mxu0 }
 0x81e   :  { %v10434_v5 = vpop.f32.mrb[222].mxu0 }
 0x81f   :  { %v7841_v61 = vpop.f32.mrb[223].mxu0 }
 0x822   :  { %v10436_v63 = vpop.f32.mrb[224].mxu0 }
 0x823   :  { %v7844_v39 = vpop.f32.mrb[225].mxu0 }
 0x826   :  { %v10438_v4 = vpop.f32.mrb[226].mxu0 }
 0x827   :  { %v7847_v57 = vpop.f32.mrb[227].mxu0 }
 0x82a   :  { %v10440_v16 = vpop.f32.mrb[228].mxu0 }
 0x82b   :  { %v7850_v24 = vpop.f32.mrb[229].mxu0 }
 0x82e   :  { %v10442_v42 = vpop.f32.mrb[230].mxu0 }
 0x82f   :  { %v7853_v60 = vpop.f32.mrb[231].mxu0 }
 0x832   :  { %v10444_v47 = vpop.f32.mrb[232].mxu0 }
 0x833   :  { %v7856_v56 = vpop.f32.mrb[233].mxu0 }
 0x84b   :  { %v5122_v36 = vpop.f32.mrb[224].mxu1 }
 0x84c   :  { %v5260_v17 = vadd.f32 %v10318_v59, %v5122_v36  ;;  %v7745_v13 = vpop.f32.mrb[225].mxu1 }
 0x84e   :  { %v5309_v55 = vadd.f32 %v6488_v30, %v5260_v17 }
 0x84f   :  { %v5127_v22 = vpop.f32.mrb[226].mxu1 }
 0x850   :  { %5956 = vst.msk [vmem:[%s10452_s8] sm:$0xff] %vm1704_vm7, %v5309_v55  ;;  %v5265_v9 = vadd.f32 %v10325_v2, %v5127_v22  ;;  %v7748_v53 = vpop.f32.mrb[227].mxu1  ;;  %7889 = vmatmul.mubr.msk.f32.vlgmr.msra.gmra.mrb[234].mxu0 %vm1704_vm7, %v5309_v55 }
 0x851   :  { %7891 = vmatprep.mubr.msk.f32.mxu0 %vm8315_vm0, %v8312_v0 }
 0x852   :  { %v5310_v34 = vadd.f32 %v6488_v30, %v5265_v9 }
 0x853   :  { %v5132_v7 = vpop.f32.mrb[228].mxu1 }
 0x854   :  { %5957 = vst.msk [vmem:[%s10452_s8 + $0x8] sm:$0xff] %vm1704_vm7, %v5310_v34  ;;  %v5270_v59 = vadd.f32 %v10330_v25, %v5132_v7  ;;  %v7751_v27 = vpop.f32.mrb[229].mxu1  ;;  %7892 = vmatmul.mubr.msk.f32.gmra.mrb[236].mxu0 %vm1704_vm7, %v5310_v34 }
 0x855   :  { %7894 = vmatprep.mubr.msk.f32.mxu0 %vm8315_vm0, %v8312_v0 }
 0x856   :  { %v5311_v2 = vadd.f32 %v6488_v30, %v5270_v59 }
 0x857   :  { %v5137_v35 = vpop.f32.mrb[230].mxu1 }
 0x858   :  { %5958 = vst.msk [vmem:[%s10452_s8 + $0x10] sm:$0xff] %vm1704_vm7, %v5311_v2  ;;  %v5275_v23 = vadd.f32 %v10335_v12, %v5137_v35  ;;  %v7754_v1 = vpop.f32.mrb[231].mxu1  ;;  %7895 = vmatmul.mubr.msk.f32.gmra.mrb[238].mxu0 %vm1704_vm7, %v5311_v2 }
 0x859   :  { %7897 = vmatprep.mubr.msk.f32.mxu0 %vm8315_vm0, %v8312_v0 }
 0x85a   :  { %v5312_v3 = vadd.f32 %v6488_v30, %v5275_v23 }
 0x85b   :  { %v5142_v19 = vpop.f32.mrb[232].mxu1 }
 0x85c   :  { %5959 = vst.msk [vmem:[%s10452_s8 + $0x18] sm:$0xff] %vm1704_vm7, %v5312_v3  ;;  %v5280_v25 = vadd.f32 %v10340_v37, %v5142_v19  ;;  %v7757_v44 = vpop.f32.mrb[233].mxu1  ;;  %7898 = vmatmul.mubr.msk.f32.gmra.mrb[240].mxu0 %vm1704_vm7, %v5312_v3 }
 0x85d   :  { %7900 = vmatprep.mubr.msk.f32.mxu0 %vm8315_vm0, %v8312_v0 }
 0x85e   :  { %v5313_v8 = vadd.f32 %v6488_v30, %v5280_v25  ;;  %v10545_v25 = vld [vmem:[%s6142_s14] ss:$0 sm:$0xff] }
 0x85f   :  { %v5147_v43 = vpop.f32.mrb[234].mxu1 }
 0x860   :  { %5960 = vst.msk [vmem:[%s10452_s8 + $0x20] sm:$0xff] %vm1704_vm7, %v5313_v8  ;;  %v5285_v14 = vadd.f32 %v10345_v26, %v5147_v43  ;;  %v7760_v31 = vpop.f32.mrb[235].mxu1  ;;  %7901 = vmatmul.mubr.msk.f32.gmra.mrb[242].mxu0 %vm1704_vm7, %v5313_v8 }
 0x861   :  { %7903 = vmatprep.mubr.msk.f32.mxu0 %vm8315_vm0, %v8312_v0 }
 0x862   :  { %v5314_v11 = vadd.f32 %v6488_v30, %v5285_v14 }
 0x863   :  { %v5152_v12 = vpop.f32.mrb[236].mxu1 }
 0x864   :  { %5961 = vst.msk [vmem:[%s10452_s8 + $0x28] sm:$0xff] %vm1704_vm7, %v5314_v11  ;;  %v5290_v48 = vadd.f32 %v10353_v41, %v5152_v12  ;;  %v7763_v62 = vpop.f32.mrb[237].mxu1  ;;  %7904 = vmatmul.mubr.msk.f32.gmra.mrb[244].mxu0 %vm1704_vm7, %v5314_v11 }
 0x865   :  { %7906 = vmatprep.mubr.msk.f32.mxu0 %vm8315_vm0, %v8312_v0 }
 0x866   :  { %v5315_v20 = vadd.f32 %v6488_v30, %v5290_v48 }
 0x867   :  { %v5157_v33 = vpop.f32.mrb[238].mxu1 }
 0x868   :  { %5962 = vst.msk [vmem:[%s10452_s8 + $0x30] sm:$0xff] %vm1704_vm7, %v5315_v20  ;;  %v5295_v58 = vadd.f32 %v10359_v40, %v5157_v33  ;;  %v7766_v51 = vpop.f32.mrb[239].mxu1  ;;  %7907 = vmatmul.mubr.msk.f32.gmra.mrb[246].mxu0 %vm1704_vm7, %v5315_v20 }
 0x869   :  { %7909 = vmatprep.mubr.msk.f32.mxu0 %vm8315_vm0, %v8312_v0 }
 0x86a   :  { %v5316_v37 = vadd.f32 %v6488_v30, %v5295_v58 }
 0x86b   :  { %v5162_v45 = vpop.f32.mrb[240].mxu1 }
 0x86c   :  { %5963 = vst.msk [vmem:[%s10452_s8 + $0x38] sm:$0xff] %vm1704_vm7, %v5316_v37  ;;  %v5300_v52 = vadd.f32 %v10365_v15, %v5162_v45  ;;  %v7769_v21 = vpop.f32.mrb[241].mxu1  ;;  %7910 = vmatmul.mubr.msk.f32.gmra.mrb[248].mxu0 %vm1704_vm7, %v5316_v37 }
 0x86d   :  { %7912 = vmatprep.mubr.msk.f32.mxu0 %vm8315_vm0, %v8312_v0  ;;  %vm6001_vm0 = vcmask 97344  }
 0x86e   :  { %v5317_v26 = vadd.f32 %v6488_v30, %v5300_v52 }
 0x86f   :  { %v10503_v49 = vpop.f32.mrb[242].mxu1 }
 0x870   :  { %5964 = vst.msk [vmem:[%s10452_s8 + $0x40] sm:$0xff] %vm1704_vm7, %v5317_v26  ;;  %v7803_v41 = vpop.f32.mrb[243].mxu1  ;;  %7913 = vmatmul.mubr.msk.f32.gmra.mrb[250].mxu0 %vm1704_vm7, %v5317_v26 }
 0x873   :  { %v10508_v29 = vpop.f32.mrb[244].mxu1 }
 0x874   :  { %v7806_v40 = vpop.f32.mrb[245].mxu1 }
 0x877   :  { %v10510_v54 = vpop.f32.mrb[246].mxu1 }
 0x878   :  { %v7809_v15 = vpop.f32.mrb[247].mxu1 }
 0x87b   :  { %v10512_v28 = vpop.f32.mrb[248].mxu1 }
 0x87c   :  { %v7812_v18 = vpop.f32.mrb[249].mxu1 }
 0x87f   :  { %v10514_v50 = vpop.f32.mrb[250].mxu1 }
 0x880   :  { %v7815_v0 = vpop.f32.mrb[251].mxu1 }
 0x883   :  { %v10516_v32 = vpop.f32.mrb[252].mxu1 }
 0x884   :  { %v7818_v10 = vpop.f32.mrb[253].mxu1 }
 0x887   :  { %v10518_v61 = vpop.f32.mrb[254].mxu1 }
 0x888   :  { %v7821_v39 = vpop.f32.mrb[255].mxu1 }
 0x88b   :  { %v10520_v57 = vpop.f32.mrb[0].mxu1 }
 0x88c   :  { %v7824_v24 = vpop.f32.mrb[1].mxu1 }
 0x88f   :  { %v10522_v60 = vpop.f32.mrb[2].mxu1 }
 0x890   :  { %v7827_v56 = vpop.f32.mrb[3].mxu1 }
 0x893   :  { %v10524_v30 = vpop.f32.mrb[4].mxu1 }
 0x894   :  { %v7861_v36 = vpop.f32.mrb[5].mxu1 }
 0x897   :  { %v10526_v17 = vpop.f32.mrb[6].mxu1 }
 0x898   :  { %v7864_v13 = vpop.f32.mrb[7].mxu1 }
 0x89b   :  { %v10528_v55 = vpop.f32.mrb[8].mxu1 }
 0x89c   :  { %v7867_v22 = vpop.f32.mrb[9].mxu1 }
 0x89f   :  { %v10530_v9 = vpop.f32.mrb[10].mxu1 }
 0x8a0   :  { %v7870_v53 = vpop.f32.mrb[11].mxu1 }
 0x8a3   :  { %v10532_v34 = vpop.f32.mrb[12].mxu1 }
 0x8a4   :  { %v7873_v7 = vpop.f32.mrb[13].mxu1 }
 0x8a7   :  { %v10534_v59 = vpop.f32.mrb[14].mxu1 }
 0x8a8   :  { %v7876_v27 = vpop.f32.mrb[15].mxu1 }
 0x8ab   :  { %v10536_v2 = vpop.f32.mrb[16].mxu1 }
 0x8ac   :  { %v7879_v35 = vpop.f32.mrb[17].mxu1 }
 0x8af   :  { %v10538_v23 = vpop.f32.mrb[18].mxu1 }
 0x8b0   :  { %v7882_v1 = vpop.f32.mrb[19].mxu1 }
 0x8b3   :  { %v10540_v3 = vpop.f32.mrb[20].mxu1 }
 0x8b4   :  { %v7885_v19 = vpop.f32.mrb[21].mxu1 }
 0x923   :  { %v5831_v44 = vpop.f32.mrb[234].mxu0 }
 0x924   :  { %v5832_v8 = vadd.f32 %v10545_v25, %v5831_v44  ;;  %v7890_v43 = vpop.f32.mrb[235].mxu0 }
 0x926   :  { %v6529_v14 = vmul.f32 -1.442695, %v5832_v8 }
 0x927   :  { %v5836_v31 = vpop.f32.mrb[236].mxu0 }
 0x928   :  { %8276 = vpow2.f32 %v6529_v14  ;;  %v5837_v11 = vadd.f32 %v10545_v25, %v5836_v31  ;;  %v7893_v12 = vpop.f32.mrb[237].mxu0 }
 0x92a   :  { %v6530_v48 = vmul.f32 -1.442695, %v5837_v11 }
 0x92b   :  { %v5841_v62 = vpop.f32.mrb[238].mxu0 }
 0x92c   :  { %8278 = vpow2.f32 %v6530_v48  ;;  %v5842_v20 = vadd.f32 %v10545_v25, %v5841_v62  ;;  %v7896_v33 = vpop.f32.mrb[239].mxu0 }
 0x92e   :  { %v6531_v58 = vmul.f32 -1.442695, %v5842_v20 }
 0x92f   :  { %v5846_v51 = vpop.f32.mrb[240].mxu0 }
 0x930   :  { %8280 = vpow2.f32 %v6531_v58  ;;  %v5847_v37 = vadd.f32 %v10545_v25, %v5846_v51  ;;  %v7899_v45 = vpop.f32.mrb[241].mxu0 }
 0x932   :  { %v8277_v52 = vpop.eup %8276  ;;  %v6532_v21 = vmul.f32 -1.442695, %v5847_v37 }
 0x933   :  { %v5902_v26 = vadd.f32 1.0, %v8277_v52  ;;  %v5851_v41 = vpop.f32.mrb[242].mxu0 }
 0x934   :  { %8282 = vpow2.f32 %v6532_v21  ;;  %v5852_v40 = vadd.f32 %v10545_v25, %v5851_v41  ;;  %v7902_v15 = vpop.f32.mrb[243].mxu0 }
 0x935   :  { %8284 = vrcp.f32 %v5902_v26 }
 0x936   :  { %v8279_v18 = vpop.eup %8278  ;;  %v6533_v0 = vmul.f32 -1.442695, %v5852_v40 }
 0x937   :  { %v5903_v10 = vadd.f32 1.0, %v8279_v18  ;;  %v5856_v39 = vpop.f32.mrb[244].mxu0 }
 0x938   :  { %8286 = vpow2.f32 %v6533_v0  ;;  %v5857_v24 = vadd.f32 %v10545_v25, %v5856_v39  ;;  %v7905_v56 = vpop.f32.mrb[245].mxu0 }
 0x939   :  { %8288 = vrcp.f32 %v5903_v10 }
 0x93a   :  { %v8281_v36 = vpop.eup %8280  ;;  %v6534_v13 = vmul.f32 -1.442695, %v5857_v24 }
 0x93b   :  { %v5904_v22 = vadd.f32 1.0, %v8281_v36  ;;  %v5861_v53 = vpop.f32.mrb[246].mxu0 }
 0x93c   :  { %8290 = vpow2.f32 %v6534_v13  ;;  %v5862_v7 = vadd.f32 %v10545_v25, %v5861_v53  ;;  %v7908_v27 = vpop.f32.mrb[247].mxu0 }
 0x93d   :  { %8292 = vrcp.f32 %v5904_v22 }
 0x93e   :  { %v8283_v35 = vpop.eup %8282  ;;  %v6535_v1 = vmul.f32 -1.442695, %v5862_v7 }
 0x93f   :  { %v8285_v19 = vpop.eup %8284  ;;  %v5905_v44 = vadd.f32 1.0, %v8283_v35  ;;  %v5866_v8 = vpop.f32.mrb[248].mxu0 }
 0x940   :  { %8294 = vpow2.f32 %v6535_v1  ;;  %v5867_v43 = vadd.f32 %v10545_v25, %v5866_v8  ;;  %v7911_v14 = vpop.f32.mrb[249].mxu0  ;;  %v5938_v31 = vmul.f32 %v8285_v19, %v10428_v6  ;;  %v5929_v11 = vmul.f32 %v8285_v19, %v10503_v49 }
 0x941   :  { %8296 = vrcp.f32 %v5905_v44  ;;  %v5947_v12 = vmul.f32 %v8285_v19, %v10524_v30 }
 0x942   :  { %v8287_v48 = vpop.eup %8286  ;;  %v6536_v62 = vmul.f32 -1.442695, %v5867_v43  ;;  %6020 = vrot.lane.b32.xlu1 %v5938_v31, %s8316_s11  ;;  %5974 = vrot.lane.b32.xlu0 %v5929_v11, %s8332_s17 }
 0x943   :  { %v8289_v20 = vpop.eup %8288  ;;  %v5906_v33 = vadd.f32 1.0, %v8287_v48  ;;  %v5871_v58 = vpop.f32.mrb[250].mxu0 }
 0x944   :  { %8298 = vpow2.f32 %v6536_v62  ;;  %v5872_v51 = vadd.f32 %v10545_v25, %v5871_v58  ;;  %v7914_v37 = vpop.f32.mrb[251].mxu0  ;;  %v5948_v6 = vmul.f32 %v8289_v20, %v10526_v17  ;;  %v5930_v49 = vmul.f32 %v8289_v20, %v10508_v29 }
 0x945   :  { %8300 = vrcp.f32 %v5906_v33  ;;  %v5939_v30 = vmul.f32 %v8289_v20, %v10430_v46 }
 0x946   :  { %v8291_v45 = vpop.eup %8290  ;;  %v6537_v52 = vmul.f32 -1.442695, %v5872_v51  ;;  %6066 = vrot.lane.b32.xlu0 %v5947_v12, %s8323_s9  ;;  %6068 = vrot.lane.b32.xlu1 %v5948_v6, %s8323_s9 }
 0x947   :  { %v8293_v21 = vpop.eup %8292  ;;  %v5907_v26 = vadd.f32 1.0, %v8291_v45 }
 0x948   :  { %8302 = vpow2.f32 %v6537_v52  ;;  %v5931_v41 = vmul.f32 %v8293_v21, %v10510_v54  ;;  %v5940_v25 = vmul.f32 %v8293_v21, %v10432_v38  ;;  %v5949_v17 = vmul.f32 %v8293_v21, %v10528_v55 }
 0x949   :  { %8304 = vrcp.f32 %v5907_v26 }
 0x94a   :  { %v8295_v29 = vpop.eup %8294  ;;  %5976 = vrot.lane.b32.xlu0 %v5930_v49, %s8332_s17  ;;  %5978 = vrot.lane.b32.xlu1 %v5931_v41, %s8332_s17 }
 0x94b   :  { %v8297_v46 = vpop.eup %8296  ;;  %v5908_v40 = vadd.f32 1.0, %v8295_v29 }
 0x94c   :  { %v5932_v15 = vmul.f32 %v8297_v46, %v10512_v28  ;;  %v5941_v18 = vmul.f32 %v8297_v46, %v10434_v5  ;;  %v5950_v0 = vmul.f32 %v8297_v46, %v10530_v9 }
 0x94d   :  { %8306 = vrcp.f32 %v5908_v40 }
 0x94e   :  { %v8299_v54 = vpop.eup %8298  ;;  %6022 = vrot.lane.b32.xlu0 %v5939_v30, %s8316_s11  ;;  %6024 = vrot.lane.b32.xlu1 %v5940_v25, %s8316_s11 }
 0x94f   :  { %v8301_v38 = vpop.eup %8300  ;;  %v5909_v55 = vadd.f32 1.0, %v8299_v54 }
 0x950   :  { %v5933_v10 = vmul.f32 %v8301_v38, %v10514_v50  ;;  %v5942_v39 = vmul.f32 %v8301_v38, %v10436_v63  ;;  %v5951_v24 = vmul.f32 %v8301_v38, %v10532_v34 }
 0x951   :  { %8308 = vrcp.f32 %v5909_v55 }
 0x952   :  { %v8303_v28 = vpop.eup %8302  ;;  %5980 = vrot.lane.b32.xlu1 %v5932_v15, %s8332_s17  ;;  %6070 = vrot.lane.b32.xlu0 %v5949_v17, %s8323_s9 }
 0x953   :  { %v8305_v5 = vpop.eup %8304  ;;  %v5910_v9 = vadd.f32 1.0, %v8303_v28 }
 0x954   :  { %v5934_v56 = vmul.f32 %v8305_v5, %v10516_v32  ;;  %v5943_v36 = vmul.f32 %v8305_v5, %v10438_v4  ;;  %v5952_v13 = vmul.f32 %v8305_v5, %v10534_v59 }
 0x955   :  { %8310 = vrcp.f32 %v5910_v9 }
 0x956   :  { %6026 = vrot.lane.b32.xlu0 %v5941_v18, %s8316_s11  ;;  %6072 = vrot.lane.b32.xlu1 %v5950_v0, %s8323_s9 }
 0x957   :  { %v8307_v63 = vpop.eup %8306 }
 0x958   :  { %v5935_v50 = vmul.f32 %v8307_v63, %v10518_v61  ;;  %v5944_v34 = vmul.f32 %v8307_v63, %v10440_v16  ;;  %v5953_v22 = vmul.f32 %v8307_v63, %v10536_v2 }
 0x95a   :  { %5982 = vrot.lane.b32.xlu0 %v5933_v10, %s8332_s17  ;;  %6028 = vrot.lane.b32.xlu1 %v5942_v39, %s8316_s11 }
 0x95b   :  { %v8309_v32 = vpop.eup %8308 }
 0x95c   :  { %v5936_v4 = vmul.f32 %v8309_v32, %v10520_v57  ;;  %v5945_v59 = vmul.f32 %v8309_v32, %v10442_v42  ;;  %v5954_v53 = vmul.f32 %v8309_v32, %v10538_v23 }
 0x95e   :  { %5984 = vrot.lane.b32.xlu1 %v5934_v56, %s8332_s17  ;;  %6074 = vrot.lane.b32.xlu0 %v5951_v24, %s8323_s9 }
 0x95f   :  { %v8311_v61 = vpop.eup %8310 }
 0x960   :  { %v5946_v16 = vmul.f32 %v8311_v61, %v10444_v47  ;;  %v5937_v2 = vmul.f32 %v8311_v61, %v10522_v60  ;;  %v5955_v7 = vmul.f32 %v8311_v61, %v10540_v3 }
 0x962   :  { %6030 = vrot.lane.b32.xlu0 %v5943_v36, %s8316_s11  ;;  %6076 = vrot.lane.b32.xlu1 %v5952_v13, %s8323_s9 }
 0x966   :  { %5986 = vrot.lane.b32.xlu0 %v5935_v50, %s8332_s17  ;;  %6032 = vrot.lane.b32.xlu1 %v5944_v34, %s8316_s11 }
 0x96a   :  { %5988 = vrot.lane.b32.xlu1 %v5936_v4, %s8332_s17  ;;  %6078 = vrot.lane.b32.xlu0 %v5953_v22, %s8323_s9 }
 0x96e   :  { %6036 = vrot.lane.b32.xlu1 %v5946_v16, %s8316_s11  ;;  %6034 = vrot.lane.b32.xlu0 %v5945_v59, %s8316_s11 }
 0x972   :  { %5990 = vrot.lane.b32.xlu0 %v5937_v2, %s8332_s17  ;;  %6080 = vrot.lane.b32.xlu1 %v5954_v53, %s8323_s9 }
 0x976   :  { %6082 = vrot.lane.b32.xlu0 %v5955_v7, %s8323_s9 }
 0x9b4   :  { %v6021_v42 = vpop.permute.xlu1 %6020  ;;  %v5975_v47 = vpop.permute.xlu0 %5974 }
 0x9b5   :  { %6002 = vst.msk [vmem:[%s10452_s8] sm:$0xff] %vm6001_vm0, %v5975_v47 }
 0x9b6   :  { %6048 = vst.msk [vmem:[%s10452_s8] sm:$0xff] %vm6047_vm3, %v6021_v42 }
 0x9b8   :  { %v6067_v57 = vpop.permute.xlu0 %6066  ;;  %v6069_v60 = vpop.permute.xlu1 %6068 }
 0x9b9   :  { %6094 = vst.msk [vmem:[%s10452_s8] sm:$0xff] %vm6093_vm4, %v6067_v57 }
 0x9bc   :  { %v5977_v23 = vpop.permute.xlu0 %5976  ;;  %v5979_v3 = vpop.permute.xlu1 %5978 }
 0x9bd   :  { %6003 = vst.msk [vmem:[%s10452_s8 + $0x8] sm:$0xff] %vm6001_vm0, %v5977_v23  ;;  %6004 = vst.msk [vmem:[%s10452_s8 + $0x10] sm:$0xff] %vm6001_vm0, %v5979_v3 }
 0x9c0   :  { %v6023_v27 = vpop.permute.xlu0 %6022  ;;  %v6025_v35 = vpop.permute.xlu1 %6024 }
 0x9c1   :  { %6049 = vst.msk [vmem:[%s10452_s8 + $0x8] sm:$0xff] %vm6047_vm3, %v6023_v27  ;;  %6050 = vst.msk [vmem:[%s10452_s8 + $0x10] sm:$0xff] %vm6047_vm3, %v6025_v35 }
 0x9c2   :  { %6095 = vst.msk [vmem:[%s10452_s8 + $0x8] sm:$0xff] %vm6093_vm4, %v6069_v60 }
 0x9c4   :  { %v5981_v1 = vpop.permute.xlu1 %5980  ;;  %v6071_v19 = vpop.permute.xlu0 %6070 }
 0x9c5   :  { %6005 = vst.msk [vmem:[%s10452_s8 + $0x18] sm:$0xff] %vm6001_vm0, %v5981_v1 }
 0x9c6   :  { %6096 = vst.msk [vmem:[%s10452_s8 + $0x10] sm:$0xff] %vm6093_vm4, %v6071_v19 }
 0x9c8   :  { %v6027_v44 = vpop.permute.xlu0 %6026  ;;  %v6073_v8 = vpop.permute.xlu1 %6072 }
 0x9c9   :  { %6051 = vst.msk [vmem:[%s10452_s8 + $0x18] sm:$0xff] %vm6047_vm3, %v6027_v44 }
 0x9ca   :  { %6097 = vst.msk [vmem:[%s10452_s8 + $0x18] sm:$0xff] %vm6093_vm4, %v6073_v8 }
 0x9cc   :  { %v5983_v43 = vpop.permute.xlu0 %5982  ;;  %v6029_v14 = vpop.permute.xlu1 %6028 }
 0x9cd   :  { %6006 = vst.msk [vmem:[%s10452_s8 + $0x20] sm:$0xff] %vm6001_vm0, %v5983_v43 }
 0x9ce   :  { %6052 = vst.msk [vmem:[%s10452_s8 + $0x20] sm:$0xff] %vm6047_vm3, %v6029_v14 }
 0x9d0   :  { %v5985_v31 = vpop.permute.xlu1 %5984  ;;  %v6075_v11 = vpop.permute.xlu0 %6074 }
 0x9d1   :  { %6007 = vst.msk [vmem:[%s10452_s8 + $0x28] sm:$0xff] %vm6001_vm0, %v5985_v31 }
 0x9d2   :  { %6098 = vst.msk [vmem:[%s10452_s8 + $0x20] sm:$0xff] %vm6093_vm4, %v6075_v11 }
 0x9d4   :  { %v6031_v12 = vpop.permute.xlu0 %6030  ;;  %v6077_v48 = vpop.permute.xlu1 %6076 }
 0x9d5   :  { %6053 = vst.msk [vmem:[%s10452_s8 + $0x28] sm:$0xff] %vm6047_vm3, %v6031_v12 }
 0x9d6   :  { %6099 = vst.msk [vmem:[%s10452_s8 + $0x28] sm:$0xff] %vm6093_vm4, %v6077_v48 }
 0x9d8   :  { %v5987_v62 = vpop.permute.xlu0 %5986  ;;  %v6033_v20 = vpop.permute.xlu1 %6032 }
 0x9d9   :  { %6008 = vst.msk [vmem:[%s10452_s8 + $0x30] sm:$0xff] %vm6001_vm0, %v5987_v62 }
 0x9da   :  { %6054 = vst.msk [vmem:[%s10452_s8 + $0x30] sm:$0xff] %vm6047_vm3, %v6033_v20 }
 0x9dc   :  { %v5989_v33 = vpop.permute.xlu1 %5988  ;;  %v6079_v58 = vpop.permute.xlu0 %6078 }
 0x9dd   :  { %6009 = vst.msk [vmem:[%s10452_s8 + $0x38] sm:$0xff] %vm6001_vm0, %v5989_v33 }
 0x9de   :  { %6100 = vst.msk [vmem:[%s10452_s8 + $0x30] sm:$0xff] %vm6093_vm4, %v6079_v58 }
 0x9e0   :  { %v6037_v51 = vpop.permute.xlu1 %6036  ;;  %v6035_v37 = vpop.permute.xlu0 %6034 }
 0x9e1   :  { %6055 = vst.msk [vmem:[%s10452_s8 + $0x38] sm:$0xff] %vm6047_vm3, %v6035_v37 }
 0x9e4   :  { %v5991_v6 = vpop.permute.xlu0 %5990  ;;  %v6081_v49 = vpop.permute.xlu1 %6080 }
 0x9e5   :  { %6010 = vst.msk [vmem:[%s10452_s8 + $0x40] sm:$0xff] %vm6001_vm0, %v5991_v6 }
 0x9e6   :  { %6101 = vst.msk [vmem:[%s10452_s8 + $0x38] sm:$0xff] %vm6093_vm4, %v6081_v49 }
 0x9e7   :  { %6056 = vst.msk [vmem:[%s10452_s8 + $0x40] sm:$0xff] %vm6047_vm3, %v6037_v51 }
 0x9e8   :  { %v6083_v30 = vpop.permute.xlu0 %6082 }
 0x9e9   :  { %6102 = vst.msk [vmem:[%s10452_s8 + $0x40] sm:$0xff] %vm6093_vm4, %v6083_v30 }

</bundles_post_ra>
